<compile_context>
chip_gen: v7x
topology: tpu7x:2x2x1
jax: 0.10.0
libtpu: 0.0.40
codegen_flags: <defaults>
</compile_context>

<pallas_src>
import functools

import jax
import jax.numpy as jnp
from jax.experimental import pallas as pl
from jax.experimental.pallas import tpu as pltpu

_BN_EPS = 1e-5


def _round_up(x, m):
    return ((x + m - 1) // m) * m


def _lane_pad(c):
    # Lane-dense padding only pays off for reasonably wide channel dims.
    return c if c < 64 else _round_up(c, 128)


# ------------------------------ Pallas kernel --------------------------------
def _fused_double_conv_kernel(xp_ref, w1_ref, w2_ref,
                              r1_ref, s1_ref, b1_ref, r2_ref, s2_ref, b2_ref,
                              out_ref,
                              xw1_ref, h1p_ref, xw2_ref, *, h_img):
    """One grid step = one `row_tile`-row strip of one example.

    xp_ref : (1, Hp+4, W+2, Cin)  NHWC input, rows padded by 2, cols by 1 (resident
                                  per example; rows sliced dynamically per strip)
    w1_ref : (3, 3*Cin,  MIDP)    shared conv1 weights, [ky, kx*Cin+c, m]  (resident)
    w2_ref : (3, 3*MIDP, OUTP)    shared conv2 weights, [ky, kx*MIDP+m, o] (resident)
    r1/s1/b1/r2/s2/b2 : (N, C)    per-example BatchEnsemble/BN vectors, f32, resident
    out_ref: (1, TH, W, OUTP)     output strip, compute_dtype
    xw1_ref: ((TH+4)*W, 3*Cin)    kx-im2col of the input strip      (VMEM scratch)
    h1p_ref: (TH+2, W+2, MIDP)    zero-col-bordered intermediate h1 (VMEM scratch)
    xw2_ref: ((TH+2)*W, 3*MIDP)   kx-im2col of h1                   (VMEM scratch)
    """
    n = pl.program_id(0)          # example
    r = pl.program_id(1)          # row tile
    _, th, w, outp = out_ref.shape
    cin = r1_ref.shape[1]
    midp = s1_ref.shape[1]
    cdt = xw1_ref.dtype
    m1 = (th + 2) * w             # h1 rows per strip (incl. +-1 halo) * W
    m2 = th * w                   # output rows per strip * W

    row0 = r * th
    if th % 8 == 0:
        row0 = pl.multiple_of(row0, 8)

    # ---------------- layer 1: conv3x3 (+ BatchEnsemble r folded in) ----------
    r1 = r1_ref[n]                                              # (Cin,) f32
    for kx in range(3):
        xt = xp_ref[0, pl.ds(row0, th + 4), kx:kx + w, :]       # (TH+4, W, Cin)
        xw1_ref[:, kx * cin:(kx + 1) * cin] = (
            (xt * r1).astype(cdt).reshape((th + 4) * w, cin))
    acc1 = jnp.zeros((m1, midp), jnp.float32)
    for ky in range(3):                                         # 3 matmuls, K=3*Cin
        acc1 = acc1 + jnp.dot(xw1_ref[ky * w: ky * w + m1, :], w1_ref[ky],
                              preferred_element_type=jnp.float32)
    # f32 epilogue: BN/s scale + bias + ReLU, then fold layer-2 r scale.
    h1 = jnp.maximum(acc1 * s1_ref[n] + b1_ref[n], 0.0) * r2_ref[n]
    # Zero h1 halo rows that fall outside the image (layer-2 'same' padding).
    jrow = jax.lax.broadcasted_iota(jnp.int32, (th + 2, 1, 1), 0)
    gsrc = r * th - 1 + jrow
    valid = jnp.logical_and(gsrc >= 0, gsrc < h_img)
    h1p_ref[:, 1:w + 1, :] = jnp.where(
        valid, h1.reshape(th + 2, w, midp), 0.0).astype(cdt)
    zcol = jnp.zeros((th + 2, 1, midp), cdt)                    # border strips only
    h1p_ref[:, 0:1, :] = zcol
    h1p_ref[:, w + 1:w + 2, :] = zcol

    # ---------------- layer 2: conv3x3 on the VMEM-resident intermediate ------
    for kx in range(3):
        xw2_ref[:, kx * midp:(kx + 1) * midp] = (
            h1p_ref[:, kx:kx + w, :].reshape(m1, midp))
    acc2 = jnp.zeros((m2, outp), jnp.float32)
    for ky in range(3):                                         # 3 matmuls, K=3*MIDP
        acc2 = acc2 + jnp.dot(xw2_ref[ky * w: ky * w + m2, :], w2_ref[ky],
                              preferred_element_type=jnp.float32)
    y = jnp.maximum(acc2 * s2_ref[n] + b2_ref[n], 0.0)
    out_ref[...] = y.reshape(1, th, w, outp).astype(out_ref.dtype)


def _pick_row_tile(h, w, cin, midp, outp, itemsize, budget=8 << 20):
    th = min(h, 128)
    while True:
        scratch = ((th + 4) * w * 3 * cin
                   + (th + 2) * (w + 2) * midp
                   + (th + 2) * w * 3 * midp) * itemsize
        accs = 4 * ((th + 2) * w * midp + th * w * outp)
        if scratch + accs <= budget or th <= 8:
            return th
        th = max(8, (th + 1) // 2)


def _fused_double_conv(xp, w1k, w2k, r1, s1, b1, r2, s2, b2,
                       h_img, w, th, compute_dtype):
    n, hp4, wp2, cin = xp.shape
    hp = hp4 - 4
    midp = s1.shape[1]
    outp = s2.shape[1]
    rt = hp // th
    item = jnp.dtype(compute_dtype).itemsize

    resident = (
        2 * hp4 * wp2 * cin * item
        + 2 * 3 * 3 * cin * midp * item
        + 2 * 3 * 3 * midp * outp * item
        + 2 * th * w * outp * item
        + ((th + 4) * w * 3 * cin
           + (th + 2) * (w + 2) * midp
           + (th + 2) * w * 3 * midp) * item
        + 4 * ((th + 2) * w * midp + th * w * outp))
    vmem_limit = int(min(100 * 2 ** 20, max(32 * 2 ** 20, 2 * resident)))

    kernel = functools.partial(_fused_double_conv_kernel, h_img=h_img)
    return pl.pallas_call(
        kernel,
        out_shape=jax.ShapeDtypeStruct((n, hp, w, outp), compute_dtype),
        grid=(n, rt),
        in_specs=[
            pl.BlockSpec((1, hp4, wp2, cin), lambda i, r: (i, 0, 0, 0)),   # x (per ex.)
            pl.BlockSpec((3, 3 * cin, midp), lambda i, r: (0, 0, 0)),      # W1 shared
            pl.BlockSpec((3, 3 * midp, outp), lambda i, r: (0, 0, 0)),     # W2 shared
            pl.BlockSpec((n, cin), lambda i, r: (0, 0)),                   # r1
            pl.BlockSpec((n, midp), lambda i, r: (0, 0)),                  # s1_eff
            pl.BlockSpec((n, midp), lambda i, r: (0, 0)),                  # b1_eff
            pl.BlockSpec((n, midp), lambda i, r: (0, 0)),                  # r2
            pl.BlockSpec((n, outp), lambda i, r: (0, 0)),                  # s2_eff
            pl.BlockSpec((n, outp), lambda i, r: (0, 0)),                  # b2_eff
        ],
        out_specs=pl.BlockSpec((1, th, w, outp), lambda i, r: (i, r, 0, 0)),
        scratch_shapes=[
            pltpu.VMEM(((th + 4) * w, 3 * cin), compute_dtype),   # layer-1 kx-im2col
            pltpu.VMEM((th + 2, w + 2, midp), compute_dtype),     # bordered h1
            pltpu.VMEM(((th + 2) * w, 3 * midp), compute_dtype),  # layer-2 kx-im2col
        ],
        compiler_params=pltpu.CompilerParams(
            dimension_semantics=("parallel", "parallel"),
            vmem_limit_bytes=vmem_limit),
    )(xp, w1k, w2k, r1, s1, b1, r2, s2, b2)


# -------------------------------- JAX glue ------------------------------------
def _expand_group(p, batch, num_estimators):
    """torch.repeat_interleave(p, batch//M) (+ wraparound for the remainder)."""
    epe = batch // num_estimators
    extra = batch % num_estimators
    out = jnp.repeat(p, epe, axis=0)
    if extra:
        out = jnp.concatenate([out, out[:extra]], axis=0)
    return out


def _prep_conv_weight(w, cin_pad, cout_pad, dtype):
    """(cout, cin, 3, 3) -> (3, 3*cin_pad, cout_pad) with [ky, kx*cin + c, o]."""
    cout, cin = w.shape[0], w.shape[1]
    wt = jnp.transpose(w, (2, 3, 1, 0))                       # (ky, kx, cin, cout)
    wt = jnp.pad(wt, ((0, 0), (0, 0),
                      (0, cin_pad - cin), (0, cout_pad - cout)))
    return wt.reshape(3, 3 * cin_pad, cout_pad).astype(dtype)


def _fold_vectors(r_g, s_g, b_g, gamma, beta, mean, var,
                  batch, num_estimators, cin_pad, cout_pad):
    """Per-example f32 vectors: r (input scale), s_eff = s*BN-scale, bias_eff."""
    scale = gamma * jax.lax.rsqrt(var + _BN_EPS)
    r_b = _expand_group(r_g, batch, num_estimators)
    s_b = _expand_group(s_g, batch, num_estimators) * scale
    b_b = (_expand_group(b_g, batch, num_estimators) - mean) * scale + beta
    r_b = jnp.pad(r_b, ((0, 0), (0, cin_pad - r_b.shape[1])))
    s_b = jnp.pad(s_b, ((0, 0), (0, cout_pad - s_b.shape[1])))
    b_b = jnp.pad(b_b, ((0, 0), (0, cout_pad - b_b.shape[1])))
    return (r_b.astype(jnp.float32), s_b.astype(jnp.float32),
            b_b.astype(jnp.float32))


def _interp_matrix(size_in, size_out, dtype=jnp.float32):
    """Linear interpolation matrix, align_corners=True."""
    if size_in == 1:
        return jnp.ones((size_out, 1), dtype)
    coords = jnp.arange(size_out, dtype=dtype) * (size_in - 1) / (size_out - 1)
    lo = jnp.clip(jnp.floor(coords).astype(jnp.int32), 0, size_in - 2)
    frac = coords - lo.astype(dtype)
    rows = jnp.arange(size_out)
    a = jnp.zeros((size_out, size_in), dtype)
    a = a.at[rows, lo].set(1.0 - frac)
    a = a.at[rows, lo + 1].add(frac)
    return a


def _bilinear_up2_nhwc(x):
    n, h, w, c = x.shape
    ah = _interp_matrix(h, 2 * h)
    aw = _interp_matrix(w, 2 * w)
    y = jnp.einsum("ph,nhwc->npwc", ah, x)
    return jnp.einsum("qw,npwc->npqc", aw, y)


# ------------------------------- _Up forward ----------------------------------
def up_forward(params, x1, x2, num_estimators,
               compute_dtype=jnp.float32, row_tile=None):
    """_Up(bilinear=True).forward — x1, x2 are NCHW (PyTorch convention)."""
    x1 = jnp.transpose(x1, (0, 2, 3, 1))
    x2 = jnp.transpose(x2, (0, 2, 3, 1))

    x1u = _bilinear_up2_nhwc(x1)
    diff_y = x2.shape[1] - x1u.shape[1]
    diff_x = x2.shape[2] - x1u.shape[2]
    # Literal F.pad(x1, [diff_x//2, diff_y//2, diff_x - diff_x//2, diff_y - diff_y//2])
    x1u = jnp.pad(x1u, ((0, 0),
                        (diff_x - diff_x // 2, diff_y - diff_y // 2),   # H
                        (diff_x // 2, diff_y // 2),                     # W
                        (0, 0)))
    x = jnp.concatenate([x2, x1u], axis=-1)

    n, h, w, cin = x.shape
    mid = params["w1"].shape[0]
    cout = params["w2"].shape[0]
    midp = _lane_pad(mid)
    outp = _lane_pad(cout)

    w1k = _prep_conv_weight(params["w1"], cin, midp, compute_dtype)
    w2k = _prep_conv_weight(params["w2"], midp, outp, compute_dtype)
    r1, s1, b1 = _fold_vectors(params["r1"], params["s1"], params["b1"],
                               params["bn1_gamma"], params["bn1_beta"],
                               params["bn1_mean"], params["bn1_var"],
                               n, num_estimators, cin, midp)
    r2, s2, b2 = _fold_vectors(params["r2"], params["s2"], params["b2"],
                               params["bn2_gamma"], params["bn2_beta"],
                               params["bn2_mean"], params["bn2_var"],
                               n, num_estimators, midp, outp)

    item = jnp.dtype(compute_dtype).itemsize
    th = row_tile if row_tile is not None else _pick_row_tile(
        h, w, cin, midp, outp, item)
    th = min(th, h)
    hp = _round_up(h, th)

    # rows padded by 2 (conv halo of the recomputed intermediate), cols by 1.
    xp = jnp.pad(x, ((0, 0), (2, 2 + hp - h), (1, 1), (0, 0))).astype(compute_dtype)

    out = _fused_double_conv(xp, w1k, w2k, r1, s1, b1, r2, s2, b2,
                             h, w, th, compute_dtype)          # (N, Hp, W, OUTP)
    out = out[:, :h, :, :cout]
    return jnp.transpose(out, (0, 3, 1, 2))                    # back to NCHW


def init_up_params(key, in_channels, out_channels, num_estimators):
    mid = in_channels // 2                          # bilinear path: mid = in//2
    ks = jax.random.split(key, 16)

    def u(k, shape, lo=-0.5, hi=0.5):
        return jax.random.uniform(k, shape, jnp.float32, lo, hi)

    return dict(
        w1=u(ks[0], (mid, in_channels, 3, 3)),
        r1=u(ks[1], (num_estimators, in_channels), 0.5, 1.5),
        s1=u(ks[2], (num_estimators, mid), 0.5, 1.5),
        b1=u(ks[3], (num_estimators, mid)),
        bn1_gamma=u(ks[4], (mid,), 0.5, 1.5),
        bn1_beta=u(ks[5], (mid,)),
        bn1_mean=u(ks[6], (mid,)),
        bn1_var=u(ks[7], (mid,), 0.5, 1.5),
        w2=u(ks[8], (out_channels, mid, 3, 3)),
        r2=u(ks[9], (num_estimators, mid), 0.5, 1.5),
        s2=u(ks[10], (num_estimators, out_channels), 0.5, 1.5),
        b2=u(ks[11], (num_estimators, out_channels)),
        bn2_gamma=u(ks[12], (out_channels,), 0.5, 1.5),
        bn2_beta=u(ks[13], (out_channels,)),
        bn2_mean=u(ks[14], (out_channels,)),
        bn2_var=u(ks[15], (out_channels,), 0.5, 1.5),
    )


# ---------------------------- pure-JAX reference ------------------------------
def _bilinear_up2_nchw(x_nchw):
    n, c, h, w = x_nchw.shape
    ah = _interp_matrix(h, 2 * h)
    aw = _interp_matrix(w, 2 * w)
    return jnp.einsum("ih,jw,nchw->ncij", ah, aw, x_nchw)


def _ref_block(x_nhwc, w, r_g, s_g, b_g, gamma, beta, mean, var, m):
    n = x_nhwc.shape[0]
    r_b = _expand_group(r_g, n, m)
    s_b = _expand_group(s_g, n, m)
    b_b = _expand_group(b_g, n, m)
    xs = x_nhwc * r_b[:, None, None, :]
    y = jax.lax.conv_general_dilated(
        xs, jnp.transpose(w, (2, 3, 1, 0)), (1, 1), ((1, 1), (1, 1)),
        dimension_numbers=("NHWC", "HWIO", "NHWC"))
    y = y * s_b[:, None, None, :] + b_b[:, None, None, :]
    y = (y - mean) * jax.lax.rsqrt(var + _BN_EPS) * gamma + beta
    return jnp.maximum(y, 0.0)


def ref_up_forward(params, x1, x2, num_estimators):
    x1u = _bilinear_up2_nchw(x1)
    diff_y = x2.shape[2] - x1u.shape[2]
    diff_x = x2.shape[3] - x1u.shape[3]
    x1u = jnp.pad(x1u, ((0, 0), (0, 0),
                        (diff_x - diff_x // 2, diff_y - diff_y // 2),
                        (diff_x // 2, diff_y // 2)))
    x = jnp.transpose(jnp.concatenate([x2, x1u], axis=1), (0, 2, 3, 1))
    h1 = _ref_block(x, params["w1"], params["r1"], params["s1"], params["b1"],
                    params["bn1_gamma"], params["bn1_beta"],
                    params["bn1_mean"], params["bn1_var"], num_estimators)
    h2 = _ref_block(h1, params["w2"], params["r2"], params["s2"], params["b2"],
                    params["bn2_gamma"], params["bn2_beta"],
                    params["bn2_mean"], params["bn2_var"], num_estimators)
    return jnp.transpose(h2, (0, 3, 1, 2))


# ------------------------------------ main -------------------------------------
if __name__ == "__main__":
    key = jax.random.PRNGKey(0)
    k1, k2, kp = jax.random.split(key, 3)

    in_channels, out_channels, num_estimators = 8, 4, 2
    batch = 4
    x1 = jax.random.normal(k1, (batch, in_channels // 2, 8, 8), jnp.float32)
    x2 = jax.random.normal(k2, (batch, in_channels // 2, 16, 16), jnp.float32)
    params = init_up_params(kp, in_channels, out_channels, num_estimators)

    ref = ref_up_forward(params, x1, x2, num_estimators)

    # f32, single row tile per example (strict correctness check).
    fwd = jax.jit(functools.partial(up_forward, num_estimators=num_estimators))
    out = jax.block_until_ready(fwd(params, x1, x2))
    assert out.shape == (batch, out_channels, 16, 16), out.shape
    assert jnp.allclose(out, ref, atol=1e-2, rtol=1e-2), \
        float(jnp.max(jnp.abs(out - ref)))

    # f32, forced multi-row-tile path (exercises the halo/mask logic, strict).
    fwd_rt = jax.jit(functools.partial(up_forward, num_estimators=num_estimators,
                                       row_tile=8))
    out_rt = jax.block_until_ready(fwd_rt(params, x1, x2))
    assert jnp.allclose(out_rt, ref, atol=1e-2, rtol=1e-2), \
        float(jnp.max(jnp.abs(out_rt - ref)))

    # bf16 storage path (v6e/v7x option): bf16 MXU + f32 epilogue scales/bias,
    # so typical error is ~1e-2; loose tolerance kept as a smoke check only.
    fwd_bf16 = jax.jit(functools.partial(up_forward,
                                         num_estimators=num_estimators,
                                         compute_dtype=jnp.bfloat16))
    out_bf16 = jax.block_until_ready(fwd_bf16(params, x1, x2))
    assert jnp.allclose(out_bf16.astype(jnp.float32), ref, atol=5e-1, rtol=5e-1), \
        float(jnp.max(jnp.abs(out_bf16.astype(jnp.float32) - ref)))

    print("KERNEL_OK")
</pallas_src>

<mosaic_0001>
module attributes {stable_mosaic.version = 11 : i64} {
  func.func private @main(%arg0: i32) attributes {dimension_semantics = [#tpu.dimension_semantics<core_parallel>], iteration_bounds = array<i64: 2>, tpu.core_type = #tpu.core_type<sc_scalar_subcore>, window_params = []} {
    return
  }
}

module attributes {stable_mosaic.version = 11 : i64} {
  func.func private @main(%arg0: i32) attributes {dimension_semantics = [#tpu.dimension_semantics<core_parallel>], iteration_bounds = array<i64: 2>, tpu.core_type = #tpu.core_type<sc_scalar_subcore>, window_params = []} {
    return
  }
}

module attributes {stable_mosaic.version = 11 : i64} {
  func.func @_fused_double_conv_kernel(%arg0: i32, %arg1: i32, %arg2: memref<1x20x18x8xf32, #tpu.memory_space<vmem>>, %arg3: memref<3x24x4xf32, #tpu.memory_space<vmem>>, %arg4: memref<3x12x4xf32, #tpu.memory_space<vmem>>, %arg5: memref<4x8xf32, #tpu.memory_space<vmem>>, %arg6: memref<4x4xf32, #tpu.memory_space<vmem>>, %arg7: memref<4x4xf32, #tpu.memory_space<vmem>>, %arg8: memref<4x4xf32, #tpu.memory_space<vmem>>, %arg9: memref<4x4xf32, #tpu.memory_space<vmem>>, %arg10: memref<4x4xf32, #tpu.memory_space<vmem>>, %arg11: memref<1x16x16x4xf32, #tpu.memory_space<vmem>>, %arg12: memref<320x24xf32, #tpu.memory_space<vmem>>, %arg13: memref<18x18x4xf32, #tpu.memory_space<vmem>>, %arg14: memref<288x12xf32, #tpu.memory_space<vmem>>) attributes {dimension_semantics = [#tpu.dimension_semantics<parallel>, #tpu.dimension_semantics<parallel>], iteration_bounds = array<i64: 4, 1>, scalar_prefetch = 0 : i64, scratch_operands = 3 : i64, tpu.core_type = #tpu.core_type<tc>, window_params = [{transform_indices = @transform_0, window_bounds = array<i64: 1, 20, 18, 8>}, {pipeline_mode = #tpu.pipeline_mode<synchronous>, transform_indices = @transform_1, window_bounds = array<i64: 3, 24, 4>}, {pipeline_mode = #tpu.pipeline_mode<synchronous>, transform_indices = @transform_2, window_bounds = array<i64: 3, 12, 4>}, {pipeline_mode = #tpu.pipeline_mode<synchronous>, transform_indices = @transform_3, window_bounds = array<i64: 4, 8>}, {pipeline_mode = #tpu.pipeline_mode<synchronous>, transform_indices = @transform_4, window_bounds = array<i64: 4, 4>}, {pipeline_mode = #tpu.pipeline_mode<synchronous>, transform_indices = @transform_5, window_bounds = array<i64: 4, 4>}, {pipeline_mode = #tpu.pipeline_mode<synchronous>, transform_indices = @transform_6, window_bounds = array<i64: 4, 4>}, {pipeline_mode = #tpu.pipeline_mode<synchronous>, transform_indices = @transform_7, window_bounds = array<i64: 4, 4>}, {pipeline_mode = #tpu.pipeline_mode<synchronous>, transform_indices = @transform_8, window_bounds = array<i64: 4, 4>}, {transform_indices = @transform_9, window_bounds = array<i64: 1, 16, 16, 4>}]} {
    %c16_i32 = arith.constant 16 : i32
    %0 = arith.muli %arg1, %c16_i32 : i32
    %1 = tpu.assume_multiple %0, 8 : i32
    %2 = arith.index_cast %arg0 : i32 to index
    %c0 = arith.constant 0 : index
    %3 = vector.load %arg5[%2, %c0] : memref<4x8xf32, #tpu.memory_space<vmem>>, vector<1x8xf32>
    %4 = vector.shape_cast %3 : vector<1x8xf32> to vector<8xf32>
    %c0_0 = arith.constant 0 : index
    %5 = arith.index_cast %1 : i32 to index
    %c0_1 = arith.constant 0 : index
    %c0_2 = arith.constant 0 : index
    %6 = vector.load %arg2[%c0_0, %5, %c0_1, %c0_2] : memref<1x20x18x8xf32, #tpu.memory_space<vmem>>, vector<1x20x16x8xf32>
    %7 = vector.shape_cast %6 : vector<1x20x16x8xf32> to vector<20x16x8xf32>
    %8 = vector.shape_cast %4 : vector<8xf32> to vector<1x1x8xf32>
    %9 = vector.broadcast %8 : vector<1x1x8xf32> to vector<20x16x8xf32>
    %10 = arith.mulf %7, %9 : vector<20x16x8xf32>
    %11 = vector.shape_cast %10 : vector<20x16x8xf32> to vector<320x8xf32>
    %c0_3 = arith.constant 0 : index
    %c0_4 = arith.constant 0 : index
    %12 = vector.load %arg12[%c0_3, %c0_4] : memref<320x24xf32, #tpu.memory_space<vmem>>, vector<320x8xf32>
    tpu.vector_store %arg12[%c0_3, %c0_4], %11 {strides = array<i32>} : memref<320x24xf32, #tpu.memory_space<vmem>>, vector<320x8xf32>,
    %c0_5 = arith.constant 0 : index
    %13 = arith.index_cast %1 : i32 to index
    %c1 = arith.constant 1 : index
    %c0_6 = arith.constant 0 : index
    %14 = vector.load %arg2[%c0_5, %13, %c1, %c0_6] : memref<1x20x18x8xf32, #tpu.memory_space<vmem>>, vector<1x20x16x8xf32>
    %15 = vector.shape_cast %14 : vector<1x20x16x8xf32> to vector<20x16x8xf32>
    %16 = vector.shape_cast %4 : vector<8xf32> to vector<1x1x8xf32>
    %17 = vector.broadcast %16 : vector<1x1x8xf32> to vector<20x16x8xf32>
    %18 = arith.mulf %15, %17 : vector<20x16x8xf32>
    %19 = vector.shape_cast %18 : vector<20x16x8xf32> to vector<320x8xf32>
    %c0_7 = arith.constant 0 : index
    %c8 = arith.constant 8 : index
    %20 = vector.load %arg12[%c0_7, %c8] : memref<320x24xf32, #tpu.memory_space<vmem>>, vector<320x8xf32>
    tpu.vector_store %arg12[%c0_7, %c8], %19 {strides = array<i32>} : memref<320x24xf32, #tpu.memory_space<vmem>>, vector<320x8xf32>,
    %c0_8 = arith.constant 0 : index
    %21 = arith.index_cast %1 : i32 to index
    %c2 = arith.constant 2 : index
    %c0_9 = arith.constant 0 : index
    %22 = vector.load %arg2[%c0_8, %21, %c2, %c0_9] : memref<1x20x18x8xf32, #tpu.memory_space<vmem>>, vector<1x20x16x8xf32>
    %23 = vector.shape_cast %22 : vector<1x20x16x8xf32> to vector<20x16x8xf32>
    %24 = vector.shape_cast %4 : vector<8xf32> to vector<1x1x8xf32>
    %25 = vector.broadcast %24 : vector<1x1x8xf32> to vector<20x16x8xf32>
    %26 = arith.mulf %23, %25 : vector<20x16x8xf32>
    %27 = vector.shape_cast %26 : vector<20x16x8xf32> to vector<320x8xf32>
    %c0_10 = arith.constant 0 : index
    %c16 = arith.constant 16 : index
    %28 = vector.load %arg12[%c0_10, %c16] : memref<320x24xf32, #tpu.memory_space<vmem>>, vector<320x8xf32>
    tpu.vector_store %arg12[%c0_10, %c16], %27 {strides = array<i32>} : memref<320x24xf32, #tpu.memory_space<vmem>>, vector<320x8xf32>,
    %cst = arith.constant 0.000000e+00 : f32
    %29 = vector.broadcast %cst : f32 to vector<288x4xf32>
    %c0_11 = arith.constant 0 : index
    %c0_12 = arith.constant 0 : index
    %30 = vector.load %arg12[%c0_11, %c0_12] : memref<320x24xf32, #tpu.memory_space<vmem>>, vector<288x24xf32>
    %c0_13 = arith.constant 0 : index
    %c0_14 = arith.constant 0 : index
    %c0_15 = arith.constant 0 : index
    %31 = vector.load %arg3[%c0_13, %c0_14, %c0_15] : memref<3x24x4xf32, #tpu.memory_space<vmem>>, vector<1x24x4xf32>
    %32 = vector.shape_cast %31 : vector<1x24x4xf32> to vector<24x4xf32>
    %cst_16 = arith.constant dense<0.000000e+00> : vector<288x4xf32>
    %33 = tpu.matmul %30, %32, %cst_16 {dimension_numbers = #tpu.dot_dimension_numbers<[1], [0], [0], [1], [0, 0, 1, 1], [], []>} : vector<288x24xf32>, vector<24x4xf32>, vector<288x4xf32> -> vector<288x4xf32>
    %34 = arith.addf %29, %33 : vector<288x4xf32>
    %c16_17 = arith.constant 16 : index
    %c0_18 = arith.constant 0 : index
    %35 = vector.load %arg12[%c16_17, %c0_18] : memref<320x24xf32, #tpu.memory_space<vmem>>, vector<288x24xf32>
    %c1_19 = arith.constant 1 : index
    %c0_20 = arith.constant 0 : index
    %c0_21 = arith.constant 0 : index
    %36 = vector.load %arg3[%c1_19, %c0_20, %c0_21] : memref<3x24x4xf32, #tpu.memory_space<vmem>>, vector<1x24x4xf32>
    %37 = vector.shape_cast %36 : vector<1x24x4xf32> to vector<24x4xf32>
    %cst_22 = arith.constant dense<0.000000e+00> : vector<288x4xf32>
    %38 = tpu.matmul %35, %37, %cst_22 {dimension_numbers = #tpu.dot_dimension_numbers<[1], [0], [0], [1], [0, 0, 1, 1], [], []>} : vector<288x24xf32>, vector<24x4xf32>, vector<288x4xf32> -> vector<288x4xf32>
    %39 = arith.addf %34, %38 : vector<288x4xf32>
    %c32 = arith.constant 32 : index
    %c0_23 = arith.constant 0 : index
    %40 = vector.load %arg12[%c32, %c0_23] : memref<320x24xf32, #tpu.memory_space<vmem>>, vector<288x24xf32>
    %c2_24 = arith.constant 2 : index
    %c0_25 = arith.constant 0 : index
    %c0_26 = arith.constant 0 : index
    %41 = vector.load %arg3[%c2_24, %c0_25, %c0_26] : memref<3x24x4xf32, #tpu.memory_space<vmem>>, vector<1x24x4xf32>
    %42 = vector.shape_cast %41 : vector<1x24x4xf32> to vector<24x4xf32>
    %cst_27 = arith.constant dense<0.000000e+00> : vector<288x4xf32>
    %43 = tpu.matmul %40, %42, %cst_27 {dimension_numbers = #tpu.dot_dimension_numbers<[1], [0], [0], [1], [0, 0, 1, 1], [], []>} : vector<288x24xf32>, vector<24x4xf32>, vector<288x4xf32> -> vector<288x4xf32>
    %44 = arith.addf %39, %43 : vector<288x4xf32>
    %45 = arith.index_cast %arg0 : i32 to index
    %c0_28 = arith.constant 0 : index
    %46 = vector.load %arg6[%45, %c0_28] : memref<4x4xf32, #tpu.memory_space<vmem>>, vector<1x4xf32>
    %47 = vector.shape_cast %46 : vector<1x4xf32> to vector<4xf32>
    %48 = vector.shape_cast %47 : vector<4xf32> to vector<1x4xf32>
    %49 = vector.broadcast %48 : vector<1x4xf32> to vector<288x4xf32>
    %50 = arith.mulf %44, %49 : vector<288x4xf32>
    %51 = arith.index_cast %arg0 : i32 to index
    %c0_29 = arith.constant 0 : index
    %52 = vector.load %arg7[%51, %c0_29] : memref<4x4xf32, #tpu.memory_space<vmem>>, vector<1x4xf32>
    %53 = vector.shape_cast %52 : vector<1x4xf32> to vector<4xf32>
    %54 = vector.shape_cast %53 : vector<4xf32> to vector<1x4xf32>
    %55 = vector.broadcast %54 : vector<1x4xf32> to vector<288x4xf32>
    %56 = arith.addf %50, %55 : vector<288x4xf32>
    %cst_30 = arith.constant 0.000000e+00 : f32
    %57 = vector.broadcast %cst_30 : f32 to vector<288x4xf32>
    %58 = arith.maximumf %56, %57 : vector<288x4xf32>
    %59 = arith.index_cast %arg0 : i32 to index
    %c0_31 = arith.constant 0 : index
    %60 = vector.load %arg8[%59, %c0_31] : memref<4x4xf32, #tpu.memory_space<vmem>>, vector<1x4xf32>
    %61 = vector.shape_cast %60 : vector<1x4xf32> to vector<4xf32>
    %62 = vector.shape_cast %61 : vector<4xf32> to vector<1x4xf32>
    %63 = vector.broadcast %62 : vector<1x4xf32> to vector<288x4xf32>
    %64 = arith.mulf %58, %63 : vector<288x4xf32>
    %65 = tpu.iota {dimensions = array<i32: 0>} : vector<18x1x1xi32>
    %c16_i32_32 = arith.constant 16 : i32
    %66 = arith.muli %arg1, %c16_i32_32 : i32
    %c1_i32 = arith.constant 1 : i32
    %67 = arith.subi %66, %c1_i32 : i32
    %68 = vector.broadcast %67 : i32 to vector<18x1x1xi32>
    %69 = arith.addi %68, %65 : vector<18x1x1xi32>
    %c0_i32 = arith.constant 0 : i32
    %70 = vector.broadcast %c0_i32 : i32 to vector<18x1x1xi32>
    %71 = arith.cmpi sge, %69, %70 : vector<18x1x1xi32>
    %c16_i32_33 = arith.constant 16 : i32
    %72 = vector.broadcast %c16_i32_33 : i32 to vector<18x1x1xi32>
    %73 = arith.cmpi slt, %69, %72 : vector<18x1x1xi32>
    %74 = arith.andi %71, %73 : vector<18x1x1xi1>
    %75 = vector.shape_cast %64 : vector<288x4xf32> to vector<18x16x4xf32>
    %cst_34 = arith.constant 0.000000e+00 : f32
    %76 = vector.shape_cast %74 : vector<18x1x1xi1> to vector<18x1x1xi1>
    %77 = vector.broadcast %76 : vector<18x1x1xi1> to vector<18x16x4xi1>
    %78 = vector.broadcast %cst_34 : f32 to vector<18x16x4xf32>
    %79 = arith.select %77, %75, %78 : vector<18x16x4xi1>, vector<18x16x4xf32>
    %c0_35 = arith.constant 0 : index
    %c1_36 = arith.constant 1 : index
    %c0_37 = arith.constant 0 : index
    %80 = vector.load %arg13[%c0_35, %c1_36, %c0_37] : memref<18x18x4xf32, #tpu.memory_space<vmem>>, vector<18x16x4xf32>
    tpu.vector_store %arg13[%c0_35, %c1_36, %c0_37], %79 {strides = array<i32>} : memref<18x18x4xf32, #tpu.memory_space<vmem>>, vector<18x16x4xf32>,
    %cst_38 = arith.constant 0.000000e+00 : f32
    %81 = vector.broadcast %cst_38 : f32 to vector<18x1x4xf32>
    %c0_39 = arith.constant 0 : index
    %c0_40 = arith.constant 0 : index
    %c0_41 = arith.constant 0 : index
    %82 = vector.load %arg13[%c0_39, %c0_40, %c0_41] : memref<18x18x4xf32, #tpu.memory_space<vmem>>, vector<18x1x4xf32>
    tpu.vector_store %arg13[%c0_39, %c0_40, %c0_41], %81 {strides = array<i32>} : memref<18x18x4xf32, #tpu.memory_space<vmem>>, vector<18x1x4xf32>,
    %c0_42 = arith.constant 0 : index
    %c17 = arith.constant 17 : index
    %c0_43 = arith.constant 0 : index
    %83 = vector.load %arg13[%c0_42, %c17, %c0_43] : memref<18x18x4xf32, #tpu.memory_space<vmem>>, vector<18x1x4xf32>
    tpu.vector_store %arg13[%c0_42, %c17, %c0_43], %81 {strides = array<i32>} : memref<18x18x4xf32, #tpu.memory_space<vmem>>, vector<18x1x4xf32>,
    %c0_44 = arith.constant 0 : index
    %c0_45 = arith.constant 0 : index
    %c0_46 = arith.constant 0 : index
    %84 = vector.load %arg13[%c0_44, %c0_45, %c0_46] : memref<18x18x4xf32, #tpu.memory_space<vmem>>, vector<18x16x4xf32>
    %85 = vector.shape_cast %84 : vector<18x16x4xf32> to vector<288x4xf32>
    %c0_47 = arith.constant 0 : index
    %c0_48 = arith.constant 0 : index
    %86 = vector.load %arg14[%c0_47, %c0_48] : memref<288x12xf32, #tpu.memory_space<vmem>>, vector<288x4xf32>
    tpu.vector_store %arg14[%c0_47, %c0_48], %85 {strides = array<i32>} : memref<288x12xf32, #tpu.memory_space<vmem>>, vector<288x4xf32>,
    %c0_49 = arith.constant 0 : index
    %c1_50 = arith.constant 1 : index
    %c0_51 = arith.constant 0 : index
    %87 = vector.load %arg13[%c0_49, %c1_50, %c0_51] : memref<18x18x4xf32, #tpu.memory_space<vmem>>, vector<18x16x4xf32>
    %88 = vector.shape_cast %87 : vector<18x16x4xf32> to vector<288x4xf32>
    %c0_52 = arith.constant 0 : index
    %c4 = arith.constant 4 : index
    %89 = vector.load %arg14[%c0_52, %c4] : memref<288x12xf32, #tpu.memory_space<vmem>>, vector<288x4xf32>
    tpu.vector_store %arg14[%c0_52, %c4], %88 {strides = array<i32>} : memref<288x12xf32, #tpu.memory_space<vmem>>, vector<288x4xf32>,
    %c0_53 = arith.constant 0 : index
    %c2_54 = arith.constant 2 : index
    %c0_55 = arith.constant 0 : index
    %90 = vector.load %arg13[%c0_53, %c2_54, %c0_55] : memref<18x18x4xf32, #tpu.memory_space<vmem>>, vector<18x16x4xf32>
    %91 = vector.shape_cast %90 : vector<18x16x4xf32> to vector<288x4xf32>
    %c0_56 = arith.constant 0 : index
    %c8_57 = arith.constant 8 : index
    %92 = vector.load %arg14[%c0_56, %c8_57] : memref<288x12xf32, #tpu.memory_space<vmem>>, vector<288x4xf32>
    tpu.vector_store %arg14[%c0_56, %c8_57], %91 {strides = array<i32>} : memref<288x12xf32, #tpu.memory_space<vmem>>, vector<288x4xf32>,
    %cst_58 = arith.constant 0.000000e+00 : f32
    %93 = vector.broadcast %cst_58 : f32 to vector<256x4xf32>
    %c0_59 = arith.constant 0 : index
    %c0_60 = arith.constant 0 : index
    %94 = vector.load %arg14[%c0_59, %c0_60] : memref<288x12xf32, #tpu.memory_space<vmem>>, vector<256x12xf32>
    %c0_61 = arith.constant 0 : index
    %c0_62 = arith.constant 0 : index
    %c0_63 = arith.constant 0 : index
    %95 = vector.load %arg4[%c0_61, %c0_62, %c0_63] : memref<3x12x4xf32, #tpu.memory_space<vmem>>, vector<1x12x4xf32>
    %96 = vector.shape_cast %95 : vector<1x12x4xf32> to vector<12x4xf32>
    %cst_64 = arith.constant dense<0.000000e+00> : vector<256x4xf32>
    %97 = tpu.matmul %94, %96, %cst_64 {dimension_numbers = #tpu.dot_dimension_numbers<[1], [0], [0], [1], [0, 0, 1, 1], [], []>} : vector<256x12xf32>, vector<12x4xf32>, vector<256x4xf32> -> vector<256x4xf32>
    %98 = arith.addf %93, %97 : vector<256x4xf32>
    %c16_65 = arith.constant 16 : index
    %c0_66 = arith.constant 0 : index
    %99 = vector.load %arg14[%c16_65, %c0_66] : memref<288x12xf32, #tpu.memory_space<vmem>>, vector<256x12xf32>
    %c1_67 = arith.constant 1 : index
    %c0_68 = arith.constant 0 : index
    %c0_69 = arith.constant 0 : index
    %100 = vector.load %arg4[%c1_67, %c0_68, %c0_69] : memref<3x12x4xf32, #tpu.memory_space<vmem>>, vector<1x12x4xf32>
    %101 = vector.shape_cast %100 : vector<1x12x4xf32> to vector<12x4xf32>
    %cst_70 = arith.constant dense<0.000000e+00> : vector<256x4xf32>
    %102 = tpu.matmul %99, %101, %cst_70 {dimension_numbers = #tpu.dot_dimension_numbers<[1], [0], [0], [1], [0, 0, 1, 1], [], []>} : vector<256x12xf32>, vector<12x4xf32>, vector<256x4xf32> -> vector<256x4xf32>
    %103 = arith.addf %98, %102 : vector<256x4xf32>
    %c32_71 = arith.constant 32 : index
    %c0_72 = arith.constant 0 : index
    %104 = vector.load %arg14[%c32_71, %c0_72] : memref<288x12xf32, #tpu.memory_space<vmem>>, vector<256x12xf32>
    %c2_73 = arith.constant 2 : index
    %c0_74 = arith.constant 0 : index
    %c0_75 = arith.constant 0 : index
    %105 = vector.load %arg4[%c2_73, %c0_74, %c0_75] : memref<3x12x4xf32, #tpu.memory_space<vmem>>, vector<1x12x4xf32>
    %106 = vector.shape_cast %105 : vector<1x12x4xf32> to vector<12x4xf32>
    %cst_76 = arith.constant dense<0.000000e+00> : vector<256x4xf32>
    %107 = tpu.matmul %104, %106, %cst_76 {dimension_numbers = #tpu.dot_dimension_numbers<[1], [0], [0], [1], [0, 0, 1, 1], [], []>} : vector<256x12xf32>, vector<12x4xf32>, vector<256x4xf32> -> vector<256x4xf32>
    %108 = arith.addf %103, %107 : vector<256x4xf32>
    %109 = arith.index_cast %arg0 : i32 to index
    %c0_77 = arith.constant 0 : index
    %110 = vector.load %arg9[%109, %c0_77] : memref<4x4xf32, #tpu.memory_space<vmem>>, vector<1x4xf32>
    %111 = vector.shape_cast %110 : vector<1x4xf32> to vector<4xf32>
    %112 = vector.shape_cast %111 : vector<4xf32> to vector<1x4xf32>
    %113 = vector.broadcast %112 : vector<1x4xf32> to vector<256x4xf32>
    %114 = arith.mulf %108, %113 : vector<256x4xf32>
    %115 = arith.index_cast %arg0 : i32 to index
    %c0_78 = arith.constant 0 : index
    %116 = vector.load %arg10[%115, %c0_78] : memref<4x4xf32, #tpu.memory_space<vmem>>, vector<1x4xf32>
    %117 = vector.shape_cast %116 : vector<1x4xf32> to vector<4xf32>
    %118 = vector.shape_cast %117 : vector<4xf32> to vector<1x4xf32>
    %119 = vector.broadcast %118 : vector<1x4xf32> to vector<256x4xf32>
    %120 = arith.addf %114, %119 : vector<256x4xf32>
    %cst_79 = arith.constant 0.000000e+00 : f32
    %121 = vector.broadcast %cst_79 : f32 to vector<256x4xf32>
    %122 = arith.maximumf %120, %121 : vector<256x4xf32>
    %123 = vector.shape_cast %122 : vector<256x4xf32> to vector<1x16x16x4xf32>
    %c0_80 = arith.constant 0 : index
    %c0_81 = arith.constant 0 : index
    %c0_82 = arith.constant 0 : index
    %c0_83 = arith.constant 0 : index
    %124 = vector.load %arg11[%c0_80, %c0_81, %c0_82, %c0_83] : memref<1x16x16x4xf32, #tpu.memory_space<vmem>>, vector<1x16x16x4xf32>
    tpu.vector_store %arg11[%c0_80, %c0_81, %c0_82, %c0_83], %123 {strides = array<i32>} : memref<1x16x16x4xf32, #tpu.memory_space<vmem>>, vector<1x16x16x4xf32>,
    return
  }
  func.func @transform_0(%arg0: i32, %arg1: i32) -> (i32, i32, i32, i32) {
    %c0_i32 = arith.constant 0 : i32
    %c0_i32_0 = arith.constant 0 : i32
    %c0_i32_1 = arith.constant 0 : i32
    %c0_i32_2 = arith.constant 0 : i32
    return %arg0, %c0_i32, %c0_i32_0, %c0_i32_1 : i32, i32, i32, i32
  }
  func.func @transform_1(%arg0: i32, %arg1: i32) -> (i32, i32, i32) {
    %c0_i32 = arith.constant 0 : i32
    %c0_i32_0 = arith.constant 0 : i32
    %c0_i32_1 = arith.constant 0 : i32
    %c0_i32_2 = arith.constant 0 : i32
    return %c0_i32, %c0_i32_0, %c0_i32_1 : i32, i32, i32
  }
  func.func @transform_2(%arg0: i32, %arg1: i32) -> (i32, i32, i32) {
    %c0_i32 = arith.constant 0 : i32
    %c0_i32_0 = arith.constant 0 : i32
    %c0_i32_1 = arith.constant 0 : i32
    %c0_i32_2 = arith.constant 0 : i32
    return %c0_i32, %c0_i32_0, %c0_i32_1 : i32, i32, i32
  }
  func.func @transform_3(%arg0: i32, %arg1: i32) -> (i32, i32) {
    %c0_i32 = arith.constant 0 : i32
    %c0_i32_0 = arith.constant 0 : i32
    %c0_i32_1 = arith.constant 0 : i32
    return %c0_i32, %c0_i32_0 : i32, i32
  }
  func.func @transform_4(%arg0: i32, %arg1: i32) -> (i32, i32) {
    %c0_i32 = arith.constant 0 : i32
    %c0_i32_0 = arith.constant 0 : i32
    %c0_i32_1 = arith.constant 0 : i32
    return %c0_i32, %c0_i32_0 : i32, i32
  }
  func.func @transform_5(%arg0: i32, %arg1: i32) -> (i32, i32) {
    %c0_i32 = arith.constant 0 : i32
    %c0_i32_0 = arith.constant 0 : i32
    %c0_i32_1 = arith.constant 0 : i32
    return %c0_i32, %c0_i32_0 : i32, i32
  }
  func.func @transform_6(%arg0: i32, %arg1: i32) -> (i32, i32) {
    %c0_i32 = arith.constant 0 : i32
    %c0_i32_0 = arith.constant 0 : i32
    %c0_i32_1 = arith.constant 0 : i32
    return %c0_i32, %c0_i32_0 : i32, i32
  }
  func.func @transform_7(%arg0: i32, %arg1: i32) -> (i32, i32) {
    %c0_i32 = arith.constant 0 : i32
    %c0_i32_0 = arith.constant 0 : i32
    %c0_i32_1 = arith.constant 0 : i32
    return %c0_i32, %c0_i32_0 : i32, i32
  }
  func.func @transform_8(%arg0: i32, %arg1: i32) -> (i32, i32) {
    %c0_i32 = arith.constant 0 : i32
    %c0_i32_0 = arith.constant 0 : i32
    %c0_i32_1 = arith.constant 0 : i32
    return %c0_i32, %c0_i32_0 : i32, i32
  }
  func.func @transform_9(%arg0: i32, %arg1: i32) -> (i32, i32, i32, i32) {
    %c0_i32 = arith.constant 0 : i32
    %c0_i32_0 = arith.constant 0 : i32
    %c0_i32_1 = arith.constant 0 : i32
    return %arg0, %arg1, %c0_i32, %c0_i32_0 : i32, i32, i32, i32
  }
}

</mosaic_0001>

<bundles_post_ra>
// kernel: up_forward.1
= control target key start
LH: loop header
LB: loop body
LE: loop exit
PB: predicated region body
PF: predicated region fallthrough
CT: control target
= control target key end

     0   :  { %s5303_s30 = smov 0   ;;  %s5305_s10 = smov 0   ;;  %s6922_s0 = inlined_call_operand.vmem [shape: f32[4,20,18,8], index: 0, kind: input, shape index: {}]   ;;  %s6923_s1 = inlined_call_operand.vmem [shape: f32[3,24,4], index: 1, kind: input, shape index: {}]   ;;  %s6924_s2 = inlined_call_operand.vmem [shape: f32[3,12,4], index: 2, kind: input, shape index: {}]   ;;  %s6925_s3 = inlined_call_operand.vmem [shape: f32[4,8], index: 3, kind: input, shape index: {}]   ;;  %s6926_s4 = inlined_call_operand.vmem [shape: f32[4,4], index: 4, kind: input, shape index: {}]   ;;  %s6927_s5 = inlined_call_operand.vmem [shape: f32[4,4], index: 5, kind: input, shape index: {}]   ;;  %s6928_s6 = inlined_call_operand.vmem [shape: f32[4,4], index: 6, kind: input, shape index: {}]   ;;  %s6929_s7 = inlined_call_operand.vmem [shape: f32[4,4], index: 7, kind: input, shape index: {}]   ;;  %s6930_s8 = inlined_call_operand.vmem [shape: f32[4,4], index: 8, kind: input, shape index: {}]   ;;  %s6931_s9 = inlined_call_operand.vmem [shape: f32[4,16,16,4], index: 9, kind: output, shape index: {}]  }
   0x1   :  { %s5307_s11 = smov 0  }
   0x2 LB: > { %s31_s12 = sadd.s32 1, %s5242_s10  ;;  %p4245_p0 = scmp.ge.s32.totalorder %s5246_s11, 1  ;;  %s5246_s11 = sphi %s5307_s11, %s19_s11   ;;  %s5242_s10 = sphi %s5305_s10, %s6935_s10   ;;  %s5238_s30 = sphi %s5303_s30, %s6934_s30  }
   0x3   : > { %p33_p1 = scmp.ge.s32.totalorder %s31_s12, 4  ;;  %p301_p2 = scmp.lt.s32.totalorder %s5246_s11, 5 }
   0x5   : > { %s6937_s12 = smov (%p33_p1, %s31_s12), 0  ;;  %p302_p3 = pnand %p4245_p0, %p301_p2 }
   0x6   : > { %p342_p4 = scmp.lt.s32.totalorder (!%p302_p3), %s5238_s30, 3  ;;  %s5328_s15 = scalar_lea.vmem (!%p302_p3), %s6925_s3, %s5238_s30  ;;  %v4250_v0 = vld [vmem:[%s6923_s1 + $0x18] sm:$0xff] (!%p302_p3)  ;;  %v4251_v1 = vld [vmem:[%s6923_s1 + $0x20] sm:$0xff] (!%p302_p3)  ;;  %vm447_vm0 = vcmask (!%p302_p3), 64512   ;;  %v4252_v42 = vld [vmem:[%s6923_s1 + $0x28] sm:$0xff] (!%p302_p3)  ;;  %vm728_vm1 = vcmask (!%p302_p3), 130112  }
   0x7   : > { %305 = sbr.rel (%p302_p3) target bundleno = 1171 (0x493), region = 56  ;;  %v5030_v2 = vpack.c.bf16 (!%p302_p3), %v4251_v1, %v4250_v0  ;;  %v5341_v3 = vld [vmem:[%s5328_s15] ss:$0 sm:$0xff] (!%p302_p3)  ;;  %s5248_s25 = smov (!%p302_p3), 8   ;;  %vm1009_vm2 = vcmask (!%p302_p3), 195712   ;;  %vm1095_vm3 = vcmask (!%p302_p3), 195584  }
   0x8   : > { %s5249_s26 = smov (!%p302_p3), 16   ;;  %vm2436_vm4 = vcmask (!%p302_p3), 31744   ;;  %vm2473_vm5 = vcmask (!%p302_p3), 24576   ;;  %s5251_s29 = smov (!%p302_p3), 4   ;;  %vm2762_vm6 = vcmask (!%p302_p3), 64544   ;;  %vm3152_vm7 = vcmask (!%p302_p3), 1043456  }
   0x9   : > { %5031 = vmatprep.subr.bf16.mxu0 (!%p302_p3), %v5030_v2  ;;  %5060 = vmatprep.subr.bf16.mxu1 (!%p302_p3), %v5030_v2  ;;  %s2129_s16 = scalar_lea.vmem (!%p302_p3), %s6926_s4, %s5238_s30  ;;  %s2171_s19 = scalar_lea.vmem (!%p302_p3), %s6927_s5, %s5238_s30  ;;  %vm5252_vm8 = vmmov (!%p302_p3), 1   ;;  %vm2979_vm10 = vcmask (!%p302_p3), 97344   ;;  %vm3055_vm11 = vcmask (!%p302_p3), 97280  }
   0xa   : > { %5033 = vmatpush3.bf16.msra.mxu0 (!%p302_p3), %v5030_v2  ;;  %5062 = vmatpush3.bf16.msra.mxu1 (!%p302_p3), %v5030_v2  ;;  %s2249_s23 = scalar_lea.vmem (!%p302_p3), %s6928_s6, %s5238_s30  ;;  %vm6170_vm9 = vmpackc.low (!%p302_p3), %vm3152_vm7, %vm5252_vm8  ;;  %s4044_s28 = scalar_lea.vmem (!%p302_p3), %s6930_s8, %s5238_s30 }
   0xb   : > { %4698 = vmatprep.subr.mxu0 (!%p302_p3), %v4252_v42  ;;  %5061 = vmatprep.subr.mxu1 (!%p302_p3), %v4252_v42 }
   0xe   : > { %s5337_s20 = scalar_select %p342_p4, %s5238_s30, 3  ;;  %4699 = vmatpush3.msra.mxu0 %v4252_v42  ;;  %5063 = vmatpush3.msra.mxu1 %v4252_v42 }
  0x10   : > { %s5192_s21 = smul.u32 480, %s5337_s20  ;;  %s4474_s13 = sshll.u32 %s5337_s20, 8 }
  0x11   : > { %s6786_s17 = scalar_lea.vmem %s6931_s9, %s4474_s13 }
  0x12   : > { %s5346_s24 = scalar_lea.vmem %s6922_s0, %s5192_s21 }
  0x13   : > { %v490_v4 = vld [vmem:[%s5346_s24 + $0x19] sm:$0xff]  ;;  %v491_v6 = vld [vmem:[%s5346_s24 + $0x21] sm:$0xff]  ;;  %v492_v12 = vld [vmem:[%s5346_s24 + $0x31] sm:$0xff] }
  0x14   : > { %v771_v5 = vld [vmem:[%s5346_s24 + $0x1a] sm:$0xff]  ;;  %v530_v7 = vmul.f32 %v5341_v3, %v490_v4  ;;  %v772_v9 = vld [vmem:[%s5346_s24 + $0x22] sm:$0xff]  ;;  %v531_v10 = vmul.f32 %v5341_v3, %v491_v6  ;;  %v532_v14 = vmul.f32 %v5341_v3, %v492_v12  ;;  %v773_v16 = vld [vmem:[%s5346_s24 + $0x32] sm:$0xff] }
  0x15   : > { %v811_v8 = vmul.f32 %v5341_v3, %v771_v5  ;;  %v812_v11 = vmul.f32 %v5341_v3, %v772_v9  ;;  %v493_v13 = vld [vmem:[%s5346_s24 + $0x39] sm:$0xff]  ;;  %v813_v18 = vmul.f32 %v5341_v3, %v773_v16  ;;  %v494_v20 = vld [vmem:[%s5346_s24 + $0x49] sm:$0xff]  ;;  %v495_v21 = vld [vmem:[%s5346_s24 + $0x51] sm:$0xff] }
  0x16   : > { %612 = vrot.lane.b32.xlu0 %v530_v7, %s5248_s25  ;;  %v533_v15 = vmul.f32 %v5341_v3, %v493_v13  ;;  %v774_v17 = vld [vmem:[%s5346_s24 + $0x3a] sm:$0xff]  ;;  %v534_v22 = vmul.f32 %v5341_v3, %v494_v20  ;;  %v535_v23 = vmul.f32 %v5341_v3, %v495_v21  ;;  %v775_v24 = vld [vmem:[%s5346_s24 + $0x4a] sm:$0xff]  ;;  %v776_v25 = vld [vmem:[%s5346_s24 + $0x52] sm:$0xff] }
  0x17   : > { %893 = vrot.lane.b32.xlu1 %v811_v8, %s5249_s26  ;;  %v814_v19 = vmul.f32 %v5341_v3, %v774_v17  ;;  %v815_v26 = vmul.f32 %v5341_v3, %v775_v24  ;;  %v816_v27 = vmul.f32 %v5341_v3, %v776_v25  ;;  %v496_v28 = vld [vmem:[%s5346_s24 + $0x61] sm:$0xff]  ;;  %v497_v29 = vld [vmem:[%s5346_s24 + $0x69] sm:$0xff]  ;;  %v365_v30 = vld [vmem:[%s5346_s24 + $0x18] sm:$0xff] }
  0x18   : > { %v777_v31 = vld [vmem:[%s5346_s24 + $0x62] sm:$0xff]  ;;  %v778_v32 = vld [vmem:[%s5346_s24 + $0x6a] sm:$0xff]  ;;  %v409_v33 = vmul.f32 %v5341_v3, %v365_v30  ;;  %v536_v35 = vmul.f32 %v5341_v3, %v496_v28  ;;  %v537_v36 = vmul.f32 %v5341_v3, %v497_v29  ;;  %v368_v39 = vld [vmem:[%s5346_s24 + $0x38] sm:$0xff] }
  0x19   : > { %v366_v34 = vld [vmem:[%s5346_s24 + $0x20] sm:$0xff]  ;;  %v367_v38 = vld [vmem:[%s5346_s24 + $0x30] sm:$0xff]  ;;  %v412_v41 = vmul.f32 %v5341_v3, %v368_v39  ;;  %v817_v43 = vmul.f32 %v5341_v3, %v777_v31  ;;  %v818_v44 = vmul.f32 %v5341_v3, %v778_v32  ;;  %v369_v45 = vld [vmem:[%s5346_s24 + $0x48] sm:$0xff] }
  0x1a   : > { %614 = vrot.lane.b32.xlu0 %v531_v10, %s5248_s25  ;;  %v410_v37 = vmul.f32 %v5341_v3, %v366_v34  ;;  %450 = vst.msk [vmem:[#allocation2 + $0x10] sm:$0xff] %vm447_vm0, %v409_v33  ;;  %v411_v40 = vmul.f32 %v5341_v3, %v367_v38  ;;  %v370_v46 = vld [vmem:[%s5346_s24 + $0x50] sm:$0xff]  ;;  %v371_v47 = vld [vmem:[%s5346_s24 + $0x60] sm:$0xff]  ;;  %v413_v48 = vmul.f32 %v5341_v3, %v369_v45  ;;  %v372_v51 = vld [vmem:[%s5346_s24 + $0x68] sm:$0xff] }
  0x1b   : > { %895 = vrot.lane.b32.xlu1 %v812_v11, %s5249_s26  ;;  %453 = vst.msk [vmem:[#allocation2 + $0x28] sm:$0xff] %vm447_vm0, %v412_v41  ;;  %v414_v49 = vmul.f32 %v5341_v3, %v370_v46  ;;  %v415_v50 = vmul.f32 %v5341_v3, %v371_v47  ;;  %v373_v52 = vld [vmem:[%s5346_s24 + $0x78] sm:$0xff]  ;;  %v374_v53 = vld [vmem:[%s5346_s24 + $0x80] sm:$0xff]  ;;  %v416_v54 = vmul.f32 %v5341_v3, %v372_v51  ;;  %v375_v57 = vld [vmem:[%s5346_s24 + $0x90] sm:$0xff] }
  0x1c   : > { %451 = vst.msk [vmem:[#allocation2 + $0x18] sm:$0xff] %vm447_vm0, %v410_v37  ;;  %452 = vst.msk [vmem:[#allocation2 + $0x20] sm:$0xff] %vm447_vm0, %v411_v40  ;;  %v417_v55 = vmul.f32 %v5341_v3, %v373_v52  ;;  %v418_v56 = vmul.f32 %v5341_v3, %v374_v53  ;;  %v376_v58 = vld [vmem:[%s5346_s24 + $0x98] sm:$0xff]  ;;  %v499_v60 = vld [vmem:[%s5346_s24 + $0x81] sm:$0xff]  ;;  %v419_v61 = vmul.f32 %v5341_v3, %v375_v57 }
  0x1d   : > { %v498_v59 = vld [vmem:[%s5346_s24 + $0x79] sm:$0xff]  ;;  %454 = vst.msk [vmem:[#allocation2 + $0x30] sm:$0xff] %vm447_vm0, %v413_v48  ;;  %455 = vst.msk [vmem:[#allocation2 + $0x38] sm:$0xff] %vm447_vm0, %v414_v49  ;;  %v420_v62 = vmul.f32 %v5341_v3, %v376_v58  ;;  %v539_v0 = vmul.f32 %v5341_v3, %v499_v60  ;;  %v780_v2 = vld [vmem:[%s5346_s24 + $0x82] sm:$0xff] }
  0x1e   : > { %616 = vrot.lane.b32.xlu0 %v532_v14, %s5248_s25  ;;  %456 = vst.msk [vmem:[#allocation2 + $0x40] sm:$0xff] %vm447_vm0, %v415_v50  ;;  %457 = vst.msk [vmem:[#allocation2 + $0x48] sm:$0xff] %vm447_vm0, %v416_v54  ;;  %v538_v63 = vmul.f32 %v5341_v3, %v498_v59  ;;  %v779_v1 = vld [vmem:[%s5346_s24 + $0x7a] sm:$0xff]  ;;  %v377_v4 = vld [vmem:[%s5346_s24 + $0xa8] sm:$0xff]  ;;  %v820_v6 = vmul.f32 %v5341_v3, %v780_v2 }
  0x1f   : > { %618 = vrot.lane.b32.xlu1 %v533_v15, %s5248_s25  ;;  %458 = vst.msk [vmem:[#allocation2 + $0x50] sm:$0xff] %vm447_vm0, %v417_v55  ;;  %459 = vst.msk [vmem:[#allocation2 + $0x58] sm:$0xff] %vm447_vm0, %v418_v56  ;;  %v819_v5 = vmul.f32 %v5341_v3, %v779_v1  ;;  %v421_v7 = vmul.f32 %v5341_v3, %v377_v4  ;;  %v378_v8 = vld [vmem:[%s5346_s24 + $0xb0] sm:$0xff]  ;;  %v501_v10 = vld [vmem:[%s5346_s24 + $0x99] sm:$0xff] }
  0x20   : > { %460 = vst.msk [vmem:[#allocation2 + $0x60] sm:$0xff] %vm447_vm0, %v419_v61  ;;  %461 = vst.msk [vmem:[#allocation2 + $0x68] sm:$0xff] %vm447_vm0, %v420_v62  ;;  %v500_v9 = vld [vmem:[%s5346_s24 + $0x91] sm:$0xff]  ;;  %v422_v11 = vmul.f32 %v5341_v3, %v378_v8  ;;  %v541_v13 = vmul.f32 %v5341_v3, %v501_v10  ;;  %v782_v15 = vld [vmem:[%s5346_s24 + $0x9a] sm:$0xff] }
  0x21   : > { %462 = vst.msk [vmem:[#allocation2 + $0x70] sm:$0xff] %vm447_vm0, %v421_v7  ;;  %v540_v12 = vmul.f32 %v5341_v3, %v500_v9  ;;  %v781_v14 = vld [vmem:[%s5346_s24 + $0x92] sm:$0xff]  ;;  %v379_v16 = vld [vmem:[%s5346_s24 + $0xc0] sm:$0xff]  ;;  %v380_v20 = vld [vmem:[%s5346_s24 + $0xc8] sm:$0xff] }
  0x22   : > { %897 = vrot.lane.b32.xlu0 %v813_v18, %s5249_s26  ;;  %463 = vst.msk [vmem:[#allocation2 + $0x78] sm:$0xff] %vm447_vm0, %v422_v11  ;;  %v821_v17 = vmul.f32 %v5341_v3, %v781_v14  ;;  %v822_v18 = vmul.f32 %v5341_v3, %v782_v15  ;;  %v502_v21 = vld [vmem:[%s5346_s24 + $0xa9] sm:$0xff]  ;;  %v381_v28 = vld [vmem:[%s5346_s24 + $0xd8] sm:$0xff]  ;;  %v382_v32 = vld [vmem:[%s5346_s24 + $0xe0] sm:$0xff] }
  0x23   : > { %899 = vrot.lane.b32.xlu1 %v814_v19, %s5249_s26  ;;  %v423_v19 = vmul.f32 %v5341_v3, %v379_v16  ;;  %v542_v24 = vmul.f32 %v5341_v3, %v502_v21  ;;  %v425_v31 = vmul.f32 %v5341_v3, %v381_v28  ;;  %v504_v33 = vld [vmem:[%s5346_s24 + $0xc1] sm:$0xff]  ;;  %v505_v34 = vld [vmem:[%s5346_s24 + $0xc9] sm:$0xff]  ;;  %v506_v45 = vld [vmem:[%s5346_s24 + $0xd9] sm:$0xff] }
  0x24   : > { %v545_v37 = vmul.f32 %v5341_v3, %v505_v34  ;;  %v785_v38 = vld [vmem:[%s5346_s24 + $0xc2] sm:$0xff]  ;;  %v786_v39 = vld [vmem:[%s5346_s24 + $0xca] sm:$0xff]  ;;  %v546_v50 = vmul.f32 %v5341_v3, %v506_v45  ;;  %v787_v53 = vld [vmem:[%s5346_s24 + $0xda] sm:$0xff] }
  0x25   : > { %464 = vst.msk [vmem:[#allocation2 + $0x80] sm:$0xff] %vm447_vm0, %v423_v19  ;;  %466 = vst.msk [vmem:[#allocation2 + $0x90] sm:$0xff] %vm447_vm0, %v425_v31  ;;  %v383_v40 = vld [vmem:[%s5346_s24 + $0xf0] sm:$0xff]  ;;  %v825_v41 = vmul.f32 %v5341_v3, %v785_v38  ;;  %v826_v42 = vmul.f32 %v5341_v3, %v786_v39  ;;  %v507_v46 = vld [vmem:[%s5346_s24 + $0xe1] sm:$0xff]  ;;  %v827_v56 = vmul.f32 %v5341_v3, %v787_v53 }
  0x26   : > { %620 = vrot.lane.b32.xlu0 %v534_v22, %s5248_s25  ;;  %v503_v22 = vld [vmem:[%s5346_s24 + $0xb1] sm:$0xff]  ;;  %v1086_v48 = vld [vmem:[%s6923_s1] sm:$0xff]  ;;  %v1087_v49 = vld [vmem:[%s6923_s1 + $0x8] sm:$0xff]  ;;  %v547_v51 = vmul.f32 %v5341_v3, %v507_v46 }
  0x27   : > { %622 = vrot.lane.b32.xlu1 %v535_v23, %s5248_s25  ;;  %v424_v23 = vmul.f32 %v5341_v3, %v380_v20  ;;  %v543_v25 = vmul.f32 %v5341_v3, %v503_v22  ;;  %v5517_v52 = vpack.c.bf16 %v1087_v49, %v1086_v48  ;;  %v788_v54 = vld [vmem:[%s5346_s24 + $0xe2] sm:$0xff]  ;;  %v386_v59 = vld [vmem:[%s5346_s24 + $0x110] sm:$0xff]  ;;  %v509_v61 = vld [vmem:[%s5346_s24 + $0xf9] sm:$0xff] }
  0x28   : > { %v385_v55 = vld [vmem:[%s5346_s24 + $0x108] sm:$0xff]  ;;  %v828_v57 = vmul.f32 %v5341_v3, %v788_v54  ;;  %v508_v60 = vld [vmem:[%s5346_s24 + $0xf1] sm:$0xff]  ;;  %v430_v62 = vmul.f32 %v5341_v3, %v386_v59  ;;  %v790_v2 = vld [vmem:[%s5346_s24 + $0xfa] sm:$0xff] }
  0x29   : > { %465 = vst.msk [vmem:[#allocation2 + $0x88] sm:$0xff] %vm447_vm0, %v424_v23  ;;  %5035 = vmatprep.subr.bf16.mxu0 %v5517_v52  ;;  %v429_v58 = vmul.f32 %v5341_v3, %v385_v55  ;;  %v789_v1 = vld [vmem:[%s5346_s24 + $0xf2] sm:$0xff]  ;;  %v387_v4 = vld [vmem:[%s5346_s24 + $0x120] sm:$0xff]  ;;  %v388_v8 = vld [vmem:[%s5346_s24 + $0x128] sm:$0xff] }
  0x2a   : > { %901 = vrot.lane.b32.xlu0 %v815_v26, %s5249_s26  ;;  %v783_v26 = vld [vmem:[%s5346_s24 + $0xaa] sm:$0xff]  ;;  %471 = vst.msk [vmem:[#allocation2 + $0xb8] sm:$0xff] %vm447_vm0, %v430_v62  ;;  %v431_v7 = vmul.f32 %v5341_v3, %v387_v4  ;;  %v432_v11 = vmul.f32 %v5341_v3, %v388_v8  ;;  %v792_v15 = vld [vmem:[%s5346_s24 + $0x112] sm:$0xff]  ;;  %v390_v20 = vld [vmem:[%s5346_s24 + $0x140] sm:$0xff] }
  0x2b   : > { %903 = vrot.lane.b32.xlu1 %v816_v27, %s5249_s26  ;;  %v784_v27 = vld [vmem:[%s5346_s24 + $0xb2] sm:$0xff]  ;;  %v823_v29 = vmul.f32 %v5341_v3, %v783_v26  ;;  %470 = vst.msk [vmem:[#allocation2 + $0xb0] sm:$0xff] %vm447_vm0, %v429_v58  ;;  %v510_v9 = vld [vmem:[%s5346_s24 + $0x109] sm:$0xff]  ;;  %v512_v21 = vld [vmem:[%s5346_s24 + $0x121] sm:$0xff]  ;;  %v434_v23 = vmul.f32 %v5341_v3, %v390_v20 }
  0x2c   : > { %v824_v30 = vmul.f32 %v5341_v3, %v784_v27  ;;  %v511_v10 = vld [vmem:[%s5346_s24 + $0x111] sm:$0xff]  ;;  %472 = vst.msk [vmem:[#allocation2 + $0xc0] sm:$0xff] %vm447_vm0, %v431_v7  ;;  %473 = vst.msk [vmem:[#allocation2 + $0xc8] sm:$0xff] %vm447_vm0, %v432_v11  ;;  %v513_v22 = vld [vmem:[%s5346_s24 + $0x129] sm:$0xff] }
  0x2d   : > { %v791_v14 = vld [vmem:[%s5346_s24 + $0x10a] sm:$0xff]  ;;  %v389_v16 = vld [vmem:[%s5346_s24 + $0x138] sm:$0xff]  ;;  %475 = vst.msk [vmem:[#allocation2 + $0xd8] sm:$0xff] %vm447_vm0, %v434_v23  ;;  %v793_v26 = vld [vmem:[%s5346_s24 + $0x122] sm:$0xff] }
  0x2e   : > { %624 = vrot.lane.b32.xlu0 %v536_v35, %s5248_s25  ;;  %v426_v35 = vmul.f32 %v5341_v3, %v382_v32  ;;  %v433_v19 = vmul.f32 %v5341_v3, %v389_v16  ;;  %v794_v27 = vld [vmem:[%s5346_s24 + $0x12a] sm:$0xff]  ;;  %v392_v32 = vld [vmem:[%s5346_s24 + $0x158] sm:$0xff]  ;;  %v515_v34 = vld [vmem:[%s5346_s24 + $0x141] sm:$0xff] }
  0x2f   : > { %626 = vrot.lane.b32.xlu1 %v537_v36, %s5248_s25  ;;  %v544_v36 = vmul.f32 %v5341_v3, %v504_v33  ;;  %v391_v28 = vld [vmem:[%s5346_s24 + $0x150] sm:$0xff]  ;;  %v514_v33 = vld [vmem:[%s5346_s24 + $0x139] sm:$0xff]  ;;  %v796_v39 = vld [vmem:[%s5346_s24 + $0x142] sm:$0xff] }
  0x30   : > { %467 = vst.msk [vmem:[#allocation2 + $0x98] sm:$0xff] %vm447_vm0, %v426_v35  ;;  %474 = vst.msk [vmem:[#allocation2 + $0xd0] sm:$0xff] %vm447_vm0, %v433_v19  ;;  %v435_v31 = vmul.f32 %v5341_v3, %v391_v28  ;;  %v436_v35 = vmul.f32 %v5341_v3, %v392_v32  ;;  %v795_v38 = vld [vmem:[%s5346_s24 + $0x13a] sm:$0xff]  ;;  %v516_v45 = vld [vmem:[%s5346_s24 + $0x151] sm:$0xff] }
  0x31   : > { %v517_v46 = vld [vmem:[%s5346_s24 + $0x159] sm:$0xff]  ;;  %v556_v48 = vmul.f32 %v5341_v3, %v516_v45  ;;  %v518_v58 = vld [vmem:[%s5346_s24 + $0x169] sm:$0xff]  ;;  %v519_v59 = vld [vmem:[%s5346_s24 + $0x171] sm:$0xff] }
  0x32   : > { %905 = vrot.lane.b32.xlu0 %v817_v43, %s5249_s26  ;;  %v427_v43 = vmul.f32 %v5341_v3, %v383_v40  ;;  %476 = vst.msk [vmem:[#allocation2 + $0xe0] sm:$0xff] %vm447_vm0, %v435_v31  ;;  %477 = vst.msk [vmem:[#allocation2 + $0xe8] sm:$0xff] %vm447_vm0, %v436_v35  ;;  %v393_v40 = vld [vmem:[%s5346_s24 + $0x168] sm:$0xff]  ;;  %v557_v49 = vmul.f32 %v5341_v3, %v517_v46  ;;  %v363_v53 = vld [vmem:[%s5346_s24] sm:$0xff]  ;;  %v559_v62 = vmul.f32 %v5341_v3, %v519_v59 }
  0x33   : > { %907 = vrot.lane.b32.xlu1 %v818_v44, %s5249_s26  ;;  %v384_v44 = vld [vmem:[%s5346_s24 + $0xf8] sm:$0xff]  ;;  %v488_v4 = vld [vmem:[%s5346_s24 + $0x1] sm:$0xff]  ;;  %v521_v19 = vld [vmem:[%s5346_s24 + $0x189] sm:$0xff] }
  0x34   : > { %v428_v47 = vmul.f32 %v5341_v3, %v384_v44  ;;  %468 = vst.msk [vmem:[#allocation2 + $0xa0] sm:$0xff] %vm447_vm0, %v427_v43  ;;  %v437_v43 = vmul.f32 %v5341_v3, %v393_v40  ;;  %v394_v44 = vld [vmem:[%s5346_s24 + $0x170] sm:$0xff]  ;;  %v528_v8 = vmul.f32 %v5341_v3, %v488_v4  ;;  %v520_v16 = vld [vmem:[%s5346_s24 + $0x181] sm:$0xff] }
  0x35   : > { %v801_v23 = vld [vmem:[%s5346_s24 + $0x182] sm:$0xff]  ;;  %v806_v59 = vld [vmem:[%s5346_s24 + $0x1ba] sm:$0xff] }
  0x36   : > { %628 = vrot.lane.b32.xlu0 %v538_v63, %s5248_s25  ;;  %469 = vst.msk [vmem:[#allocation2 + $0xa8] sm:$0xff] %vm447_vm0, %v428_v47  ;;  %v548_v63 = vmul.f32 %v5341_v3, %v508_v60  ;;  %v438_v47 = vmul.f32 %v5341_v3, %v394_v44  ;;  %478 = vst.msk [vmem:[#allocation2 + $0xf0] sm:$0xff] %vm447_vm0, %v437_v43  ;;  %v841_v31 = vmul.f32 %v5341_v3, %v801_v23  ;;  %v804_v44 = vld [vmem:[%s5346_s24 + $0x1a2] sm:$0xff] }
  0x37   : > { %630 = vrot.lane.b32.xlu1 %v539_v0, %s5248_s25  ;;  %v549_v0 = vmul.f32 %v5341_v3, %v509_v61  ;;  %v558_v61 = vmul.f32 %v5341_v3, %v518_v58  ;;  %v844_v46 = vmul.f32 %v5341_v3, %v804_v44 }
  0x38   : > { %479 = vst.msk [vmem:[#allocation2 + $0xf8] sm:$0xff] %vm447_vm0, %v438_v47  ;;  %v524_v47 = vld [vmem:[%s5346_s24 + $0x1b1] sm:$0xff] }
  0x3a   : > { %909 = vrot.lane.b32.xlu0 %v819_v5, %s5249_s26  ;;  %v829_v5 = vmul.f32 %v5341_v3, %v789_v1 }
  0x3b   : > { %911 = vrot.lane.b32.xlu1 %v820_v6, %s5249_s26  ;;  %v830_v6 = vmul.f32 %v5341_v3, %v790_v2 }
  0x3e   : > { %632 = vrot.lane.b32.xlu0 %v540_v12, %s5248_s25  ;;  %v550_v12 = vmul.f32 %v5341_v3, %v510_v9 }
  0x3f   : > { %634 = vrot.lane.b32.xlu1 %v541_v13, %s5248_s25  ;;  %v551_v13 = vmul.f32 %v5341_v3, %v511_v10  ;;  %v769_v10 = vld [vmem:[%s5346_s24 + $0x2] sm:$0xff] }
  0x42   : > { %913 = vrot.lane.b32.xlu0 %v821_v17, %s5249_s26  ;;  %v831_v17 = vmul.f32 %v5341_v3, %v791_v14  ;;  %v809_v14 = vmul.f32 %v5341_v3, %v769_v10 }
  0x43   : > { %915 = vrot.lane.b32.xlu1 %v822_v18, %s5249_s26  ;;  %v832_v18 = vmul.f32 %v5341_v3, %v792_v15 }
  0x46   : > { %636 = vrot.lane.b32.xlu0 %v542_v24, %s5248_s25  ;;  %v552_v24 = vmul.f32 %v5341_v3, %v512_v21  ;;  %v560_v21 = vmul.f32 %v5341_v3, %v520_v16 }
  0x47   : > { %638 = vrot.lane.b32.xlu1 %v543_v25, %s5248_s25  ;;  %v553_v25 = vmul.f32 %v5341_v3, %v513_v22  ;;  %v561_v22 = vmul.f32 %v5341_v3, %v521_v19 }
  0x4a   : > { %917 = vrot.lane.b32.xlu0 %v823_v29, %s5249_s26  ;;  %v833_v29 = vmul.f32 %v5341_v3, %v793_v26  ;;  %v802_v26 = vld [vmem:[%s5346_s24 + $0x18a] sm:$0xff] }
  0x4b   : > { %919 = vrot.lane.b32.xlu1 %v824_v30, %s5249_s26  ;;  %v834_v30 = vmul.f32 %v5341_v3, %v794_v27  ;;  %v1088_v27 = vld [vmem:[%s6923_s1 + $0x10] sm:$0xff]  ;;  %v842_v32 = vmul.f32 %v5341_v3, %v802_v26  ;;  %v398_v26 = vld [vmem:[%s5346_s24 + $0x1a0] sm:$0xff] }
  0x4e   : > { %640 = vrot.lane.b32.xlu0 %v544_v36, %s5248_s25  ;;  %v554_v36 = vmul.f32 %v5341_v3, %v514_v33  ;;  %v522_v33 = vld [vmem:[%s5346_s24 + $0x199] sm:$0xff] }
  0x4f   : > { %642 = vrot.lane.b32.xlu1 %v545_v37, %s5248_s25  ;;  %v555_v37 = vmul.f32 %v5341_v3, %v515_v34 }
  0x52   : > { %921 = vrot.lane.b32.xlu0 %v825_v41, %s5249_s26  ;;  %v835_v41 = vmul.f32 %v5341_v3, %v795_v38  ;;  %v562_v38 = vmul.f32 %v5341_v3, %v522_v33 }
  0x53   : > { %923 = vrot.lane.b32.xlu1 %v826_v42, %s5249_s26  ;;  %v836_v42 = vmul.f32 %v5341_v3, %v796_v39 }
  0x56   : > { %644 = vrot.lane.b32.xlu0 %v546_v50, %s5248_s25  ;;  %v797_v50 = vld [vmem:[%s5346_s24 + $0x152] sm:$0xff] }
  0x57   : > { %646 = vrot.lane.b32.xlu1 %v547_v51, %s5248_s25  ;;  %v798_v51 = vld [vmem:[%s5346_s24 + $0x15a] sm:$0xff]  ;;  %v837_v54 = vmul.f32 %v5341_v3, %v797_v50 }
  0x58   : > { %v838_v55 = vmul.f32 %v5341_v3, %v798_v51  ;;  %v525_v50 = vld [vmem:[%s5346_s24 + $0x1b9] sm:$0xff]  ;;  %v564_v51 = vmul.f32 %v5341_v3, %v524_v47 }
  0x5a   : > { %925 = vrot.lane.b32.xlu0 %v827_v56, %s5249_s26  ;;  %v407_v56 = vmul.f32 %v5341_v3, %v363_v53  ;;  %v565_v53 = vmul.f32 %v5341_v3, %v525_v50 }
  0x5b   : > { %927 = vrot.lane.b32.xlu1 %v828_v57, %s5249_s26  ;;  %v364_v57 = vld [vmem:[%s5346_s24 + $0x8] sm:$0xff] }
  0x5c   : > { %v408_v60 = vmul.f32 %v5341_v3, %v364_v57  ;;  %448 = vst.msk [vmem:[#allocation2] sm:$0xff] %vm447_vm0, %v407_v56 }
  0x5e   : > { %648 = vrot.lane.b32.xlu0 %v548_v63, %s5248_s25  ;;  %449 = vst.msk [vmem:[#allocation2 + $0x8] sm:$0xff] %vm447_vm0, %v408_v60  ;;  %v799_v63 = vld [vmem:[%s5346_s24 + $0x16a] sm:$0xff] }
  0x5f   : > { %650 = vrot.lane.b32.xlu1 %v549_v0, %s5248_s25  ;;  %v800_v0 = vld [vmem:[%s5346_s24 + $0x172] sm:$0xff]  ;;  %v839_v1 = vmul.f32 %v5341_v3, %v799_v63 }
  0x60   : > { %v840_v2 = vmul.f32 %v5341_v3, %v800_v0 }
  0x62   : > { %929 = vrot.lane.b32.xlu0 %v829_v5, %s5249_s26  ;;  %v489_v5 = vld [vmem:[%s5346_s24 + $0x9] sm:$0xff] }
  0x63   : > { %931 = vrot.lane.b32.xlu1 %v830_v6, %s5249_s26  ;;  %v529_v9 = vmul.f32 %v5341_v3, %v489_v5 }
  0x66   : > { %652 = vrot.lane.b32.xlu0 %v550_v12, %s5248_s25 }
  0x67   : > { %654 = vrot.lane.b32.xlu1 %v551_v13, %s5248_s25  ;;  %v770_v13 = vld [vmem:[%s5346_s24 + $0xa] sm:$0xff] }
  0x68   : > { %v810_v15 = vmul.f32 %v5341_v3, %v770_v13  ;;  %v395_v13 = vld [vmem:[%s5346_s24 + $0x180] sm:$0xff] }
  0x6a   : > { %933 = vrot.lane.b32.xlu0 %v831_v17, %s5249_s26 }
  0x6b   : > { %935 = vrot.lane.b32.xlu1 %v832_v18, %s5249_s26 }
  0x6e   : > { %656 = vrot.lane.b32.xlu0 %v552_v24, %s5248_s25 }
  0x6f   : > { %658 = vrot.lane.b32.xlu1 %v553_v25, %s5248_s25 }
  0x72   : > { %937 = vrot.lane.b32.xlu0 %v833_v29, %s5249_s26  ;;  %v4325_v29 = vld [vmem:[%s6923_s1 + $0x30] sm:$0xff] }
  0x73   : > { %939 = vrot.lane.b32.xlu1 %v834_v30, %s5249_s26  ;;  %v4326_v30 = vld [vmem:[%s6923_s1 + $0x38] sm:$0xff] }
  0x76   : > { %660 = vrot.lane.b32.xlu0 %v554_v36, %s5248_s25  ;;  %v523_v36 = vld [vmem:[%s5346_s24 + $0x1a1] sm:$0xff] }
  0x77   : > { %662 = vrot.lane.b32.xlu1 %v555_v37, %s5248_s25  ;;  %v5686_v37 = vpack.c.bf16 %v4326_v30, %v4325_v29  ;;  %v563_v39 = vmul.f32 %v5341_v3, %v523_v36 }
  0x7a   : > { %941 = vrot.lane.b32.xlu0 %v835_v41, %s5249_s26 }
  0x7b   : > { %943 = vrot.lane.b32.xlu1 %v836_v42, %s5249_s26 }
  0x7e   : > { %664 = vrot.lane.b32.xlu0 %v556_v48, %s5248_s25 }
  0x7f   : > { %666 = vrot.lane.b32.xlu1 %v557_v49, %s5248_s25 }
  0x82   : > { %945 = vrot.lane.b32.xlu0 %v837_v54, %s5249_s26  ;;  %v805_v54 = vld [vmem:[%s5346_s24 + $0x1b2] sm:$0xff] }
  0x83   : > { %947 = vrot.lane.b32.xlu1 %v838_v55, %s5249_s26  ;;  %v845_v60 = vmul.f32 %v5341_v3, %v805_v54 }
  0x86   : > { %668 = vrot.lane.b32.xlu0 %v558_v61, %s5248_s25  ;;  %v846_v61 = vmul.f32 %v5341_v3, %v806_v59 }
  0x87   : > { %670 = vrot.lane.b32.xlu1 %v559_v62, %s5248_s25 }
  0x88   : > { %v613_v6 = vpop.permute.xlu0 %612 }
  0x89   : > { %v894_v7 = vpop.permute.xlu1 %893  ;;  %731 = vst.msk [vmem:[#allocation2 + $0x10] sm:$0xff] %vm728_vm1, %v613_v6 }
  0x8a   : > { %1012 = vst.msk [vmem:[#allocation2 + $0x10] sm:$0xff] %vm1009_vm2, %v894_v7  ;;  %949 = vrot.lane.b32.xlu0 %v839_v1, %s5249_s26 }
  0x8b   : > { %951 = vrot.lane.b32.xlu1 %v840_v2, %s5249_s26 }
  0x8c   : > { %v615_v11 = vpop.permute.xlu0 %614 }
  0x8d   : > { %v896_v12 = vpop.permute.xlu1 %895  ;;  %732 = vst.msk [vmem:[#allocation2 + $0x18] sm:$0xff] %vm728_vm1, %v615_v11 }
  0x8e   : > { %1013 = vst.msk [vmem:[#allocation2 + $0x18] sm:$0xff] %vm1009_vm2, %v896_v12  ;;  %608 = vrot.lane.b32.xlu0 %v528_v8, %s5248_s25 }
  0x8f   : > { %610 = vrot.lane.b32.xlu1 %v529_v9, %s5248_s25 }
  0x90   : > { %v617_v17 = vpop.permute.xlu0 %616 }
  0x91   : > { %v619_v18 = vpop.permute.xlu1 %618  ;;  %733 = vst.msk [vmem:[#allocation2 + $0x20] sm:$0xff] %vm728_vm1, %v617_v17  ;;  %v5654_v20 = vld [vmem:[#allocation2 + $0x10] sm:$0xff] }
  0x92   : > { %734 = vst.msk [vmem:[#allocation2 + $0x28] sm:$0xff] %vm728_vm1, %v619_v18  ;;  %889 = vrot.lane.b32.xlu0 %v809_v14, %s5249_s26  ;;  %4700 = vmatprep.mubr.msk.f32.mxu0 %vm1095_vm3, %v5654_v20  ;;  %v439_v14 = vmul.f32 %v5341_v3, %v395_v13 }
  0x93   : > { %891 = vrot.lane.b32.xlu1 %v810_v15, %s5249_s26  ;;  %v396_v15 = vld [vmem:[%s5346_s24 + $0x188] sm:$0xff] }
  0x94   : > { %v898_v24 = vpop.permute.xlu0 %897  ;;  %v440_v16 = vmul.f32 %v5341_v3, %v396_v15  ;;  %480 = vst.msk [vmem:[#allocation2 + $0x100] sm:$0xff] %vm447_vm0, %v439_v14 }
  0x95   : > { %v900_v25 = vpop.permute.xlu1 %899  ;;  %1014 = vst.msk [vmem:[#allocation2 + $0x20] sm:$0xff] %vm1009_vm2, %v898_v24  ;;  %v5669_v28 = vld [vmem:[#allocation2 + $0x18] sm:$0xff] }
  0x96   : > { %1015 = vst.msk [vmem:[#allocation2 + $0x28] sm:$0xff] %vm1009_vm2, %v900_v25  ;;  %4701 = vmatmul.mubr.msk.f32.vlgmr.msra.gmra.mrb[0].mxu0 %vm1095_vm3, %v5669_v28  ;;  %672 = vrot.lane.b32.xlu0 %v560_v21, %s5248_s25  ;;  %v397_v24 = vld [vmem:[%s5346_s24 + $0x198] sm:$0xff] }
  0x97   : > { %674 = vrot.lane.b32.xlu1 %v561_v22, %s5248_s25  ;;  %5037 = vmatpush3.bf16.msra.mxu0 %v5517_v52  ;;  %v803_v52 = vld [vmem:[%s5346_s24 + $0x19a] sm:$0xff]  ;;  %481 = vst.msk [vmem:[#allocation2 + $0x108] sm:$0xff] %vm447_vm0, %v440_v16  ;;  %v441_v25 = vmul.f32 %v5341_v3, %v397_v24 }
  0x98   : > { %v621_v34 = vpop.permute.xlu0 %620  ;;  %4758 = vmatprep.subr.mxu0 %v1088_v27  ;;  %v843_v45 = vmul.f32 %v5341_v3, %v803_v52 }
  0x99   : > { %v623_v35 = vpop.permute.xlu1 %622  ;;  %735 = vst.msk [vmem:[#allocation2 + $0x30] sm:$0xff] %vm728_vm1, %v621_v34 }
  0x9a   : > { %736 = vst.msk [vmem:[#allocation2 + $0x38] sm:$0xff] %vm728_vm1, %v623_v35  ;;  %953 = vrot.lane.b32.xlu0 %v841_v31, %s5249_s26 }
  0x9b   : > { %955 = vrot.lane.b32.xlu1 %v842_v32, %s5249_s26  ;;  %4759 = vmatpush3.msra.mxu0 %v1088_v27  ;;  %v442_v27 = vmul.f32 %v5341_v3, %v398_v26  ;;  %482 = vst.msk [vmem:[#allocation2 + $0x110] sm:$0xff] %vm447_vm0, %v441_v25 }
  0x9c   : > { %v902_v40 = vpop.permute.xlu0 %901  ;;  %v5695_v42 = vld [vmem:[#allocation2 + $0x20] sm:$0xff]  ;;  %5039 = vmatprep.subr.bf16.mxu0 %v5686_v37 }
  0x9d   : > { %v904_v41 = vpop.permute.xlu1 %903  ;;  %v5697_v43 = vld [vmem:[#allocation2 + $0x28] sm:$0xff]  ;;  %1016 = vst.msk [vmem:[#allocation2 + $0x30] sm:$0xff] %vm1009_vm2, %v902_v40  ;;  %4703 = vmatprep.mubr.msk.f32.mxu0 %vm1095_vm3, %v5695_v42 }
  0x9e   : > { %1017 = vst.msk [vmem:[#allocation2 + $0x38] sm:$0xff] %vm1009_vm2, %v904_v41  ;;  %4704 = vmatmul.mubr.msk.f32.gmra.mrb[2].mxu0 %vm1095_vm3, %v5697_v43  ;;  %676 = vrot.lane.b32.xlu0 %v562_v38, %s5248_s25 }
  0x9f   : > { %678 = vrot.lane.b32.xlu1 %v563_v39, %s5248_s25  ;;  %483 = vst.msk [vmem:[#allocation2 + $0x118] sm:$0xff] %vm447_vm0, %v442_v27 }
  0xa0   : > { %v625_v48 = vpop.permute.xlu0 %624 }
  0xa1   : > { %v627_v49 = vpop.permute.xlu1 %626  ;;  %737 = vst.msk [vmem:[#allocation2 + $0x40] sm:$0xff] %vm728_vm1, %v625_v48 }
  0xa2   : > { %738 = vst.msk [vmem:[#allocation2 + $0x48] sm:$0xff] %vm728_vm1, %v627_v49  ;;  %957 = vrot.lane.b32.xlu0 %v843_v45, %s5249_s26 }
  0xa3   : > { %959 = vrot.lane.b32.xlu1 %v844_v46, %s5249_s26 }
  0xa4   : > { %v906_v55 = vpop.permute.xlu0 %905  ;;  %v5720_v57 = vld [vmem:[#allocation2 + $0x30] sm:$0xff] }
  0xa5   : > { %v908_v56 = vpop.permute.xlu1 %907  ;;  %v5722_v58 = vld [vmem:[#allocation2 + $0x38] sm:$0xff]  ;;  %1018 = vst.msk [vmem:[#allocation2 + $0x40] sm:$0xff] %vm1009_vm2, %v906_v55  ;;  %4706 = vmatprep.mubr.msk.f32.mxu0 %vm1095_vm3, %v5720_v57 }
  0xa6   : > { %1019 = vst.msk [vmem:[#allocation2 + $0x48] sm:$0xff] %vm1009_vm2, %v908_v56  ;;  %4707 = vmatmul.mubr.msk.f32.gmra.mrb[4].mxu0 %vm1095_vm3, %v5722_v58  ;;  %680 = vrot.lane.b32.xlu0 %v564_v51, %s5248_s25 }
  0xa7   : > { %682 = vrot.lane.b32.xlu1 %v565_v53, %s5248_s25 }
  0xa8   : > { %v629_v62 = vpop.permute.xlu0 %628 }
  0xa9   : > { %v631_v63 = vpop.permute.xlu1 %630  ;;  %739 = vst.msk [vmem:[#allocation2 + $0x50] sm:$0xff] %vm728_vm1, %v629_v62 }
  0xaa   : > { %740 = vst.msk [vmem:[#allocation2 + $0x58] sm:$0xff] %vm728_vm1, %v631_v63  ;;  %961 = vrot.lane.b32.xlu0 %v845_v60, %s5249_s26 }
  0xab   : > { %963 = vrot.lane.b32.xlu1 %v846_v61, %s5249_s26 }
  0xac   : > { %v910_v0 = vpop.permute.xlu0 %909  ;;  %v5739_v2 = vld [vmem:[#allocation2 + $0x40] sm:$0xff] }
  0xad   : > { %v912_v1 = vpop.permute.xlu1 %911  ;;  %v5741_v4 = vld [vmem:[#allocation2 + $0x48] sm:$0xff]  ;;  %1020 = vst.msk [vmem:[#allocation2 + $0x50] sm:$0xff] %vm1009_vm2, %v910_v0  ;;  %4709 = vmatprep.mubr.msk.f32.mxu0 %vm1095_vm3, %v5739_v2 }
  0xae   : > { %1021 = vst.msk [vmem:[#allocation2 + $0x58] sm:$0xff] %vm1009_vm2, %v912_v1  ;;  %4710 = vmatmul.mubr.msk.f32.gmra.mrb[6].mxu0 %vm1095_vm3, %v5741_v4 }
  0xb0   : > { %v633_v5 = vpop.permute.xlu0 %632 }
  0xb1   : > { %v635_v6 = vpop.permute.xlu1 %634  ;;  %741 = vst.msk [vmem:[#allocation2 + $0x60] sm:$0xff] %vm728_vm1, %v633_v5 }
  0xb2   : > { %742 = vst.msk [vmem:[#allocation2 + $0x68] sm:$0xff] %vm728_vm1, %v635_v6 }
  0xb4   : > { %v914_v7 = vpop.permute.xlu0 %913  ;;  %v5751_v9 = vld [vmem:[#allocation2 + $0x50] sm:$0xff] }
  0xb5   : > { %v916_v8 = vpop.permute.xlu1 %915  ;;  %v5753_v10 = vld [vmem:[#allocation2 + $0x58] sm:$0xff]  ;;  %1022 = vst.msk [vmem:[#allocation2 + $0x60] sm:$0xff] %vm1009_vm2, %v914_v7  ;;  %4712 = vmatprep.mubr.msk.f32.mxu0 %vm1095_vm3, %v5751_v9 }
  0xb6   : > { %1023 = vst.msk [vmem:[#allocation2 + $0x68] sm:$0xff] %vm1009_vm2, %v916_v8  ;;  %4713 = vmatmul.mubr.msk.f32.gmra.mrb[8].mxu0 %vm1095_vm3, %v5753_v10 }
  0xb8   : > { %v637_v11 = vpop.permute.xlu0 %636 }
  0xb9   : > { %v639_v12 = vpop.permute.xlu1 %638  ;;  %743 = vst.msk [vmem:[#allocation2 + $0x70] sm:$0xff] %vm728_vm1, %v637_v11 }
  0xba   : > { %744 = vst.msk [vmem:[#allocation2 + $0x78] sm:$0xff] %vm728_vm1, %v639_v12 }
  0xbc   : > { %v918_v17 = vpop.permute.xlu0 %917  ;;  %v5767_v19 = vld [vmem:[#allocation2 + $0x60] sm:$0xff] }
  0xbd   : > { %v920_v18 = vpop.permute.xlu1 %919  ;;  %v5769_v21 = vld [vmem:[#allocation2 + $0x68] sm:$0xff]  ;;  %1024 = vst.msk [vmem:[#allocation2 + $0x70] sm:$0xff] %vm1009_vm2, %v918_v17  ;;  %4715 = vmatprep.mubr.msk.f32.mxu0 %vm1095_vm3, %v5767_v19 }
  0xbe   : > { %1025 = vst.msk [vmem:[#allocation2 + $0x78] sm:$0xff] %vm1009_vm2, %v920_v18  ;;  %4716 = vmatmul.mubr.msk.f32.gmra.mrb[10].mxu0 %vm1095_vm3, %v5769_v21 }
  0xc0   : > { %v641_v22 = vpop.permute.xlu0 %640 }
  0xc1   : > { %v643_v23 = vpop.permute.xlu1 %642  ;;  %745 = vst.msk [vmem:[#allocation2 + $0x80] sm:$0xff] %vm728_vm1, %v641_v22 }
  0xc2   : > { %746 = vst.msk [vmem:[#allocation2 + $0x88] sm:$0xff] %vm728_vm1, %v643_v23 }
  0xc4   : > { %v922_v29 = vpop.permute.xlu0 %921  ;;  %v5785_v31 = vld [vmem:[#allocation2 + $0x70] sm:$0xff] }
  0xc5   : > { %v924_v30 = vpop.permute.xlu1 %923  ;;  %v5787_v32 = vld [vmem:[#allocation2 + $0x78] sm:$0xff]  ;;  %1026 = vst.msk [vmem:[#allocation2 + $0x80] sm:$0xff] %vm1009_vm2, %v922_v29  ;;  %4718 = vmatprep.mubr.msk.f32.mxu0 %vm1095_vm3, %v5785_v31 }
  0xc6   : > { %1027 = vst.msk [vmem:[#allocation2 + $0x88] sm:$0xff] %vm1009_vm2, %v924_v30  ;;  %4719 = vmatmul.mubr.msk.f32.gmra.mrb[12].mxu0 %vm1095_vm3, %v5787_v32  ;;  %v399_v30 = vld [vmem:[%s5346_s24 + $0x1b0] sm:$0xff] }
  0xc8   : > { %v645_v3 = vpop.permute.xlu0 %644 }
  0xc9   : > { %v647_v33 = vpop.permute.xlu1 %646  ;;  %747 = vst.msk [vmem:[#allocation2 + $0x90] sm:$0xff] %vm728_vm1, %v645_v3  ;;  %v400_v3 = vld [vmem:[%s5346_s24 + $0x1b8] sm:$0xff] }
  0xca   : > { %748 = vst.msk [vmem:[#allocation2 + $0x98] sm:$0xff] %vm728_vm1, %v647_v33 }
  0xcc   : > { %v926_v34 = vpop.permute.xlu0 %925  ;;  %v5799_v36 = vld [vmem:[#allocation2 + $0x80] sm:$0xff] }
  0xcd   : > { %v928_v35 = vpop.permute.xlu1 %927  ;;  %v5801_v38 = vld [vmem:[#allocation2 + $0x88] sm:$0xff]  ;;  %1028 = vst.msk [vmem:[#allocation2 + $0x90] sm:$0xff] %vm1009_vm2, %v926_v34  ;;  %4721 = vmatprep.mubr.msk.f32.mxu0 %vm1095_vm3, %v5799_v36  ;;  %v5222_v34 = vld [vmem:[%s5328_s15] ss:$0 sm:$0xff] }
  0xce   : > { %1029 = vst.msk [vmem:[#allocation2 + $0x98] sm:$0xff] %vm1009_vm2, %v928_v35  ;;  %4722 = vmatmul.mubr.msk.f32.gmra.mrb[14].mxu0 %vm1095_vm3, %v5801_v38  ;;  %v443_v35 = vmul.f32 %v5222_v34, %v399_v30 }
  0xd0   : > { %v649_v39 = vpop.permute.xlu0 %648  ;;  %484 = vst.msk [vmem:[#allocation2 + $0x120] sm:$0xff] %vm447_vm0, %v443_v35 }
  0xd1   : > { %v651_v52 = vpop.permute.xlu1 %650  ;;  %749 = vst.msk [vmem:[#allocation2 + $0xa0] sm:$0xff] %vm728_vm1, %v649_v39  ;;  %v444_v39 = vmul.f32 %v5222_v34, %v400_v3 }
  0xd2   : > { %750 = vst.msk [vmem:[#allocation2 + $0xa8] sm:$0xff] %vm728_vm1, %v651_v52 }
  0xd3   : > { %485 = vst.msk [vmem:[#allocation2 + $0x128] sm:$0xff] %vm447_vm0, %v444_v39 }
  0xd4   : > { %v930_v40 = vpop.permute.xlu0 %929  ;;  %v5811_v44 = vld [vmem:[#allocation2 + $0x90] sm:$0xff] }
  0xd5   : > { %v932_v41 = vpop.permute.xlu1 %931  ;;  %v5813_v45 = vld [vmem:[#allocation2 + $0x98] sm:$0xff]  ;;  %1030 = vst.msk [vmem:[#allocation2 + $0xa0] sm:$0xff] %vm1009_vm2, %v930_v40  ;;  %4724 = vmatprep.mubr.msk.f32.mxu0 %vm1095_vm3, %v5811_v44 }
  0xd6   : > { %1031 = vst.msk [vmem:[#allocation2 + $0xa8] sm:$0xff] %vm1009_vm2, %v932_v41  ;;  %4725 = vmatmul.mubr.msk.f32.gmra.mrb[16].mxu0 %vm1095_vm3, %v5813_v45 }
  0xd8   : > { %v653_v46 = vpop.permute.xlu0 %652 }
  0xd9   : > { %v655_v47 = vpop.permute.xlu1 %654  ;;  %751 = vst.msk [vmem:[#allocation2 + $0xb0] sm:$0xff] %vm728_vm1, %v653_v46 }
  0xda   : > { %752 = vst.msk [vmem:[#allocation2 + $0xb8] sm:$0xff] %vm728_vm1, %v655_v47  ;;  %v4327_v47 = vld [vmem:[%s6923_s1 + $0x40] sm:$0xff] }
  0xdc   : > { %v934_v48 = vpop.permute.xlu0 %933  ;;  %v5823_v50 = vld [vmem:[#allocation2 + $0xa0] sm:$0xff] }
  0xdd   : > { %v936_v49 = vpop.permute.xlu1 %935  ;;  %v5825_v51 = vld [vmem:[#allocation2 + $0xa8] sm:$0xff]  ;;  %1032 = vst.msk [vmem:[#allocation2 + $0xb0] sm:$0xff] %vm1009_vm2, %v934_v48  ;;  %4727 = vmatprep.mubr.msk.f32.mxu0 %vm1095_vm3, %v5823_v50 }
  0xde   : > { %1033 = vst.msk [vmem:[#allocation2 + $0xb8] sm:$0xff] %vm1009_vm2, %v936_v49  ;;  %4728 = vmatmul.mubr.msk.f32.gmra.mrb[18].mxu0 %vm1095_vm3, %v5825_v51 }
  0xe0   : > { %v657_v53 = vpop.permute.xlu0 %656 }
  0xe1   : > { %v659_v54 = vpop.permute.xlu1 %658  ;;  %753 = vst.msk [vmem:[#allocation2 + $0xc0] sm:$0xff] %vm728_vm1, %v657_v53 }
  0xe2   : > { %754 = vst.msk [vmem:[#allocation2 + $0xc8] sm:$0xff] %vm728_vm1, %v659_v54 }
  0xe4   : > { %v938_v55 = vpop.permute.xlu0 %937  ;;  %v5835_v59 = vld [vmem:[#allocation2 + $0xb0] sm:$0xff] }
  0xe5   : > { %v940_v56 = vpop.permute.xlu1 %939  ;;  %v5837_v60 = vld [vmem:[#allocation2 + $0xb8] sm:$0xff]  ;;  %1034 = vst.msk [vmem:[#allocation2 + $0xc0] sm:$0xff] %vm1009_vm2, %v938_v55  ;;  %4730 = vmatprep.mubr.msk.f32.mxu0 %vm1095_vm3, %v5835_v59 }
  0xe6   : > { %1035 = vst.msk [vmem:[#allocation2 + $0xc8] sm:$0xff] %vm1009_vm2, %v940_v56  ;;  %4731 = vmatmul.mubr.msk.f32.gmra.mrb[20].mxu0 %vm1095_vm3, %v5837_v60 }
  0xe8   : > { %v661_v61 = vpop.permute.xlu0 %660 }
  0xe9   : > { %v663_v62 = vpop.permute.xlu1 %662  ;;  %755 = vst.msk [vmem:[#allocation2 + $0xd0] sm:$0xff] %vm728_vm1, %v661_v61 }
  0xea   : > { %756 = vst.msk [vmem:[#allocation2 + $0xd8] sm:$0xff] %vm728_vm1, %v663_v62 }
  0xec   : > { %v942_v63 = vpop.permute.xlu0 %941  ;;  %v5847_v1 = vld [vmem:[#allocation2 + $0xc0] sm:$0xff] }
  0xed   : > { %v944_v0 = vpop.permute.xlu1 %943  ;;  %v5849_v5 = vld [vmem:[#allocation2 + $0xc8] sm:$0xff]  ;;  %1036 = vst.msk [vmem:[#allocation2 + $0xd0] sm:$0xff] %vm1009_vm2, %v942_v63  ;;  %4733 = vmatprep.mubr.msk.f32.mxu0 %vm1095_vm3, %v5847_v1 }
  0xee   : > { %1037 = vst.msk [vmem:[#allocation2 + $0xd8] sm:$0xff] %vm1009_vm2, %v944_v0  ;;  %4734 = vmatmul.mubr.msk.f32.gmra.mrb[22].mxu0 %vm1095_vm3, %v5849_v5 }
  0xf0   : > { %v665_v6 = vpop.permute.xlu0 %664 }
  0xf1   : > { %v667_v7 = vpop.permute.xlu1 %666  ;;  %757 = vst.msk [vmem:[#allocation2 + $0xe0] sm:$0xff] %vm728_vm1, %v665_v6 }
  0xf2   : > { %758 = vst.msk [vmem:[#allocation2 + $0xe8] sm:$0xff] %vm728_vm1, %v667_v7 }
  0xf4   : > { %v946_v8 = vpop.permute.xlu0 %945  ;;  %v5859_v12 = vld [vmem:[#allocation2 + $0xd0] sm:$0xff] }
  0xf5   : > { %v948_v11 = vpop.permute.xlu1 %947  ;;  %v5861_v13 = vld [vmem:[#allocation2 + $0xd8] sm:$0xff]  ;;  %1038 = vst.msk [vmem:[#allocation2 + $0xe0] sm:$0xff] %vm1009_vm2, %v946_v8  ;;  %4736 = vmatprep.mubr.msk.f32.mxu0 %vm1095_vm3, %v5859_v12  ;;  %v6130_v8 = vld [vmem:[%s2171_s19] ss:$0 sm:$0xff] }
  0xf6   : > { %1039 = vst.msk [vmem:[#allocation2 + $0xe8] sm:$0xff] %vm1009_vm2, %v948_v11  ;;  %4737 = vmatmul.mubr.msk.f32.gmra.mrb[24].mxu0 %vm1095_vm3, %v5861_v13 }
  0xf8   : > { %v669_v14 = vpop.permute.xlu0 %668 }
  0xf9   : > { %v671_v15 = vpop.permute.xlu1 %670  ;;  %759 = vst.msk [vmem:[#allocation2 + $0xf0] sm:$0xff] %vm728_vm1, %v669_v14 }
  0xfa   : > { %760 = vst.msk [vmem:[#allocation2 + $0xf8] sm:$0xff] %vm728_vm1, %v671_v15 }
  0xfc   : > { %v950_v16 = vpop.permute.xlu0 %949  ;;  %v5871_v18 = vld [vmem:[#allocation2 + $0xe0] sm:$0xff] }
  0xfd   : > { %v952_v17 = vpop.permute.xlu1 %951  ;;  %v5873_v22 = vld [vmem:[#allocation2 + $0xe8] sm:$0xff]  ;;  %1040 = vst.msk [vmem:[#allocation2 + $0xf0] sm:$0xff] %vm1009_vm2, %v950_v16  ;;  %4739 = vmatprep.mubr.msk.f32.mxu0 %vm1095_vm3, %v5871_v18  ;;  %v6141_v16 = vld [vmem:[%s2249_s23] ss:$0 sm:$0xff] }
  0xfe   : > { %1041 = vst.msk [vmem:[#allocation2 + $0xf8] sm:$0xff] %vm1009_vm2, %v952_v17  ;;  %4740 = vmatmul.mubr.msk.f32.gmra.mrb[26].mxu0 %vm1095_vm3, %v5873_v22 }
 0x100   : > { %v609_v23 = vpop.permute.xlu0 %608 }
 0x101   : > { %v611_v24 = vpop.permute.xlu1 %610  ;;  %729 = vst.msk [vmem:[#allocation2] sm:$0xff] %vm728_vm1, %v609_v23 }
 0x102   : > { %730 = vst.msk [vmem:[#allocation2 + $0x8] sm:$0xff] %vm728_vm1, %v611_v24 }
 0x104   : > { %v890_v25 = vpop.permute.xlu0 %889  ;;  %v5883_v26 = vld [vmem:[#allocation2 + $0xf0] sm:$0xff] }
 0x105   : > { %v5885_v27 = vld [vmem:[#allocation2 + $0xf8] sm:$0xff]  ;;  %1010 = vst.msk [vmem:[#allocation2] sm:$0xff] %vm1009_vm2, %v890_v25  ;;  %v892_v29 = vpop.permute.xlu1 %891  ;;  %4742 = vmatprep.mubr.msk.f32.mxu0 %vm1095_vm3, %v5883_v26 }
 0x106   : > { %1011 = vst.msk [vmem:[#allocation2 + $0x8] sm:$0xff] %vm1009_vm2, %v892_v29  ;;  %4743 = vmatmul.mubr.msk.f32.gmra.mrb[28].mxu0 %vm1095_vm3, %v5885_v27 }
 0x108   : > { %v673_v33 = vpop.permute.xlu0 %672 }
 0x109   : > { %761 = vst.msk [vmem:[#allocation2 + $0x100] sm:$0xff] %vm728_vm1, %v673_v33  ;;  %v675_v52 = vpop.permute.xlu1 %674 }
 0x10a   : > { %762 = vst.msk [vmem:[#allocation2 + $0x108] sm:$0xff] %vm728_vm1, %v675_v52 }
 0x10c   : > { %v1050_v40 = vld [vmem:[#allocation2] sm:$0xff]  ;;  %v954_v41 = vpop.permute.xlu0 %953 }
 0x10d   : > { %4760 = vmatprep.mubr.msk.f32.mxu0 %vm1095_vm3, %v1050_v40  ;;  %v1051_v46 = vld [vmem:[#allocation2 + $0x8] sm:$0xff]  ;;  %1042 = vst.msk [vmem:[#allocation2 + $0x100] sm:$0xff] %vm1009_vm2, %v954_v41  ;;  %v956_v48 = vpop.permute.xlu1 %955 }
 0x10e   : > { %4761 = vmatmul.mubr.msk.f32.vlgmr.msra.gmra.mrb[30].mxu0 %vm1095_vm3, %v1051_v46  ;;  %1043 = vst.msk [vmem:[#allocation2 + $0x108] sm:$0xff] %vm1009_vm2, %v956_v48 }
 0x10f   : > { %5041 = vmatpush3.bf16.msra.mxu0 %v5686_v37  ;;  %4763 = vmatprep.mubr.msk.f32.mxu0 %vm1095_vm3, %v5654_v20 }
 0x110   : > { %4818 = vmatprep.subr.mxu0 %v4327_v47  ;;  %v677_v49 = vpop.permute.xlu0 %676 }
 0x111   : > { %763 = vst.msk [vmem:[#allocation2 + $0x110] sm:$0xff] %vm728_vm1, %v677_v49  ;;  %v679_v53 = vpop.permute.xlu1 %678 }
 0x112   : > { %4764 = vmatmul.mubr.msk.f32.gmra.mrb[2].mxu0 %vm1095_vm3, %v5669_v28  ;;  %764 = vst.msk [vmem:[#allocation2 + $0x118] sm:$0xff] %vm728_vm1, %v679_v53  ;;  %v4367_v53 = vld [vmem:[%s6924_s2 + $0x10] sm:$0xff] }
 0x113   : > { %4766 = vmatprep.mubr.msk.f32.mxu0 %vm1095_vm3, %v5695_v42  ;;  %4819 = vmatpush3.msra.mxu0 %v4327_v47 }
 0x114   : > { %v958_v54 = vpop.permute.xlu0 %957  ;;  %v5916_v55 = vld [vmem:[#allocation2 + $0x100] sm:$0xff] }
 0x115   : > { %1044 = vst.msk [vmem:[#allocation2 + $0x110] sm:$0xff] %vm1009_vm2, %v958_v54  ;;  %v960_v20 = vpop.permute.xlu1 %959  ;;  %4745 = vmatprep.mubr.msk.f32.mxu1 %vm1095_vm3, %v5916_v55  ;;  %v5921_v37 = vld [vmem:[#allocation2 + $0x108] sm:$0xff]  ;;  %v4368_v54 = vld [vmem:[%s6924_s2 + $0x18] sm:$0xf] }
 0x116   : > { %4767 = vmatmul.mubr.msk.f32.gmra.mrb[4].mxu0 %vm1095_vm3, %v5697_v43  ;;  %1045 = vst.msk [vmem:[#allocation2 + $0x118] sm:$0xff] %vm1009_vm2, %v960_v20  ;;  %4746 = vmatmul.mubr.msk.f32.vlgmr.msra.gmra.mrb[0].mxu1 %vm1095_vm3, %v5921_v37 }
 0x117   : > { %4769 = vmatprep.mubr.msk.f32.mxu0 %vm1095_vm3, %v5720_v57 }
 0x118   : > { %v681_v28 = vpop.permute.xlu0 %680 }
 0x119   : > { %765 = vst.msk [vmem:[#allocation2 + $0x120] sm:$0xff] %vm728_vm1, %v681_v28  ;;  %v683_v56 = vpop.permute.xlu1 %682  ;;  %v5042_v28 = vpack.c.bf16 %v4368_v54, %v4367_v53 }
 0x11a   : > { %4770 = vmatmul.mubr.msk.f32.gmra.mrb[6].mxu0 %vm1095_vm3, %v5722_v58  ;;  %766 = vst.msk [vmem:[#allocation2 + $0x128] sm:$0xff] %vm728_vm1, %v683_v56 }
 0x11b   : > { %4772 = vmatprep.mubr.msk.f32.mxu0 %vm1095_vm3, %v5739_v2  ;;  %5044 = vmatprep.subr.msk.bf16.mxu1 %vm6170_vm9, %v5042_v28 }
 0x11c   : > { %v5936_v61 = vld [vmem:[#allocation2 + $0x110] sm:$0xff]  ;;  %v962_v62 = vpop.permute.xlu0 %961  ;;  %5047 = vmatpush3.bf16.msk.msra.mxu1 %vm6170_vm9, %v5042_v28 }
 0x11d   : > { %4748 = vmatprep.mubr.msk.f32.mxu1 %vm1095_vm3, %v5936_v61  ;;  %v5940_v63 = vld [vmem:[#allocation2 + $0x118] sm:$0xff]  ;;  %1046 = vst.msk [vmem:[#allocation2 + $0x120] sm:$0xff] %vm1009_vm2, %v962_v62  ;;  %v964_v0 = vpop.permute.xlu1 %963 }
 0x11e   : > { %4773 = vmatmul.mubr.msk.f32.gmra.mrb[8].mxu0 %vm1095_vm3, %v5741_v4  ;;  %4749 = vmatmul.mubr.msk.f32.gmra.mrb[2].mxu1 %vm1095_vm3, %v5940_v63  ;;  %1047 = vst.msk [vmem:[#allocation2 + $0x128] sm:$0xff] %vm1009_vm2, %v964_v0 }
 0x11f   : > { %4775 = vmatprep.mubr.msk.f32.mxu0 %vm1095_vm3, %v5751_v9 }
 0x122   : > { %4776 = vmatmul.mubr.msk.f32.gmra.mrb[10].mxu0 %vm1095_vm3, %v5753_v10 }
 0x123   : > { %4778 = vmatprep.mubr.msk.f32.mxu0 %vm1095_vm3, %v5767_v19 }
 0x124   : > { %v1732_v6 = vld [vmem:[#allocation2 + $0x120] sm:$0xff] }
 0x125   : > { %v1733_v7 = vld [vmem:[#allocation2 + $0x128] sm:$0xff]  ;;  %4751 = vmatprep.mubr.msk.f32.mxu1 %vm1095_vm3, %v1732_v6 }
 0x126   : > { %4779 = vmatmul.mubr.msk.f32.gmra.mrb[12].mxu0 %vm1095_vm3, %v5769_v21  ;;  %4752 = vmatmul.mubr.msk.f32.gmra.mrb[4].mxu1 %vm1095_vm3, %v1733_v7 }
 0x127   : > { %4781 = vmatprep.mubr.msk.f32.mxu0 %vm1095_vm3, %v5785_v31 }
 0x12a   : > { %4782 = vmatmul.mubr.msk.f32.gmra.mrb[14].mxu0 %vm1095_vm3, %v5787_v32 }
 0x12b   : > { %4784 = vmatprep.mubr.msk.f32.mxu0 %vm1095_vm3, %v5799_v36 }
 0x12e   : > { %4785 = vmatmul.mubr.msk.f32.gmra.mrb[16].mxu0 %vm1095_vm3, %v5801_v38 }
 0x12f   : > { %4787 = vmatprep.mubr.msk.f32.mxu0 %vm1095_vm3, %v5811_v44 }
 0x132   : > { %4788 = vmatmul.mubr.msk.f32.gmra.mrb[18].mxu0 %vm1095_vm3, %v5813_v45 }
 0x133   : > { %4790 = vmatprep.mubr.msk.f32.mxu0 %vm1095_vm3, %v5823_v50 }
 0x136   : > { %4791 = vmatmul.mubr.msk.f32.gmra.mrb[20].mxu0 %vm1095_vm3, %v5825_v51 }
 0x137   : > { %4793 = vmatprep.mubr.msk.f32.mxu0 %vm1095_vm3, %v5835_v59 }
 0x13a   : > { %4794 = vmatmul.mubr.msk.f32.gmra.mrb[22].mxu0 %vm1095_vm3, %v5837_v60 }
 0x13b   : > { %4796 = vmatprep.mubr.msk.f32.mxu0 %vm1095_vm3, %v5847_v1 }
 0x13e   : > { %4797 = vmatmul.mubr.msk.f32.gmra.mrb[24].mxu0 %vm1095_vm3, %v5849_v5 }
 0x13f   : > { %4799 = vmatprep.mubr.msk.f32.mxu0 %vm1095_vm3, %v5859_v12 }
 0x142   : > { %4800 = vmatmul.mubr.msk.f32.gmra.mrb[26].mxu0 %vm1095_vm3, %v5861_v13 }
 0x143   : > { %4802 = vmatprep.mubr.msk.f32.mxu0 %vm1095_vm3, %v5871_v18 }
 0x146   : > { %4803 = vmatmul.mubr.msk.f32.gmra.mrb[28].mxu0 %vm1095_vm3, %v5873_v22 }
 0x147   : > { %4805 = vmatprep.mubr.msk.f32.mxu0 %vm1095_vm3, %v5883_v26 }
 0x14a   : > { %4806 = vmatmul.mubr.msk.f32.gmra.mrb[32].mxu0 %vm1095_vm3, %v5885_v27 }
 0x14b   : > { %4808 = vmatprep.mubr.msk.f32.mxu0 %vm1095_vm3, %v5916_v55 }
 0x14e   : > { %4809 = vmatmul.mubr.msk.f32.gmra.mrb[34].mxu0 %vm1095_vm3, %v5921_v37 }
 0x14f   : > { %4811 = vmatprep.mubr.msk.f32.mxu0 %vm1095_vm3, %v5936_v61 }
 0x152   : > { %4812 = vmatmul.mubr.msk.f32.gmra.mrb[36].mxu0 %vm1095_vm3, %v5940_v63 }
 0x153   : > { %4820 = vmatprep.mubr.msk.f32.mxu0 %vm1095_vm3, %v5695_v42 }
 0x156   : > { %4821 = vmatmul.mubr.msk.f32.vlgmr.msra.gmra.mrb[38].mxu0 %vm1095_vm3, %v5697_v43 }
 0x157   : > { %4823 = vmatprep.mubr.msk.f32.mxu0 %vm1095_vm3, %v5720_v57  ;;  %v5250_v57 = vmov 0.0  }
 0x158   : > { %2438 = vst.msk [vmem:[#allocation3 + $0x9] sm:$0xff] %vm2436_vm4, %v5250_v57  ;;  %2437 = vst.msk [vmem:[#allocation3 + $0x1] sm:$0xff] %vm2436_vm4, %v5250_v57 }
 0x159   : > { %2471 = vst.msk [vmem:[#allocation3 + $0x199] sm:$0xff] %vm2436_vm4, %v5250_v57  ;;  %2472 = vst.msk [vmem:[#allocation3 + $0x1a1] sm:$0xff] %vm2436_vm4, %v5250_v57 }
 0x15a   : > { %4824 = vmatmul.mubr.msk.f32.gmra.mrb[2].mxu0 %vm1095_vm3, %v5722_v58  ;;  %2493 = vst.msk [vmem:[#allocation3 + $0x29] sm:$0x1] %vm2473_vm5, %v5250_v57  ;;  %2474 = vst.msk [vmem:[#allocation3] sm:$0x1] %vm2473_vm5, %v5250_v57 }
 0x15b   : > { %4826 = vmatprep.mubr.msk.f32.mxu0 %vm1095_vm3, %v5739_v2  ;;  %2475 = vst.msk [vmem:[#allocation3 + $0x18] sm:$0x1] %vm2473_vm5, %v5250_v57  ;;  %2476 = vst.msk [vmem:[#allocation3 + $0x30] sm:$0x1] %vm2473_vm5, %v5250_v57 }
 0x15c   : > { %2477 = vst.msk [vmem:[#allocation3 + $0x48] sm:$0x1] %vm2473_vm5, %v5250_v57  ;;  %2478 = vst.msk [vmem:[#allocation3 + $0x60] sm:$0x1] %vm2473_vm5, %v5250_v57 }
 0x15d   : > { %2479 = vst.msk [vmem:[#allocation3 + $0x78] sm:$0x1] %vm2473_vm5, %v5250_v57  ;;  %2480 = vst.msk [vmem:[#allocation3 + $0x90] sm:$0x1] %vm2473_vm5, %v5250_v57 }
 0x15e   : > { %4827 = vmatmul.mubr.msk.f32.gmra.mrb[4].mxu0 %vm1095_vm3, %v5741_v4  ;;  %2481 = vst.msk [vmem:[#allocation3 + $0xa8] sm:$0x1] %vm2473_vm5, %v5250_v57  ;;  %2482 = vst.msk [vmem:[#allocation3 + $0xc0] sm:$0x1] %vm2473_vm5, %v5250_v57 }
 0x15f   : > { %4829 = vmatprep.mubr.msk.f32.mxu0 %vm1095_vm3, %v5751_v9  ;;  %2483 = vst.msk [vmem:[#allocation3 + $0xd8] sm:$0x1] %vm2473_vm5, %v5250_v57  ;;  %2484 = vst.msk [vmem:[#allocation3 + $0xf0] sm:$0x1] %vm2473_vm5, %v5250_v57  ;;  %v2583_v58 = vld [vmem:[#allocation3 + $0x9] sm:$0xff]  ;;  %v2582_v2 = vld [vmem:[#allocation3 + $0x1] sm:$0xff] }
 0x160   : > { %2485 = vst.msk [vmem:[#allocation3 + $0x108] sm:$0x1] %vm2473_vm5, %v5250_v57  ;;  %2486 = vst.msk [vmem:[#allocation3 + $0x120] sm:$0x1] %vm2473_vm5, %v5250_v57  ;;  %2656 = vrot.lane.b32.xlu1 %v2583_v58, %s5251_s29  ;;  %2654 = vrot.lane.b32.xlu0 %v2582_v2, %s5251_s29 }
 0x161   : > { %2487 = vst.msk [vmem:[#allocation3 + $0x138] sm:$0x1] %vm2473_vm5, %v5250_v57  ;;  %2488 = vst.msk [vmem:[#allocation3 + $0x150] sm:$0x1] %vm2473_vm5, %v5250_v57 }
 0x162   : > { %4830 = vmatmul.mubr.msk.f32.gmra.mrb[6].mxu0 %vm1095_vm3, %v5753_v10  ;;  %2489 = vst.msk [vmem:[#allocation3 + $0x168] sm:$0x1] %vm2473_vm5, %v5250_v57  ;;  %2490 = vst.msk [vmem:[#allocation3 + $0x180] sm:$0x1] %vm2473_vm5, %v5250_v57 }
 0x163   : > { %4832 = vmatprep.mubr.msk.f32.mxu0 %vm1095_vm3, %v5767_v19  ;;  %2491 = vst.msk [vmem:[#allocation3 + $0x198] sm:$0x1] %vm2473_vm5, %v5250_v57  ;;  %2492 = vst.msk [vmem:[#allocation3 + $0x11] sm:$0x1] %vm2473_vm5, %v5250_v57 }
 0x164   : > { %2494 = vst.msk [vmem:[#allocation3 + $0x41] sm:$0x1] %vm2473_vm5, %v5250_v57  ;;  %2495 = vst.msk [vmem:[#allocation3 + $0x59] sm:$0x1] %vm2473_vm5, %v5250_v57 }
 0x165   : > { %2496 = vst.msk [vmem:[#allocation3 + $0x71] sm:$0x1] %vm2473_vm5, %v5250_v57  ;;  %2497 = vst.msk [vmem:[#allocation3 + $0x89] sm:$0x1] %vm2473_vm5, %v5250_v57 }
 0x166   : > { %4833 = vmatmul.mubr.msk.f32.gmra.mrb[8].mxu0 %vm1095_vm3, %v5769_v21  ;;  %2498 = vst.msk [vmem:[#allocation3 + $0xa1] sm:$0x1] %vm2473_vm5, %v5250_v57  ;;  %2499 = vst.msk [vmem:[#allocation3 + $0xb9] sm:$0x1] %vm2473_vm5, %v5250_v57 }
 0x167   : > { %4835 = vmatprep.mubr.msk.f32.mxu0 %vm1095_vm3, %v5785_v31  ;;  %2500 = vst.msk [vmem:[#allocation3 + $0xd1] sm:$0x1] %vm2473_vm5, %v5250_v57  ;;  %2501 = vst.msk [vmem:[#allocation3 + $0xe9] sm:$0x1] %vm2473_vm5, %v5250_v57 }
 0x168   : > { %2502 = vst.msk [vmem:[#allocation3 + $0x101] sm:$0x1] %vm2473_vm5, %v5250_v57  ;;  %2503 = vst.msk [vmem:[#allocation3 + $0x119] sm:$0x1] %vm2473_vm5, %v5250_v57 }
 0x169   : > { %v4702_v42 = vpop.f32.mrb[0].mxu0  ;;  %2504 = vst.msk [vmem:[#allocation3 + $0x131] sm:$0x1] %vm2473_vm5, %v5250_v57  ;;  %2505 = vst.msk [vmem:[#allocation3 + $0x149] sm:$0x1] %vm2473_vm5, %v5250_v57 }
 0x16a   : > { %v1270_v43 = vpop.f32.mrb[1].mxu0  ;;  %4836 = vmatmul.mubr.msk.f32.gmra.mrb[10].mxu0 %vm1095_vm3, %v5787_v32  ;;  %2506 = vst.msk [vmem:[#allocation3 + $0x161] sm:$0x1] %vm2473_vm5, %v5250_v57  ;;  %2507 = vst.msk [vmem:[#allocation3 + $0x179] sm:$0x1] %vm2473_vm5, %v5250_v57 }
 0x16b   : > { %4838 = vmatprep.mubr.msk.f32.mxu0 %vm1095_vm3, %v5799_v36  ;;  %2508 = vst.msk [vmem:[#allocation3 + $0x191] sm:$0x1] %vm2473_vm5, %v5250_v57  ;;  %2509 = vst.msk [vmem:[#allocation3 + $0x1a9] sm:$0x1] %vm2473_vm5, %v5250_v57 }
 0x16e   : > { %4839 = vmatmul.mubr.msk.f32.gmra.mrb[12].mxu0 %vm1095_vm3, %v5801_v38 }
 0x16f   : > { %4841 = vmatprep.mubr.msk.f32.mxu0 %vm1095_vm3, %v5811_v44 }
 0x172   : > { %4842 = vmatmul.mubr.msk.f32.gmra.mrb[14].mxu0 %vm1095_vm3, %v5813_v45 }
 0x173   : > { %4844 = vmatprep.mubr.msk.f32.mxu0 %vm1095_vm3, %v5823_v50 }
 0x176   : > { %4845 = vmatmul.mubr.msk.f32.gmra.mrb[16].mxu0 %vm1095_vm3, %v5825_v51  ;;  %v6126_v51 = vld [vmem:[%s2129_s16] ss:$0 sm:$0xff] }
 0x177   : > { %4847 = vmatprep.mubr.msk.f32.mxu0 %vm1095_vm3, %v5835_v59  ;;  %v2511_v59 = vld [vmem:[#allocation3 + $0x8] sm:$0xff] }
 0x178   : > { %2547 = vst.msk [vmem:[#allocation4 + $0x8] sm:$0xff] %vm2436_vm4, %v2511_v59 }
 0x17a   : > { %4848 = vmatmul.mubr.msk.f32.gmra.mrb[18].mxu0 %vm1095_vm3, %v5837_v60  ;;  %v2510_v60 = vld [vmem:[#allocation3] sm:$0xff] }
 0x17b   : > { %4850 = vmatprep.mubr.msk.f32.mxu0 %vm1095_vm3, %v5847_v1  ;;  %2546 = vst.msk [vmem:[#allocation4] sm:$0xff] %vm2436_vm4, %v2510_v60 }
 0x17e   : > { %4851 = vmatmul.mubr.msk.f32.gmra.mrb[20].mxu0 %vm1095_vm3, %v5849_v5 }
 0x17f   : > { %4853 = vmatprep.mubr.msk.f32.mxu0 %vm1095_vm3, %v5859_v12 }
 0x182   : > { %4854 = vmatmul.mubr.msk.f32.gmra.mrb[22].mxu0 %vm1095_vm3, %v5861_v13 }
 0x183   : > { %4856 = vmatprep.mubr.msk.f32.mxu0 %vm1095_vm3, %v5871_v18 }
 0x186   : > { %4857 = vmatmul.mubr.msk.f32.gmra.mrb[24].mxu0 %vm1095_vm3, %v5873_v22 }
 0x187   : > { %4859 = vmatprep.mubr.msk.f32.mxu0 %vm1095_vm3, %v5883_v26 }
 0x18a   : > { %4860 = vmatmul.mubr.msk.f32.gmra.mrb[26].mxu0 %vm1095_vm3, %v5885_v27 }
 0x18b   : > { %4862 = vmatprep.mubr.msk.f32.mxu0 %vm1095_vm3, %v5916_v55 }
 0x18e   : > { %4863 = vmatmul.mubr.msk.f32.gmra.mrb[28].mxu0 %vm1095_vm3, %v5921_v37 }
 0x18f   : > { %4865 = vmatprep.mubr.msk.f32.mxu0 %vm1095_vm3, %v5936_v61 }
 0x192   : > { %4866 = vmatmul.mubr.msk.f32.gmra.mrb[32].mxu0 %vm1095_vm3, %v5940_v63 }
 0x193   : > { %4868 = vmatprep.mubr.msk.f32.mxu0 %vm1095_vm3, %v1732_v6 }
 0x196   : > { %4869 = vmatmul.mubr.msk.f32.gmra.mrb[34].mxu0 %vm1095_vm3, %v1733_v7 }
 0x1d2   : > { %v2657_v1 = vpop.permute.xlu1 %2656  ;;  %v2655_v11 = vpop.permute.xlu0 %2654 }
 0x1d3   : > { %2764 = vst.msk [vmem:[#allocation4 + $0x8] sm:$0xff] %vm2762_vm6, %v2657_v1  ;;  %2763 = vst.msk [vmem:[#allocation4] sm:$0xff] %vm2762_vm6, %v2655_v11 }
 0x1e1   : > { %v4762_v4 = vpop.f32.mrb[30].mxu0 }
 0x1e2   : > { %v1521_v9 = vpop.f32.mrb[31].mxu0 }
 0x1e9   : > { %v6110_v10 = vpop.f32.mrb[0].mxu1 }
 0x1ea   : > { %v6112_v19 = vpop.f32.mrb[1].mxu1 }
 0x1f1   : > { %v6114_v21 = vpop.f32.mrb[2].mxu1 }
 0x1f2   : > { %v6116_v31 = vpop.f32.mrb[3].mxu1 }
 0x1f9   : > { %v4753_v32 = vpop.f32.mrb[4].mxu1 }
 0x1fa   : > { %v1440_v36 = vpop.f32.mrb[5].mxu1 }
 0x225   : > { %v4813_v38 = vpop.f32.mrb[36].mxu0 }
 0x226   : > { %v1691_v44 = vpop.f32.mrb[37].mxu0 }
 0x229   : > { %v4822_v45 = vpop.f32.mrb[38].mxu0 }
 0x22a   : > { %v1914_v50 = vpop.f32.mrb[39].mxu0 }
 0x22d   : > { %v4825_v5 = vpop.f32.mrb[2].mxu0 }
 0x22e   : > { %v2138_v12 = vmul.f32 %v4825_v5, %v6126_v51  ;;  %v1924_v13 = vpop.f32.mrb[3].mxu0 }
 0x22f   : > { %v2137_v14 = vmul.f32 %v6126_v51, %v1924_v13 }
 0x230   : > { %v2180_v15 = vadd.f32 %v6130_v8, %v2138_v12 }
 0x231   : > { %v2179_v17 = vadd.f32 %v6130_v8, %v2137_v14  ;;  %v4828_v18 = vpop.f32.mrb[4].mxu0 }
 0x232   : > { %v2216_v22 = vmax.f32 %v2180_v15, 0.0  ;;  %v2140_v23 = vmul.f32 %v4828_v18, %v6126_v51  ;;  %v1934_v24 = vpop.f32.mrb[5].mxu0 }
 0x233   : > { %v2215_v25 = vmax.f32 %v2179_v17, 0.0  ;;  %v2139_v26 = vmul.f32 %v6126_v51, %v1934_v24 }
 0x234   : > { %v2258_v27 = vmul.f32 %v6141_v16, %v2216_v22  ;;  %v2182_v29 = vadd.f32 %v6130_v8, %v2140_v23 }
 0x235   : > { %v2257_v30 = vmul.f32 %v6141_v16, %v2215_v25  ;;  %v2181_v3 = vadd.f32 %v6130_v8, %v2139_v26  ;;  %v4831_v33 = vpop.f32.mrb[6].mxu0 }
 0x236   : > { %2440 = vst.msk [vmem:[#allocation3 + $0x21] sm:$0xff] %vm2436_vm4, %v2258_v27  ;;  %v2218_v34 = vmax.f32 %v2182_v29, 0.0  ;;  %v2142_v35 = vmul.f32 %v4831_v33, %v6126_v51  ;;  %v1944_v39 = vpop.f32.mrb[7].mxu0 }
 0x237   : > { %2439 = vst.msk [vmem:[#allocation3 + $0x19] sm:$0xff] %vm2436_vm4, %v2257_v30  ;;  %v2217_v52 = vmax.f32 %v2181_v3, 0.0  ;;  %v2141_v40 = vmul.f32 %v6126_v51, %v1944_v39 }
 0x238   : > { %v2260_v41 = vmul.f32 %v6141_v16, %v2218_v34  ;;  %v2184_v46 = vadd.f32 %v6130_v8, %v2142_v35 }
 0x239   : > { %v2259_v47 = vmul.f32 %v6141_v16, %v2217_v52  ;;  %v2183_v48 = vadd.f32 %v6130_v8, %v2141_v40  ;;  %v4834_v49 = vpop.f32.mrb[8].mxu0 }
 0x23a   : > { %2442 = vst.msk [vmem:[#allocation3 + $0x39] sm:$0xff] %vm2436_vm4, %v2260_v41  ;;  %v2220_v55 = vmax.f32 %v2184_v46, 0.0  ;;  %v2144_v20 = vmul.f32 %v4834_v49, %v6126_v51  ;;  %v1954_v37 = vpop.f32.mrb[9].mxu0 }
 0x23b   : > { %2441 = vst.msk [vmem:[#allocation3 + $0x31] sm:$0xff] %vm2436_vm4, %v2259_v47  ;;  %v2219_v56 = vmax.f32 %v2183_v48, 0.0  ;;  %v2143_v61 = vmul.f32 %v6126_v51, %v1954_v37 }
 0x23c   : > { %v2262_v62 = vmul.f32 %v6141_v16, %v2220_v55  ;;  %v2186_v63 = vadd.f32 %v6130_v8, %v2144_v20 }
 0x23d   : > { %v2261_v6 = vmul.f32 %v6141_v16, %v2219_v56  ;;  %v2185_v7 = vadd.f32 %v6130_v8, %v2143_v61  ;;  %v4837_v42 = vpop.f32.mrb[10].mxu0  ;;  %v2585_v43 = vld [vmem:[#allocation3 + $0x21] sm:$0xff] }
 0x23e   : > { %2444 = vst.msk [vmem:[#allocation3 + $0x51] sm:$0xff] %vm2436_vm4, %v2262_v62  ;;  %v2222_v57 = vmax.f32 %v2186_v63, 0.0  ;;  %v2146_v58 = vmul.f32 %v4837_v42, %v6126_v51  ;;  %2660 = vrot.lane.b32.xlu1 %v2585_v43, %s5251_s29  ;;  %v1964_v2 = vpop.f32.mrb[11].mxu0  ;;  %v2584_v4 = vld [vmem:[#allocation3 + $0x19] sm:$0xff]  ;;  %v2802_v1 = vld [vmem:[#allocation3 + $0x22] sm:$0xff] }
 0x23f   : > { %v2513_v9 = vld [vmem:[#allocation3 + $0x20] sm:$0xff]  ;;  %2443 = vst.msk [vmem:[#allocation3 + $0x49] sm:$0xff] %vm2436_vm4, %v2261_v6  ;;  %v2221_v32 = vmax.f32 %v2185_v7, 0.0  ;;  %v2145_v36 = vmul.f32 %v6126_v51, %v1964_v2  ;;  %2658 = vrot.lane.b32.xlu0 %v2584_v4, %s5251_s29  ;;  %v2512_v38 = vld [vmem:[#allocation3 + $0x18] sm:$0xff] }
 0x240   : > { %2549 = vst.msk [vmem:[#allocation4 + $0x18] sm:$0xff] %vm2436_vm4, %v2513_v9  ;;  %v2264_v44 = vmul.f32 %v6141_v16, %v2222_v57  ;;  %v2188_v45 = vadd.f32 %v6130_v8, %v2146_v58  ;;  %2548 = vst.msk [vmem:[#allocation4 + $0x10] sm:$0xff] %vm2436_vm4, %v2512_v38  ;;  %v2801_v13 = vld [vmem:[#allocation3 + $0x1a] sm:$0xff] }
 0x241   : > { %v2263_v50 = vmul.f32 %v6141_v16, %v2221_v32  ;;  %v2187_v59 = vadd.f32 %v6130_v8, %v2145_v36  ;;  %v4840_v60 = vpop.f32.mrb[12].mxu0  ;;  %v2587_v27 = vld [vmem:[#allocation3 + $0x39] sm:$0xff] }
 0x242   : > { %2446 = vst.msk [vmem:[#allocation3 + $0x69] sm:$0xff] %vm2436_vm4, %v2264_v44  ;;  %v2224_v5 = vmax.f32 %v2188_v45, 0.0  ;;  %v2148_v11 = vmul.f32 %v4840_v60, %v6126_v51  ;;  %2877 = vrot.lane.b32.xlu1 %v2802_v1, %s5248_s25  ;;  %v1974_v12 = vpop.f32.mrb[13].mxu0  ;;  %v2515_v14 = vld [vmem:[#allocation3 + $0x38] sm:$0xff]  ;;  %v2514_v18 = vld [vmem:[#allocation3 + $0x30] sm:$0xff] }
 0x243   : > { %2445 = vst.msk [vmem:[#allocation3 + $0x61] sm:$0xff] %vm2436_vm4, %v2263_v50  ;;  %v2223_v15 = vmax.f32 %v2187_v59, 0.0  ;;  %v2147_v17 = vmul.f32 %v6126_v51, %v1974_v12  ;;  %2875 = vrot.lane.b32.xlu0 %v2801_v13, %s5248_s25  ;;  %2551 = vst.msk [vmem:[#allocation4 + $0x28] sm:$0xff] %vm2436_vm4, %v2515_v14  ;;  %v2586_v33 = vld [vmem:[#allocation3 + $0x31] sm:$0xff]  ;;  %v2804_v49 = vld [vmem:[#allocation3 + $0x3a] sm:$0xff] }
 0x244   : > { %v2266_v22 = vmul.f32 %v6141_v16, %v2224_v5  ;;  %v2190_v23 = vadd.f32 %v6130_v8, %v2148_v11  ;;  %2550 = vst.msk [vmem:[#allocation4 + $0x20] sm:$0xff] %vm2436_vm4, %v2514_v18  ;;  %v2803_v20 = vld [vmem:[#allocation3 + $0x32] sm:$0xff] }
 0x245   : > { %v2265_v24 = vmul.f32 %v6141_v16, %v2223_v15  ;;  %v2189_v25 = vadd.f32 %v6130_v8, %v2147_v17  ;;  %v4843_v26 = vpop.f32.mrb[14].mxu0  ;;  %v2589_v43 = vld [vmem:[#allocation3 + $0x51] sm:$0xff] }
 0x246   : > { %2448 = vst.msk [vmem:[#allocation3 + $0x81] sm:$0xff] %vm2436_vm4, %v2266_v22  ;;  %v2226_v29 = vmax.f32 %v2190_v23, 0.0  ;;  %v2150_v30 = vmul.f32 %v4843_v26, %v6126_v51  ;;  %2664 = vrot.lane.b32.xlu1 %v2587_v27, %s5251_s29  ;;  %v1984_v3 = vpop.f32.mrb[15].mxu0  ;;  %v2517_v34 = vld [vmem:[#allocation3 + $0x50] sm:$0xff]  ;;  %v2516_v52 = vld [vmem:[#allocation3 + $0x48] sm:$0xff] }
 0x247   : > { %2447 = vst.msk [vmem:[#allocation3 + $0x79] sm:$0xff] %vm2436_vm4, %v2265_v24  ;;  %v2225_v35 = vmax.f32 %v2189_v25, 0.0  ;;  %v2149_v39 = vmul.f32 %v6126_v51, %v1984_v3  ;;  %2662 = vrot.lane.b32.xlu0 %v2586_v33, %s5251_s29  ;;  %2553 = vst.msk [vmem:[#allocation4 + $0x38] sm:$0xff] %vm2436_vm4, %v2517_v34  ;;  %v2588_v4 = vld [vmem:[#allocation3 + $0x49] sm:$0xff]  ;;  %v2806_v1 = vld [vmem:[#allocation3 + $0x52] sm:$0xff] }
 0x248   : > { %v2268_v40 = vmul.f32 %v6141_v16, %v2226_v29  ;;  %v2192_v41 = vadd.f32 %v6130_v8, %v2150_v30  ;;  %2552 = vst.msk [vmem:[#allocation4 + $0x30] sm:$0xff] %vm2436_vm4, %v2516_v52  ;;  %v2805_v13 = vld [vmem:[#allocation3 + $0x4a] sm:$0xff] }
 0x249   : > { %v2267_v46 = vmul.f32 %v6141_v16, %v2225_v35  ;;  %v2191_v47 = vadd.f32 %v6130_v8, %v2149_v39  ;;  %v4846_v48 = vpop.f32.mrb[16].mxu0  ;;  %v2591_v27 = vld [vmem:[#allocation3 + $0x69] sm:$0xff] }
 0x24a   : > { %2450 = vst.msk [vmem:[#allocation3 + $0x99] sm:$0xff] %vm2436_vm4, %v2268_v40  ;;  %v2228_v53 = vmax.f32 %v2192_v41, 0.0  ;;  %v2152_v54 = vmul.f32 %v4846_v48, %v6126_v51  ;;  %2881 = vrot.lane.b32.xlu1 %v2804_v49, %s5248_s25  ;;  %v1994_v55 = vpop.f32.mrb[17].mxu0  ;;  %v2519_v37 = vld [vmem:[#allocation3 + $0x68] sm:$0xff]  ;;  %v2518_v61 = vld [vmem:[#allocation3 + $0x60] sm:$0xff] }
 0x24b   : > { %2449 = vst.msk [vmem:[#allocation3 + $0x91] sm:$0xff] %vm2436_vm4, %v2267_v46  ;;  %v2227_v28 = vmax.f32 %v2191_v47, 0.0  ;;  %v2151_v56 = vmul.f32 %v6126_v51, %v1994_v55  ;;  %2879 = vrot.lane.b32.xlu0 %v2803_v20, %s5248_s25  ;;  %2555 = vst.msk [vmem:[#allocation4 + $0x48] sm:$0xff] %vm2436_vm4, %v2519_v37  ;;  %v2590_v33 = vld [vmem:[#allocation3 + $0x61] sm:$0xff]  ;;  %v2808_v49 = vld [vmem:[#allocation3 + $0x6a] sm:$0xff] }
 0x24c   : > { %v2270_v62 = vmul.f32 %v6141_v16, %v2228_v53  ;;  %v2194_v63 = vadd.f32 %v6130_v8, %v2152_v54  ;;  %2554 = vst.msk [vmem:[#allocation4 + $0x40] sm:$0xff] %vm2436_vm4, %v2518_v61  ;;  %v2807_v20 = vld [vmem:[#allocation3 + $0x62] sm:$0xff] }
 0x24d   : > { %v2269_v6 = vmul.f32 %v6141_v16, %v2227_v28  ;;  %v2193_v7 = vadd.f32 %v6130_v8, %v2151_v56  ;;  %v4849_v42 = vpop.f32.mrb[18].mxu0 }
 0x24e   : > { %2452 = vst.msk [vmem:[#allocation3 + $0xb1] sm:$0xff] %vm2436_vm4, %v2270_v62  ;;  %v2230_v57 = vmax.f32 %v2194_v63, 0.0  ;;  %v2154_v58 = vmul.f32 %v4849_v42, %v6126_v51  ;;  %2668 = vrot.lane.b32.xlu1 %v2589_v43, %s5251_s29  ;;  %v2004_v2 = vpop.f32.mrb[19].mxu0  ;;  %v2521_v9 = vld [vmem:[#allocation3 + $0x80] sm:$0xff]  ;;  %v2520_v38 = vld [vmem:[#allocation3 + $0x78] sm:$0xff] }
 0x24f   : > { %2451 = vst.msk [vmem:[#allocation3 + $0xa9] sm:$0xff] %vm2436_vm4, %v2269_v6  ;;  %v2229_v32 = vmax.f32 %v2193_v7, 0.0  ;;  %v2153_v36 = vmul.f32 %v6126_v51, %v2004_v2  ;;  %2666 = vrot.lane.b32.xlu0 %v2588_v4, %s5251_s29  ;;  %2557 = vst.msk [vmem:[#allocation4 + $0x58] sm:$0xff] %vm2436_vm4, %v2521_v9  ;;  %v2593_v43 = vld [vmem:[#allocation3 + $0x81] sm:$0xff]  ;;  %v2592_v4 = vld [vmem:[#allocation3 + $0x79] sm:$0xff] }
 0x250   : > { %v2272_v44 = vmul.f32 %v6141_v16, %v2230_v57  ;;  %v2196_v45 = vadd.f32 %v6130_v8, %v2154_v58  ;;  %2556 = vst.msk [vmem:[#allocation4 + $0x50] sm:$0xff] %vm2436_vm4, %v2520_v38 }
 0x251   : > { %v2271_v50 = vmul.f32 %v6141_v16, %v2229_v32  ;;  %v2195_v59 = vadd.f32 %v6130_v8, %v2153_v36  ;;  %v4852_v60 = vpop.f32.mrb[20].mxu0 }
 0x252   : > { %2454 = vst.msk [vmem:[#allocation3 + $0xc9] sm:$0xff] %vm2436_vm4, %v2272_v44  ;;  %v2232_v5 = vmax.f32 %v2196_v45, 0.0  ;;  %v2156_v11 = vmul.f32 %v4852_v60, %v6126_v51  ;;  %2885 = vrot.lane.b32.xlu1 %v2806_v1, %s5248_s25  ;;  %v2014_v12 = vpop.f32.mrb[21].mxu0  ;;  %v2523_v14 = vld [vmem:[#allocation3 + $0x98] sm:$0xff]  ;;  %v2522_v18 = vld [vmem:[#allocation3 + $0x90] sm:$0xff]  ;;  %v2810_v1 = vld [vmem:[#allocation3 + $0x82] sm:$0xff] }
 0x253   : > { %2453 = vst.msk [vmem:[#allocation3 + $0xc1] sm:$0xff] %vm2436_vm4, %v2271_v50  ;;  %v2231_v15 = vmax.f32 %v2195_v59, 0.0  ;;  %v2155_v17 = vmul.f32 %v6126_v51, %v2014_v12  ;;  %2883 = vrot.lane.b32.xlu0 %v2805_v13, %s5248_s25  ;;  %2559 = vst.msk [vmem:[#allocation4 + $0x68] sm:$0xff] %vm2436_vm4, %v2523_v14  ;;  %v2809_v13 = vld [vmem:[#allocation3 + $0x7a] sm:$0xff] }
 0x254   : > { %v2274_v22 = vmul.f32 %v6141_v16, %v2232_v5  ;;  %v2198_v23 = vadd.f32 %v6130_v8, %v2156_v11  ;;  %2558 = vst.msk [vmem:[#allocation4 + $0x60] sm:$0xff] %vm2436_vm4, %v2522_v18 }
 0x255   : > { %v2273_v24 = vmul.f32 %v6141_v16, %v2231_v15  ;;  %v2197_v25 = vadd.f32 %v6130_v8, %v2155_v17  ;;  %v4855_v26 = vpop.f32.mrb[22].mxu0 }
 0x256   : > { %2456 = vst.msk [vmem:[#allocation3 + $0xe1] sm:$0xff] %vm2436_vm4, %v2274_v22  ;;  %v2234_v29 = vmax.f32 %v2198_v23, 0.0  ;;  %v2158_v30 = vmul.f32 %v4855_v26, %v6126_v51  ;;  %2672 = vrot.lane.b32.xlu1 %v2591_v27, %s5251_s29  ;;  %v2024_v3 = vpop.f32.mrb[23].mxu0  ;;  %v2525_v34 = vld [vmem:[#allocation3 + $0xb0] sm:$0xff]  ;;  %v2524_v52 = vld [vmem:[#allocation3 + $0xa8] sm:$0xff]  ;;  %v2595_v27 = vld [vmem:[#allocation3 + $0x99] sm:$0xff] }
 0x257   : > { %2455 = vst.msk [vmem:[#allocation3 + $0xd9] sm:$0xff] %vm2436_vm4, %v2273_v24  ;;  %v2233_v35 = vmax.f32 %v2197_v25, 0.0  ;;  %v2157_v39 = vmul.f32 %v6126_v51, %v2024_v3  ;;  %2670 = vrot.lane.b32.xlu0 %v2590_v33, %s5251_s29  ;;  %2561 = vst.msk [vmem:[#allocation4 + $0x78] sm:$0xff] %vm2436_vm4, %v2525_v34  ;;  %v2594_v33 = vld [vmem:[#allocation3 + $0x91] sm:$0xff] }
 0x258   : > { %v2276_v40 = vmul.f32 %v6141_v16, %v2234_v29  ;;  %v2200_v41 = vadd.f32 %v6130_v8, %v2158_v30  ;;  %2560 = vst.msk [vmem:[#allocation4 + $0x70] sm:$0xff] %vm2436_vm4, %v2524_v52 }
 0x259   : > { %v2275_v46 = vmul.f32 %v6141_v16, %v2233_v35  ;;  %v2199_v47 = vadd.f32 %v6130_v8, %v2157_v39  ;;  %v4858_v48 = vpop.f32.mrb[24].mxu0 }
 0x25a   : > { %2458 = vst.msk [vmem:[#allocation3 + $0xf9] sm:$0xff] %vm2436_vm4, %v2276_v40  ;;  %v2236_v53 = vmax.f32 %v2200_v41, 0.0  ;;  %v2160_v54 = vmul.f32 %v4858_v48, %v6126_v51  ;;  %2889 = vrot.lane.b32.xlu1 %v2808_v49, %s5248_s25  ;;  %v2034_v55 = vpop.f32.mrb[25].mxu0  ;;  %v2527_v37 = vld [vmem:[#allocation3 + $0xc8] sm:$0xff]  ;;  %v2526_v61 = vld [vmem:[#allocation3 + $0xc0] sm:$0xff] }
 0x25b   : > { %2457 = vst.msk [vmem:[#allocation3 + $0xf1] sm:$0xff] %vm2436_vm4, %v2275_v46  ;;  %v2235_v28 = vmax.f32 %v2199_v47, 0.0  ;;  %v2159_v56 = vmul.f32 %v6126_v51, %v2034_v55  ;;  %2887 = vrot.lane.b32.xlu0 %v2807_v20, %s5248_s25  ;;  %2563 = vst.msk [vmem:[#allocation4 + $0x88] sm:$0xff] %vm2436_vm4, %v2527_v37  ;;  %v2812_v48 = vld [vmem:[#allocation3 + $0x9a] sm:$0xff] }
 0x25c   : > { %v2278_v62 = vmul.f32 %v6141_v16, %v2236_v53  ;;  %v2202_v63 = vadd.f32 %v6130_v8, %v2160_v54  ;;  %2562 = vst.msk [vmem:[#allocation4 + $0x80] sm:$0xff] %vm2436_vm4, %v2526_v61  ;;  %v2811_v54 = vld [vmem:[#allocation3 + $0x92] sm:$0xff] }
 0x25d   : > { %v2277_v6 = vmul.f32 %v6141_v16, %v2235_v28  ;;  %v2201_v7 = vadd.f32 %v6130_v8, %v2159_v56  ;;  %v4861_v42 = vpop.f32.mrb[26].mxu0 }
 0x25e   : > { %2460 = vst.msk [vmem:[#allocation3 + $0x111] sm:$0xff] %vm2436_vm4, %v2278_v62  ;;  %v2238_v57 = vmax.f32 %v2202_v63, 0.0  ;;  %v2162_v58 = vmul.f32 %v4861_v42, %v6126_v51  ;;  %2676 = vrot.lane.b32.xlu1 %v2593_v43, %s5251_s29  ;;  %v2044_v2 = vpop.f32.mrb[27].mxu0  ;;  %v2529_v9 = vld [vmem:[#allocation3 + $0xe0] sm:$0xff]  ;;  %v2528_v38 = vld [vmem:[#allocation3 + $0xd8] sm:$0xff] }
 0x25f   : > { %2459 = vst.msk [vmem:[#allocation3 + $0x109] sm:$0xff] %vm2436_vm4, %v2277_v6  ;;  %v2237_v32 = vmax.f32 %v2201_v7, 0.0  ;;  %v2161_v36 = vmul.f32 %v6126_v51, %v2044_v2  ;;  %2674 = vrot.lane.b32.xlu0 %v2592_v4, %s5251_s29  ;;  %2565 = vst.msk [vmem:[#allocation4 + $0x98] sm:$0xff] %vm2436_vm4, %v2529_v9  ;;  %v2597_v63 = vld [vmem:[#allocation3 + $0xb1] sm:$0xff] }
 0x260   : > { %v2280_v44 = vmul.f32 %v6141_v16, %v2238_v57  ;;  %v2204_v45 = vadd.f32 %v6130_v8, %v2162_v58  ;;  %2564 = vst.msk [vmem:[#allocation4 + $0x90] sm:$0xff] %vm2436_vm4, %v2528_v38  ;;  %v2814_v4 = vld [vmem:[#allocation3 + $0xb2] sm:$0xff] }
 0x261   : > { %v2279_v50 = vmul.f32 %v6141_v16, %v2237_v32  ;;  %v2203_v59 = vadd.f32 %v6130_v8, %v2161_v36  ;;  %v4864_v60 = vpop.f32.mrb[28].mxu0  ;;  %v2813_v32 = vld [vmem:[#allocation3 + $0xaa] sm:$0xff] }
 0x262   : > { %2462 = vst.msk [vmem:[#allocation3 + $0x129] sm:$0xff] %vm2436_vm4, %v2280_v44  ;;  %v2240_v5 = vmax.f32 %v2204_v45, 0.0  ;;  %v2164_v11 = vmul.f32 %v4864_v60, %v6126_v51  ;;  %2893 = vrot.lane.b32.xlu1 %v2810_v1, %s5248_s25  ;;  %v2054_v12 = vpop.f32.mrb[29].mxu0  ;;  %v2531_v14 = vld [vmem:[#allocation3 + $0xf8] sm:$0xff]  ;;  %v2530_v18 = vld [vmem:[#allocation3 + $0xf0] sm:$0xff]  ;;  %v2598_v45 = vld [vmem:[#allocation3 + $0xc1] sm:$0xff] }
 0x263   : > { %2461 = vst.msk [vmem:[#allocation3 + $0x121] sm:$0xff] %vm2436_vm4, %v2279_v50  ;;  %v2239_v15 = vmax.f32 %v2203_v59, 0.0  ;;  %v2163_v17 = vmul.f32 %v6126_v51, %v2054_v12  ;;  %2891 = vrot.lane.b32.xlu0 %v2809_v13, %s5248_s25  ;;  %2567 = vst.msk [vmem:[#allocation4 + $0xa8] sm:$0xff] %vm2436_vm4, %v2531_v14  ;;  %v2599_v44 = vld [vmem:[#allocation3 + $0xc9] sm:$0xff]  ;;  %v3048_v1 = vld [vmem:[%s6924_s2] sm:$0xff] }
 0x264   : > { %v2282_v22 = vmul.f32 %v6141_v16, %v2240_v5  ;;  %v2206_v23 = vadd.f32 %v6130_v8, %v2164_v11  ;;  %2566 = vst.msk [vmem:[#allocation4 + $0xa0] sm:$0xff] %vm2436_vm4, %v2530_v18  ;;  %v2816_v59 = vld [vmem:[#allocation3 + $0xca] sm:$0xff]  ;;  %v2815_v60 = vld [vmem:[#allocation3 + $0xc2] sm:$0xff]  ;;  %v2817_v18 = vld [vmem:[#allocation3 + $0xda] sm:$0xff] }
 0x265   : > { %v2281_v24 = vmul.f32 %v6141_v16, %v2239_v15  ;;  %v2205_v25 = vadd.f32 %v6130_v8, %v2163_v17  ;;  %v4867_v26 = vpop.f32.mrb[32].mxu0  ;;  %v3049_v5 = vld [vmem:[%s6924_s2 + $0x8] sm:$0xf]  ;;  %v2600_v15 = vld [vmem:[#allocation3 + $0xd9] sm:$0xff] }
 0x266   : > { %2464 = vst.msk [vmem:[#allocation3 + $0x141] sm:$0xff] %vm2436_vm4, %v2282_v22  ;;  %v2242_v29 = vmax.f32 %v2206_v23, 0.0  ;;  %v5064_v30 = vadd.f32 %v4867_v26, %v6110_v10  ;;  %2680 = vrot.lane.b32.xlu1 %v2595_v27, %s5251_s29  ;;  %v2064_v3 = vpop.f32.mrb[33].mxu0  ;;  %v2533_v34 = vld [vmem:[#allocation3 + $0x110] sm:$0xff]  ;;  %v2532_v52 = vld [vmem:[#allocation3 + $0x108] sm:$0xff]  ;;  %v6354_v11 = vpack.c.bf16 %v3049_v5, %v3048_v1  ;;  %v2603_v22 = vld [vmem:[#allocation3 + $0xf9] sm:$0xff] }
 0x267   : > { %2463 = vst.msk [vmem:[#allocation3 + $0x139] sm:$0xff] %vm2436_vm4, %v2281_v24  ;;  %v2241_v35 = vmax.f32 %v2205_v25, 0.0  ;;  %v5065_v39 = vadd.f32 %v2064_v3, %v6112_v19  ;;  %2678 = vrot.lane.b32.xlu0 %v2594_v33, %s5251_s29  ;;  %2569 = vst.msk [vmem:[#allocation4 + $0xb8] sm:$0xff] %vm2436_vm4, %v2533_v34  ;;  %v2601_v13 = vld [vmem:[#allocation3 + $0xe1] sm:$0xff]  ;;  %v2602_v23 = vld [vmem:[#allocation3 + $0xf1] sm:$0xff] }
 0x268   : > { %v2284_v40 = vmul.f32 %v6141_v16, %v2242_v29  ;;  %v2166_v41 = vmul.f32 %v5064_v30, %v6126_v51  ;;  %2568 = vst.msk [vmem:[#allocation4 + $0xb0] sm:$0xff] %vm2436_vm4, %v2532_v52  ;;  %5050 = vmatprep.subr.msk.bf16.mxu1 %vm6170_vm9, %v6354_v11  ;;  %v2818_v17 = vld [vmem:[#allocation3 + $0xe2] sm:$0xff]  ;;  %v2820_v24 = vld [vmem:[#allocation3 + $0xfa] sm:$0xff]  ;;  %v2819_v25 = vld [vmem:[#allocation3 + $0xf2] sm:$0xff] }
 0x269   : > { %v2283_v10 = vmul.f32 %v6141_v16, %v2241_v35  ;;  %v2165_v46 = vmul.f32 %v5065_v39, %v6126_v51  ;;  %v4870_v47 = vpop.f32.mrb[34].mxu0  ;;  %v2605_v26 = vld [vmem:[#allocation3 + $0x111] sm:$0xff]  ;;  %v2604_v27 = vld [vmem:[#allocation3 + $0x109] sm:$0xff]  ;;  %v6441_v5 = vld [vmem:[%s5328_s15] ss:$0 sm:$0xff] }
 0x26a   : > { %2466 = vst.msk [vmem:[#allocation3 + $0x159] sm:$0xff] %vm2436_vm4, %v2284_v40  ;;  %v2208_v19 = vadd.f32 %v6130_v8, %v2166_v41  ;;  %v5066_v49 = vadd.f32 %v4870_v47, %v6114_v21  ;;  %2897 = vrot.lane.b32.xlu1 %v2812_v48, %s5248_s25  ;;  %v2074_v53 = vpop.f32.mrb[35].mxu0  ;;  %v2535_v55 = vld [vmem:[#allocation3 + $0x128] sm:$0xff]  ;;  %v2534_v28 = vld [vmem:[#allocation3 + $0x120] sm:$0xff]  ;;  %v2822_v29 = vld [vmem:[#allocation3 + $0x112] sm:$0xff] }
 0x26b   : > { %2465 = vst.msk [vmem:[#allocation3 + $0x151] sm:$0xff] %vm2436_vm4, %v2283_v10  ;;  %v2207_v20 = vadd.f32 %v6130_v8, %v2165_v46  ;;  %v5067_v37 = vadd.f32 %v2074_v53, %v6116_v31  ;;  %2895 = vrot.lane.b32.xlu0 %v2811_v54, %s5248_s25  ;;  %2571 = vst.msk [vmem:[#allocation4 + $0xc8] sm:$0xff] %vm2436_vm4, %v2535_v55  ;;  %v2596_v31 = vld [vmem:[#allocation3 + $0xa9] sm:$0xff]  ;;  %v2606_v33 = vld [vmem:[#allocation3 + $0x121] sm:$0xff] }
 0x26c   : > { %v2244_v56 = vmax.f32 %v2208_v19, 0.0  ;;  %v2168_v61 = vmul.f32 %v5066_v49, %v6126_v51  ;;  %2570 = vst.msk [vmem:[#allocation4 + $0xc0] sm:$0xff] %vm2436_vm4, %v2534_v28  ;;  %v2821_v30 = vld [vmem:[#allocation3 + $0x10a] sm:$0xff]  ;;  %v2823_v35 = vld [vmem:[#allocation3 + $0x122] sm:$0xff] }
 0x26d   : > { %v2243_v21 = vmax.f32 %v2207_v20, 0.0  ;;  %v2167_v62 = vmul.f32 %v5067_v37, %v6126_v51  ;;  %v2607_v3 = vld [vmem:[#allocation3 + $0x129] sm:$0xff]  ;;  %v2609_v39 = vld [vmem:[#allocation3 + $0x141] sm:$0xff] }
 0x26e   : > { %v2286_v6 = vmul.f32 %v6141_v16, %v2244_v56  ;;  %v2210_v7 = vadd.f32 %v6130_v8, %v2168_v61  ;;  %2684 = vrot.lane.b32.xlu1 %v2597_v63, %s5251_s29  ;;  %v2537_v42 = vld [vmem:[#allocation3 + $0x140] sm:$0xff]  ;;  %v2536_v58 = vld [vmem:[#allocation3 + $0x138] sm:$0xff]  ;;  %v2824_v34 = vld [vmem:[#allocation3 + $0x12a] sm:$0xff] }
 0x26f   : > { %v2285_v43 = vmul.f32 %v6141_v16, %v2243_v21  ;;  %v2209_v57 = vadd.f32 %v6130_v8, %v2167_v62  ;;  %2682 = vrot.lane.b32.xlu0 %v2596_v31, %s5251_s29  ;;  %2573 = vst.msk [vmem:[#allocation4 + $0xd8] sm:$0xff] %vm2436_vm4, %v2537_v42  ;;  %2572 = vst.msk [vmem:[#allocation4 + $0xd0] sm:$0xff] %vm2436_vm4, %v2536_v58  ;;  %v2608_v52 = vld [vmem:[#allocation3 + $0x139] sm:$0xff]  ;;  %v2826_v40 = vld [vmem:[#allocation3 + $0x142] sm:$0xff] }
 0x270   : > { %2468 = vst.msk [vmem:[#allocation3 + $0x171] sm:$0xff] %vm2436_vm4, %v2286_v6  ;;  %v2246_v51 = vmax.f32 %v2210_v7, 0.0  ;;  %v2825_v41 = vld [vmem:[#allocation3 + $0x13a] sm:$0xff]  ;;  %v4436_v31 = vld [vmem:[%s6924_s2 + $0x28] sm:$0xf] }
 0x271   : > { %2467 = vst.msk [vmem:[#allocation3 + $0x169] sm:$0xff] %vm2436_vm4, %v2285_v43  ;;  %v2245_v2 = vmax.f32 %v2209_v57, 0.0  ;;  %v2611_v10 = vld [vmem:[#allocation3 + $0x159] sm:$0xff]  ;;  %v2800_v42 = vld [vmem:[#allocation3 + $0xa] sm:$0xff]  ;;  %v2799_v57 = vld [vmem:[#allocation3 + $0x2] sm:$0xff] }
 0x272   : > { %v2288_v9 = vmul.f32 %v6141_v16, %v2246_v51  ;;  %2901 = vrot.lane.b32.xlu1 %v2814_v4, %s5248_s25  ;;  %v2539_v8 = vld [vmem:[#allocation3 + $0x158] sm:$0xff]  ;;  %v2538_v38 = vld [vmem:[#allocation3 + $0x150] sm:$0xff]  ;;  %v4435_v7 = vld [vmem:[%s6924_s2 + $0x20] sm:$0xff] }
 0x273   : > { %v2287_v36 = vmul.f32 %v6141_v16, %v2245_v2  ;;  %2899 = vrot.lane.b32.xlu0 %v2813_v32, %s5248_s25  ;;  %2575 = vst.msk [vmem:[#allocation4 + $0xe8] sm:$0xff] %vm2436_vm4, %v2539_v8  ;;  %2574 = vst.msk [vmem:[#allocation4 + $0xe0] sm:$0xff] %vm2436_vm4, %v2538_v38  ;;  %v2610_v46 = vld [vmem:[#allocation3 + $0x151] sm:$0xff]  ;;  %v2828_v47 = vld [vmem:[#allocation3 + $0x15a] sm:$0xff]  ;;  %v6408_v2 = vpack.c.bf16 %v4436_v31, %v4435_v7 }
 0x274   : > { %2470 = vst.msk [vmem:[#allocation3 + $0x189] sm:$0xff] %vm2436_vm4, %v2288_v9  ;;  %v2827_v48 = vld [vmem:[#allocation3 + $0x152] sm:$0xff]  ;;  %v2617_v9 = vld [vmem:[#allocation3 + $0x1a1] sm:$0xff] }
 0x275   : > { %2469 = vst.msk [vmem:[#allocation3 + $0x181] sm:$0xff] %vm2436_vm4, %v2287_v36  ;;  %v2616_v8 = vld [vmem:[#allocation3 + $0x199] sm:$0xff]  ;;  %v2834_v38 = vld [vmem:[#allocation3 + $0x1a2] sm:$0xff] }
 0x276   : > { %2688 = vrot.lane.b32.xlu1 %v2599_v44, %s5251_s29  ;;  %v527_v44 = vld [vmem:[%s5346_s24 + $0x1d1] sm:$0xff] }
 0x277   : > { %2686 = vrot.lane.b32.xlu0 %v2598_v45, %s5251_s29  ;;  %v2613_v19 = vld [vmem:[#allocation3 + $0x171] sm:$0xff] }
 0x278   : > { %v2541_v50 = vld [vmem:[#allocation3 + $0x170] sm:$0xff]  ;;  %v2540_v16 = vld [vmem:[#allocation3 + $0x168] sm:$0xff] }
 0x279   : > { %2577 = vst.msk [vmem:[#allocation4 + $0xf8] sm:$0xff] %vm2436_vm4, %v2541_v50  ;;  %2576 = vst.msk [vmem:[#allocation4 + $0xf0] sm:$0xff] %vm2436_vm4, %v2540_v16  ;;  %v2612_v49 = vld [vmem:[#allocation3 + $0x169] sm:$0xff]  ;;  %v2830_v55 = vld [vmem:[#allocation3 + $0x172] sm:$0xff] }
 0x27a   : > { %2905 = vrot.lane.b32.xlu1 %v2816_v59, %s5248_s25  ;;  %v2829_v20 = vld [vmem:[#allocation3 + $0x16a] sm:$0xff]  ;;  %v2833_v50 = vld [vmem:[#allocation3 + $0x19a] sm:$0xff] }
 0x27b   : > { %2903 = vrot.lane.b32.xlu0 %v2815_v60, %s5248_s25  ;;  %v2615_v56 = vld [vmem:[#allocation3 + $0x189] sm:$0xff] }
 0x27c   : > { %v2543_v12 = vld [vmem:[#allocation3 + $0x188] sm:$0xff]  ;;  %v2542_v14 = vld [vmem:[#allocation3 + $0x180] sm:$0xff] }
 0x27d   : > { %2579 = vst.msk [vmem:[#allocation4 + $0x108] sm:$0xff] %vm2436_vm4, %v2543_v12  ;;  %2578 = vst.msk [vmem:[#allocation4 + $0x100] sm:$0xff] %vm2436_vm4, %v2542_v14  ;;  %v2614_v61 = vld [vmem:[#allocation3 + $0x181] sm:$0xff]  ;;  %v2832_v63 = vld [vmem:[#allocation3 + $0x18a] sm:$0xff] }
 0x27e   : > { %2692 = vrot.lane.b32.xlu1 %v2601_v13, %s5251_s29  ;;  %v2831_v6 = vld [vmem:[#allocation3 + $0x182] sm:$0xff]  ;;  %v808_v13 = vld [vmem:[%s5346_s24 + $0x1d2] sm:$0xff] }
 0x27f   : > { %2690 = vrot.lane.b32.xlu0 %v2600_v15, %s5251_s29  ;;  %v526_v59 = vld [vmem:[%s5346_s24 + $0x1c9] sm:$0xff] }
 0x280   : > { %v566_v12 = vmul.f32 %v6441_v5, %v526_v59  ;;  %v807_v15 = vld [vmem:[%s5346_s24 + $0x1ca] sm:$0xff] }
 0x282   : > { %2909 = vrot.lane.b32.xlu1 %v2818_v17, %s5248_s25 }
 0x283   : > { %2907 = vrot.lane.b32.xlu0 %v2817_v18, %s5248_s25  ;;  %v848_v18 = vmul.f32 %v6441_v5, %v808_v13 }
 0x286   : > { %2696 = vrot.lane.b32.xlu1 %v2603_v22, %s5251_s29  ;;  %v847_v22 = vmul.f32 %v6441_v5, %v807_v15 }
 0x287   : > { %2694 = vrot.lane.b32.xlu0 %v2602_v23, %s5251_s29 }
 0x28a   : > { %2913 = vrot.lane.b32.xlu1 %v2820_v24, %s5248_s25 }
 0x28b   : > { %2911 = vrot.lane.b32.xlu0 %v2819_v25, %s5248_s25 }
 0x28e   : > { %2700 = vrot.lane.b32.xlu1 %v2605_v26, %s5251_s29 }
 0x28f   : > { %2698 = vrot.lane.b32.xlu0 %v2604_v27, %s5251_s29 }
 0x292   : > { %2917 = vrot.lane.b32.xlu1 %v2822_v29, %s5248_s25 }
 0x293   : > { %2915 = vrot.lane.b32.xlu0 %v2821_v30, %s5248_s25 }
 0x296   : > { %2704 = vrot.lane.b32.xlu1 %v2607_v3, %s5251_s29 }
 0x297   : > { %2702 = vrot.lane.b32.xlu0 %v2606_v33, %s5251_s29 }
 0x29a   : > { %2921 = vrot.lane.b32.xlu1 %v2824_v34, %s5248_s25 }
 0x29b   : > { %2919 = vrot.lane.b32.xlu0 %v2823_v35, %s5248_s25 }
 0x29e   : > { %2708 = vrot.lane.b32.xlu1 %v2609_v39, %s5251_s29 }
 0x29f   : > { %2706 = vrot.lane.b32.xlu0 %v2608_v52, %s5251_s29 }
 0x2a2   : > { %2925 = vrot.lane.b32.xlu1 %v2826_v40, %s5248_s25 }
 0x2a3   : > { %2923 = vrot.lane.b32.xlu0 %v2825_v41, %s5248_s25 }
 0x2a6   : > { %2712 = vrot.lane.b32.xlu1 %v2611_v10, %s5251_s29 }
 0x2a7   : > { %2710 = vrot.lane.b32.xlu0 %v2610_v46, %s5251_s29 }
 0x2aa   : > { %2929 = vrot.lane.b32.xlu1 %v2828_v47, %s5248_s25 }
 0x2ab   : > { %2927 = vrot.lane.b32.xlu0 %v2827_v48, %s5248_s25 }
 0x2ae   : > { %2716 = vrot.lane.b32.xlu1 %v2613_v19, %s5251_s29 }
 0x2af   : > { %2714 = vrot.lane.b32.xlu0 %v2612_v49, %s5251_s29 }
 0x2b0   : > { %v2661_v53 = vpop.permute.xlu1 %2660 }
 0x2b1   : > { %2766 = vst.msk [vmem:[#allocation4 + $0x18] sm:$0xff] %vm2762_vm6, %v2661_v53  ;;  %v2659_v54 = vpop.permute.xlu0 %2658 }
 0x2b2   : > { %2765 = vst.msk [vmem:[#allocation4 + $0x10] sm:$0xff] %vm2762_vm6, %v2659_v54  ;;  %2933 = vrot.lane.b32.xlu1 %v2830_v55, %s5248_s25 }
 0x2b3   : > { %2931 = vrot.lane.b32.xlu0 %v2829_v20, %s5248_s25 }
 0x2b4   : > { %v2878_v37 = vpop.permute.xlu1 %2877 }
 0x2b5   : > { %2983 = vst.msk [vmem:[#allocation4 + $0x18] sm:$0xff] %vm2979_vm10, %v2878_v37  ;;  %v2876_v28 = vpop.permute.xlu0 %2875 }
 0x2b6   : > { %2982 = vst.msk [vmem:[#allocation4 + $0x10] sm:$0xff] %vm2979_vm10, %v2876_v28  ;;  %2720 = vrot.lane.b32.xlu1 %v2615_v56, %s5251_s29 }
 0x2b7   : > { %2718 = vrot.lane.b32.xlu0 %v2614_v61, %s5251_s29 }
 0x2b8   : > { %v2665_v21 = vpop.permute.xlu1 %2664 }
 0x2b9   : > { %2768 = vst.msk [vmem:[#allocation4 + $0x28] sm:$0xff] %vm2762_vm6, %v2665_v21  ;;  %v2663_v62 = vpop.permute.xlu0 %2662 }
 0x2ba   : > { %2767 = vst.msk [vmem:[#allocation4 + $0x20] sm:$0xff] %vm2762_vm6, %v2663_v62  ;;  %2937 = vrot.lane.b32.xlu1 %v2832_v63, %s5248_s25 }
 0x2bb   : > { %2935 = vrot.lane.b32.xlu0 %v2831_v6, %s5248_s25 }
 0x2bc   : > { %v2882_v43 = vpop.permute.xlu1 %2881  ;;  %v6413_v4 = vld [vmem:[#allocation4 + $0x18] sm:$0xff] }
 0x2bd   : > { %2985 = vst.msk [vmem:[#allocation4 + $0x28] sm:$0xff] %vm2979_vm10, %v2882_v43  ;;  %v2880_v58 = vpop.permute.xlu0 %2879  ;;  %v6406_v51 = vld [vmem:[#allocation4 + $0x10] sm:$0xff] }
 0x2be   : > { %2984 = vst.msk [vmem:[#allocation4 + $0x20] sm:$0xff] %vm2979_vm10, %v2880_v58  ;;  %4878 = vmatprep.mubr.msk.f32.mxu1 %vm3055_vm11, %v6406_v51  ;;  %2873 = vrot.lane.b32.xlu1 %v2800_v42, %s5248_s25 }
 0x2bf   : > { %4879 = vmatmul.mubr.msk.f32.vlgmr.msra.gmra.mrb[6].mxu1 %vm3055_vm11, %v6413_v4  ;;  %2871 = vrot.lane.b32.xlu0 %v2799_v57, %s5248_s25 }
 0x2c0   : > { %v2669_v32 = vpop.permute.xlu1 %2668  ;;  %5053 = vmatpush3.bf16.msk.msra.mxu1 %vm6170_vm9, %v6354_v11  ;;  %v567_v11 = vmul.f32 %v6441_v5, %v527_v44 }
 0x2c1   : > { %2770 = vst.msk [vmem:[#allocation4 + $0x38] sm:$0xff] %vm2762_vm6, %v2669_v32  ;;  %v2667_v36 = vpop.permute.xlu0 %2666  ;;  %5056 = vmatprep.subr.msk.bf16.mxu1 %vm6170_vm9, %v6408_v2 }
 0x2c2   : > { %2769 = vst.msk [vmem:[#allocation4 + $0x30] sm:$0xff] %vm2762_vm6, %v2667_v36  ;;  %2724 = vrot.lane.b32.xlu1 %v2617_v9, %s5251_s29 }
 0x2c3   : > { %2722 = vrot.lane.b32.xlu0 %v2616_v8, %s5251_s29 }
 0x2c4   : > { %v2886_v45 = vpop.permute.xlu1 %2885  ;;  %v6437_v1 = vld [vmem:[#allocation4 + $0x28] sm:$0xff] }
 0x2c5   : > { %2987 = vst.msk [vmem:[#allocation4 + $0x38] sm:$0xff] %vm2979_vm10, %v2886_v45  ;;  %v2884_v16 = vpop.permute.xlu0 %2883  ;;  %v6432_v60 = vld [vmem:[#allocation4 + $0x20] sm:$0xff] }
 0x2c6   : > { %2986 = vst.msk [vmem:[#allocation4 + $0x30] sm:$0xff] %vm2979_vm10, %v2884_v16  ;;  %4881 = vmatprep.mubr.msk.f32.mxu1 %vm3055_vm11, %v6432_v60  ;;  %2941 = vrot.lane.b32.xlu1 %v2834_v38, %s5248_s25 }
 0x2c7   : > { %4882 = vmatmul.mubr.msk.f32.gmra.mrb[8].mxu1 %vm3055_vm11, %v6437_v1  ;;  %2939 = vrot.lane.b32.xlu0 %v2833_v50, %s5248_s25 }
 0x2c8   : > { %v2673_v14 = vpop.permute.xlu1 %2672 }
 0x2c9   : > { %2772 = vst.msk [vmem:[#allocation4 + $0x48] sm:$0xff] %vm2762_vm6, %v2673_v14  ;;  %v2671_v17 = vpop.permute.xlu0 %2670 }
 0x2ca   : > { %2771 = vst.msk [vmem:[#allocation4 + $0x40] sm:$0xff] %vm2762_vm6, %v2671_v17  ;;  %686 = vrot.lane.b32.xlu1 %v567_v11, %s5248_s25 }
 0x2cb   : > { %684 = vrot.lane.b32.xlu0 %v566_v12, %s5248_s25  ;;  %s4006_s25 = scalar_lea.vmem %s6929_s7, %s5238_s30 }
 0x2cc   : > { %v2890_v23 = vpop.permute.xlu1 %2889  ;;  %v6462_v26 = vld [vmem:[#allocation4 + $0x38] sm:$0xff] }
 0x2cd   : > { %2989 = vst.msk [vmem:[#allocation4 + $0x48] sm:$0xff] %vm2979_vm10, %v2890_v23  ;;  %v2888_v24 = vpop.permute.xlu0 %2887  ;;  %v6457_v25 = vld [vmem:[#allocation4 + $0x30] sm:$0xff] }
 0x2ce   : > { %2988 = vst.msk [vmem:[#allocation4 + $0x40] sm:$0xff] %vm2979_vm10, %v2888_v24  ;;  %4884 = vmatprep.mubr.msk.f32.mxu1 %vm3055_vm11, %v6457_v25  ;;  %967 = vrot.lane.b32.xlu1 %v848_v18, %s5249_s26 }
 0x2cf   : > { %4885 = vmatmul.mubr.msk.f32.gmra.mrb[10].mxu1 %vm3055_vm11, %v6462_v26  ;;  %965 = vrot.lane.b32.xlu0 %v847_v22, %s5249_s26 }
 0x2d0   : > { %v2677_v27 = vpop.permute.xlu1 %2676 }
 0x2d1   : > { %2774 = vst.msk [vmem:[#allocation4 + $0x58] sm:$0xff] %vm2762_vm6, %v2677_v27  ;;  %v2675_v29 = vpop.permute.xlu0 %2674 }
 0x2d2   : > { %2773 = vst.msk [vmem:[#allocation4 + $0x50] sm:$0xff] %vm2762_vm6, %v2675_v29 }
 0x2d4   : > { %v2894_v30 = vpop.permute.xlu1 %2893  ;;  %v6476_v34 = vld [vmem:[#allocation4 + $0x48] sm:$0xff] }
 0x2d5   : > { %2991 = vst.msk [vmem:[#allocation4 + $0x58] sm:$0xff] %vm2979_vm10, %v2894_v30  ;;  %v2892_v3 = vpop.permute.xlu0 %2891  ;;  %v6471_v33 = vld [vmem:[#allocation4 + $0x40] sm:$0xff] }
 0x2d6   : > { %2990 = vst.msk [vmem:[#allocation4 + $0x50] sm:$0xff] %vm2979_vm10, %v2892_v3  ;;  %4887 = vmatprep.mubr.msk.f32.mxu1 %vm3055_vm11, %v6471_v33 }
 0x2d7   : > { %4888 = vmatmul.mubr.msk.f32.gmra.mrb[12].mxu1 %vm3055_vm11, %v6476_v34 }
 0x2d8   : > { %v2681_v35 = vpop.permute.xlu1 %2680 }
 0x2d9   : > { %2776 = vst.msk [vmem:[#allocation4 + $0x68] sm:$0xff] %vm2762_vm6, %v2681_v35  ;;  %v2679_v39 = vpop.permute.xlu0 %2678 }
 0x2da   : > { %2775 = vst.msk [vmem:[#allocation4 + $0x60] sm:$0xff] %vm2762_vm6, %v2679_v39 }
 0x2dc   : > { %v2898_v52 = vpop.permute.xlu1 %2897  ;;  %v6488_v10 = vld [vmem:[#allocation4 + $0x58] sm:$0xff] }
 0x2dd   : > { %2993 = vst.msk [vmem:[#allocation4 + $0x68] sm:$0xff] %vm2979_vm10, %v2898_v52  ;;  %v2896_v40 = vpop.permute.xlu0 %2895  ;;  %v6483_v41 = vld [vmem:[#allocation4 + $0x50] sm:$0xff] }
 0x2de   : > { %2992 = vst.msk [vmem:[#allocation4 + $0x60] sm:$0xff] %vm2979_vm10, %v2896_v40  ;;  %4890 = vmatprep.mubr.msk.f32.mxu1 %vm3055_vm11, %v6483_v41 }
 0x2df   : > { %4891 = vmatmul.mubr.msk.f32.gmra.mrb[14].mxu1 %vm3055_vm11, %v6488_v10 }
 0x2e0   : > { %v2685_v46 = vpop.permute.xlu1 %2684 }
 0x2e1   : > { %2778 = vst.msk [vmem:[#allocation4 + $0x78] sm:$0xff] %vm2762_vm6, %v2685_v46  ;;  %v2683_v47 = vpop.permute.xlu0 %2682  ;;  %v2544_v46 = vld [vmem:[#allocation3 + $0x198] sm:$0xff] }
 0x2e2   : > { %2777 = vst.msk [vmem:[#allocation4 + $0x70] sm:$0xff] %vm2762_vm6, %v2683_v47 }
 0x2e3   : > { %2580 = vst.msk [vmem:[#allocation4 + $0x110] sm:$0xff] %vm2436_vm4, %v2544_v46 }
 0x2e4   : > { %v2902_v48 = vpop.permute.xlu1 %2901  ;;  %v6500_v53 = vld [vmem:[#allocation4 + $0x68] sm:$0xff] }
 0x2e5   : > { %2995 = vst.msk [vmem:[#allocation4 + $0x78] sm:$0xff] %vm2979_vm10, %v2902_v48  ;;  %v2900_v19 = vpop.permute.xlu0 %2899  ;;  %v6495_v49 = vld [vmem:[#allocation4 + $0x60] sm:$0xff] }
 0x2e6   : > { %2994 = vst.msk [vmem:[#allocation4 + $0x70] sm:$0xff] %vm2979_vm10, %v2900_v19  ;;  %4893 = vmatprep.mubr.msk.f32.mxu1 %vm3055_vm11, %v6495_v49 }
 0x2e7   : > { %4894 = vmatmul.mubr.msk.f32.gmra.mrb[16].mxu1 %vm3055_vm11, %v6500_v53 }
 0x2e8   : > { %v2689_v54 = vpop.permute.xlu1 %2688 }
 0x2e9   : > { %2780 = vst.msk [vmem:[#allocation4 + $0x88] sm:$0xff] %vm2762_vm6, %v2689_v54  ;;  %v2687_v55 = vpop.permute.xlu0 %2686  ;;  %v2545_v54 = vld [vmem:[#allocation3 + $0x1a0] sm:$0xff] }
 0x2ea   : > { %2779 = vst.msk [vmem:[#allocation4 + $0x80] sm:$0xff] %vm2762_vm6, %v2687_v55 }
 0x2eb   : > { %2581 = vst.msk [vmem:[#allocation4 + $0x118] sm:$0xff] %vm2436_vm4, %v2545_v54 }
 0x2ec   : > { %v2906_v20 = vpop.permute.xlu1 %2905  ;;  %v6512_v56 = vld [vmem:[#allocation4 + $0x78] sm:$0xff] }
 0x2ed   : > { %2997 = vst.msk [vmem:[#allocation4 + $0x88] sm:$0xff] %vm2979_vm10, %v2906_v20  ;;  %v2904_v37 = vpop.permute.xlu0 %2903  ;;  %v6507_v28 = vld [vmem:[#allocation4 + $0x70] sm:$0xff] }
 0x2ee   : > { %2996 = vst.msk [vmem:[#allocation4 + $0x80] sm:$0xff] %vm2979_vm10, %v2904_v37  ;;  %4896 = vmatprep.mubr.msk.f32.mxu1 %vm3055_vm11, %v6507_v28 }
 0x2ef   : > { %4897 = vmatmul.mubr.msk.f32.gmra.mrb[18].mxu1 %vm3055_vm11, %v6512_v56 }
 0x2f0   : > { %v2693_v61 = vpop.permute.xlu1 %2692 }
 0x2f1   : > { %2782 = vst.msk [vmem:[#allocation4 + $0x98] sm:$0xff] %vm2762_vm6, %v2693_v61  ;;  %v2691_v21 = vpop.permute.xlu0 %2690  ;;  %v401_v61 = vld [vmem:[%s5346_s24 + $0x1c8] sm:$0xff] }
 0x2f2   : > { %2781 = vst.msk [vmem:[#allocation4 + $0x90] sm:$0xff] %vm2762_vm6, %v2691_v21 }
 0x2f4   : > { %v2910_v62 = vpop.permute.xlu1 %2909  ;;  %v6524_v7 = vld [vmem:[#allocation4 + $0x88] sm:$0xff] }
 0x2f5   : > { %2999 = vst.msk [vmem:[#allocation4 + $0x98] sm:$0xff] %vm2979_vm10, %v2910_v62  ;;  %v2908_v63 = vpop.permute.xlu0 %2907  ;;  %v6519_v6 = vld [vmem:[#allocation4 + $0x80] sm:$0xff] }
 0x2f6   : > { %2998 = vst.msk [vmem:[#allocation4 + $0x90] sm:$0xff] %vm2979_vm10, %v2908_v63  ;;  %4899 = vmatprep.mubr.msk.f32.mxu1 %vm3055_vm11, %v6519_v6  ;;  %v445_v63 = vmul.f32 %v6441_v5, %v401_v61 }
 0x2f7   : > { %4900 = vmatmul.mubr.msk.f32.gmra.mrb[20].mxu1 %vm3055_vm11, %v6524_v7 }
 0x2f8   : > { %v2697_v31 = vpop.permute.xlu1 %2696  ;;  %486 = vst.msk [vmem:[#allocation2 + $0x130] sm:$0xff] %vm447_vm0, %v445_v63 }
 0x2f9   : > { %2784 = vst.msk [vmem:[#allocation4 + $0xa8] sm:$0xff] %vm2762_vm6, %v2697_v31  ;;  %v2695_v42 = vpop.permute.xlu0 %2694 }
 0x2fa   : > { %2783 = vst.msk [vmem:[#allocation4 + $0xa0] sm:$0xff] %vm2762_vm6, %v2695_v42  ;;  %v402_v42 = vld [vmem:[%s5346_s24 + $0x1d0] sm:$0xff] }
 0x2fc   : > { %v2914_v43 = vpop.permute.xlu1 %2913  ;;  %v6536_v9 = vld [vmem:[#allocation4 + $0x98] sm:$0xff] }
 0x2fd   : > { %3001 = vst.msk [vmem:[#allocation4 + $0xa8] sm:$0xff] %vm2979_vm10, %v2914_v43  ;;  %v2912_v57 = vpop.permute.xlu0 %2911  ;;  %v6531_v58 = vld [vmem:[#allocation4 + $0x90] sm:$0xff] }
 0x2fe   : > { %3000 = vst.msk [vmem:[#allocation4 + $0xa0] sm:$0xff] %vm2979_vm10, %v2912_v57  ;;  %4902 = vmatprep.mubr.msk.f32.mxu1 %vm3055_vm11, %v6531_v58  ;;  %v446_v57 = vmul.f32 %v6441_v5, %v402_v42 }
 0x2ff   : > { %4903 = vmatmul.mubr.msk.f32.gmra.mrb[22].mxu1 %vm3055_vm11, %v6536_v9 }
 0x300   : > { %v2701_v32 = vpop.permute.xlu1 %2700  ;;  %487 = vst.msk [vmem:[#allocation2 + $0x138] sm:$0xff] %vm447_vm0, %v446_v57 }
 0x301   : > { %2786 = vst.msk [vmem:[#allocation4 + $0xb8] sm:$0xff] %vm2762_vm6, %v2701_v32  ;;  %v2699_v8 = vpop.permute.xlu0 %2698 }
 0x302   : > { %2785 = vst.msk [vmem:[#allocation4 + $0xb0] sm:$0xff] %vm2762_vm6, %v2699_v8 }
 0x304   : > { %v2918_v36 = vpop.permute.xlu1 %2917  ;;  %v6548_v45 = vld [vmem:[#allocation4 + $0xa8] sm:$0xff] }
 0x305   : > { %3003 = vst.msk [vmem:[#allocation4 + $0xb8] sm:$0xff] %vm2979_vm10, %v2918_v36  ;;  %v2916_v38 = vpop.permute.xlu0 %2915  ;;  %v6543_v44 = vld [vmem:[#allocation4 + $0xa0] sm:$0xff] }
 0x306   : > { %3002 = vst.msk [vmem:[#allocation4 + $0xb0] sm:$0xff] %vm2979_vm10, %v2916_v38  ;;  %4905 = vmatprep.mubr.msk.f32.mxu1 %vm3055_vm11, %v6543_v44 }
 0x307   : > { %4906 = vmatmul.mubr.msk.f32.gmra.mrb[24].mxu1 %vm3055_vm11, %v6548_v45 }
 0x308   : > { %v2705_v50 = vpop.permute.xlu1 %2704 }
 0x309   : > { %2788 = vst.msk [vmem:[#allocation4 + $0xc8] sm:$0xff] %vm2762_vm6, %v2705_v50  ;;  %v2703_v59 = vpop.permute.xlu0 %2702 }
 0x30a   : > { %2787 = vst.msk [vmem:[#allocation4 + $0xc0] sm:$0xff] %vm2762_vm6, %v2703_v59 }
 0x30c   : > { %v2922_v16 = vpop.permute.xlu1 %2921  ;;  %v6560_v13 = vld [vmem:[#allocation4 + $0xb8] sm:$0xff] }
 0x30d   : > { %3005 = vst.msk [vmem:[#allocation4 + $0xc8] sm:$0xff] %vm2979_vm10, %v2922_v16  ;;  %v2920_v11 = vpop.permute.xlu0 %2919  ;;  %v6555_v12 = vld [vmem:[#allocation4 + $0xb0] sm:$0xff] }
 0x30e   : > { %3004 = vst.msk [vmem:[#allocation4 + $0xc0] sm:$0xff] %vm2979_vm10, %v2920_v11  ;;  %4908 = vmatprep.mubr.msk.f32.mxu1 %vm3055_vm11, %v6555_v12 }
 0x30f   : > { %4909 = vmatmul.mubr.msk.f32.gmra.mrb[26].mxu1 %vm3055_vm11, %v6560_v13 }
 0x310   : > { %v2709_v14 = vpop.permute.xlu1 %2708 }
 0x311   : > { %2790 = vst.msk [vmem:[#allocation4 + $0xd8] sm:$0xff] %vm2762_vm6, %v2709_v14  ;;  %v2707_v15 = vpop.permute.xlu0 %2706 }
 0x312   : > { %2789 = vst.msk [vmem:[#allocation4 + $0xd0] sm:$0xff] %vm2762_vm6, %v2707_v15 }
 0x314   : > { %v2926_v17 = vpop.permute.xlu1 %2925  ;;  %v6572_v23 = vld [vmem:[#allocation4 + $0xc8] sm:$0xff] }
 0x315   : > { %3007 = vst.msk [vmem:[#allocation4 + $0xd8] sm:$0xff] %vm2979_vm10, %v2926_v17  ;;  %v2924_v18 = vpop.permute.xlu0 %2923  ;;  %v6567_v22 = vld [vmem:[#allocation4 + $0xc0] sm:$0xff] }
 0x316   : > { %3006 = vst.msk [vmem:[#allocation4 + $0xd0] sm:$0xff] %vm2979_vm10, %v2924_v18  ;;  %4911 = vmatprep.mubr.msk.f32.mxu1 %vm3055_vm11, %v6567_v22 }
 0x317   : > { %4912 = vmatmul.mubr.msk.f32.gmra.mrb[28].mxu1 %vm3055_vm11, %v6572_v23 }
 0x318   : > { %v2713_v24 = vpop.permute.xlu1 %2712 }
 0x319   : > { %2792 = vst.msk [vmem:[#allocation4 + $0xe8] sm:$0xff] %vm2762_vm6, %v2713_v24  ;;  %v2711_v27 = vpop.permute.xlu0 %2710 }
 0x31a   : > { %2791 = vst.msk [vmem:[#allocation4 + $0xe0] sm:$0xff] %vm2762_vm6, %v2711_v27 }
 0x31c   : > { %v2930_v29 = vpop.permute.xlu1 %2929  ;;  %v6584_v35 = vld [vmem:[#allocation4 + $0xd8] sm:$0xff] }
 0x31d   : > { %3009 = vst.msk [vmem:[#allocation4 + $0xe8] sm:$0xff] %vm2979_vm10, %v2930_v29  ;;  %v2928_v30 = vpop.permute.xlu0 %2927  ;;  %v6579_v3 = vld [vmem:[#allocation4 + $0xd0] sm:$0xff] }
 0x31e   : > { %3008 = vst.msk [vmem:[#allocation4 + $0xe0] sm:$0xff] %vm2979_vm10, %v2928_v30  ;;  %4914 = vmatprep.mubr.msk.f32.mxu1 %vm3055_vm11, %v6579_v3 }
 0x31f   : > { %4915 = vmatmul.mubr.msk.f32.gmra.mrb[30].mxu1 %vm3055_vm11, %v6584_v35 }
 0x320   : > { %v2717_v39 = vpop.permute.xlu1 %2716 }
 0x321   : > { %2794 = vst.msk [vmem:[#allocation4 + $0xf8] sm:$0xff] %vm2762_vm6, %v2717_v39  ;;  %v2715_v52 = vpop.permute.xlu0 %2714 }
 0x322   : > { %2793 = vst.msk [vmem:[#allocation4 + $0xf0] sm:$0xff] %vm2762_vm6, %v2715_v52 }
 0x324   : > { %v2934_v40 = vpop.permute.xlu1 %2933  ;;  %v6597_v19 = vld [vmem:[#allocation4 + $0xe8] sm:$0xff] }
 0x325   : > { %3011 = vst.msk [vmem:[#allocation4 + $0xf8] sm:$0xff] %vm2979_vm10, %v2934_v40  ;;  %v2932_v47 = vpop.permute.xlu0 %2931  ;;  %v6591_v48 = vld [vmem:[#allocation4 + $0xe0] sm:$0xff] }
 0x326   : > { %3010 = vst.msk [vmem:[#allocation4 + $0xf0] sm:$0xff] %vm2979_vm10, %v2932_v47  ;;  %4917 = vmatprep.mubr.msk.f32.mxu1 %vm3055_vm11, %v6591_v48 }
 0x327   : > { %4918 = vmatmul.mubr.msk.f32.gmra.mrb[32].mxu1 %vm3055_vm11, %v6597_v19 }
 0x328   : > { %v2721_v55 = vpop.permute.xlu1 %2720 }
 0x329   : > { %2796 = vst.msk [vmem:[#allocation4 + $0x108] sm:$0xff] %vm2762_vm6, %v2721_v55  ;;  %v2719_v20 = vpop.permute.xlu0 %2718 }
 0x32a   : > { %2795 = vst.msk [vmem:[#allocation4 + $0x100] sm:$0xff] %vm2762_vm6, %v2719_v20 }
 0x32c   : > { %v2938_v37 = vpop.permute.xlu1 %2937  ;;  %v6612_v31 = vld [vmem:[#allocation4 + $0xf8] sm:$0xff] }
 0x32d   : > { %3013 = vst.msk [vmem:[#allocation4 + $0x108] sm:$0xff] %vm2979_vm10, %v2938_v37  ;;  %v2936_v21 = vpop.permute.xlu0 %2935  ;;  %v6606_v62 = vld [vmem:[#allocation4 + $0xf0] sm:$0xff] }
 0x32e   : > { %3012 = vst.msk [vmem:[#allocation4 + $0x100] sm:$0xff] %vm2979_vm10, %v2936_v21  ;;  %4920 = vmatprep.mubr.msk.f32.mxu1 %vm3055_vm11, %v6606_v62 }
 0x32f   : > { %4921 = vmatmul.mubr.msk.f32.gmra.mrb[34].mxu1 %vm3055_vm11, %v6612_v31 }
 0x330   : > { %v2874_v43 = vpop.permute.xlu1 %2873 }
 0x331   : > { %v2872_v32 = vpop.permute.xlu0 %2871  ;;  %2981 = vst.msk [vmem:[#allocation4 + $0x8] sm:$0xff] %vm2979_vm10, %v2874_v43 }
 0x332   : > { %2980 = vst.msk [vmem:[#allocation4] sm:$0xff] %vm2979_vm10, %v2872_v32 }
 0x334   : > { %v2725_v8 = vpop.permute.xlu1 %2724  ;;  %v6627_v50 = vld [vmem:[#allocation4 + $0x108] sm:$0xff] }
 0x335   : > { %v6622_v36 = vld [vmem:[#allocation4 + $0x100] sm:$0xff]  ;;  %v2723_v38 = vpop.permute.xlu0 %2722  ;;  %2798 = vst.msk [vmem:[#allocation4 + $0x118] sm:$0xff] %vm2762_vm6, %v2725_v8 }
 0x336   : > { %4923 = vmatprep.mubr.msk.f32.mxu1 %vm3055_vm11, %v6622_v36  ;;  %2797 = vst.msk [vmem:[#allocation4 + $0x110] sm:$0xff] %vm2762_vm6, %v2723_v38 }
 0x337   : > { %4924 = vmatmul.mubr.msk.f32.gmra.mrb[36].mxu1 %vm3055_vm11, %v6627_v50 }
 0x338   : > { %v3017_v5 = vld [vmem:[#allocation4 + $0x8] sm:$0xff]  ;;  %v2942_v59 = vpop.permute.xlu1 %2941 }
 0x339   : > { %v3016_v16 = vld [vmem:[#allocation4] sm:$0xff]  ;;  %v2940_v11 = vpop.permute.xlu0 %2939  ;;  %3015 = vst.msk [vmem:[#allocation4 + $0x118] sm:$0xff] %vm2979_vm10, %v2942_v59 }
 0x33a   : > { %4930 = vmatprep.mubr.msk.f32.mxu1 %vm3055_vm11, %v3016_v16  ;;  %3014 = vst.msk [vmem:[#allocation4 + $0x110] sm:$0xff] %vm2979_vm10, %v2940_v11 }
 0x33b   : > { %4931 = vmatmul.mubr.msk.f32.vlgmr.msra.gmra.mrb[6].mxu1 %vm3055_vm11, %v3017_v5 }
 0x33c   : > { %5059 = vmatpush3.bf16.msk.msra.mxu1 %vm6170_vm9, %v6408_v2  ;;  %4933 = vmatprep.mubr.msk.f32.mxu1 %vm3055_vm11, %v6406_v51  ;;  %v687_v14 = vpop.permute.xlu1 %686 }
 0x33d   : > { %v685_v15 = vpop.permute.xlu0 %684  ;;  %768 = vst.msk [vmem:[#allocation2 + $0x138] sm:$0xff] %vm728_vm1, %v687_v14 }
 0x33e   : > { %767 = vst.msk [vmem:[#allocation2 + $0x130] sm:$0xff] %vm728_vm1, %v685_v15 }
 0x33f   : > { %4934 = vmatmul.mubr.msk.f32.gmra.mrb[8].mxu1 %vm3055_vm11, %v6413_v4 }
 0x340   : > { %4936 = vmatprep.mubr.msk.f32.mxu1 %vm3055_vm11, %v6432_v60  ;;  %v968_v17 = vpop.permute.xlu1 %967  ;;  %v3646_v4 = vld [vmem:[#allocation4 + $0x118] sm:$0xff] }
 0x341   : > { %v966_v18 = vpop.permute.xlu0 %965  ;;  %1049 = vst.msk [vmem:[#allocation2 + $0x138] sm:$0xff] %vm1009_vm2, %v968_v17  ;;  %v3645_v2 = vld [vmem:[#allocation4 + $0x110] sm:$0xff] }
 0x342   : > { %1048 = vst.msk [vmem:[#allocation2 + $0x130] sm:$0xff] %vm1009_vm2, %v966_v18 }
 0x343   : > { %4937 = vmatmul.mubr.msk.f32.gmra.mrb[10].mxu1 %vm3055_vm11, %v6437_v1 }
 0x344   : > { %4939 = vmatprep.mubr.msk.f32.mxu1 %vm3055_vm11, %v6457_v25 }
 0x347   : > { %4940 = vmatmul.mubr.msk.f32.gmra.mrb[12].mxu1 %vm3055_vm11, %v6462_v26 }
 0x348   : > { %4942 = vmatprep.mubr.msk.f32.mxu1 %vm3055_vm11, %v6471_v33  ;;  %v1735_v0 = vld [vmem:[#allocation2 + $0x138] sm:$0xff] }
 0x349   : > { %v1734_v51 = vld [vmem:[#allocation2 + $0x130] sm:$0xff] }
 0x34a   : > { %4871 = vmatprep.mubr.msk.f32.mxu0 %vm1095_vm3, %v1734_v51 }
 0x34b   : > { %4943 = vmatmul.mubr.msk.f32.gmra.mrb[14].mxu1 %vm3055_vm11, %v6476_v34  ;;  %4872 = vmatmul.mubr.msk.f32.gmra.mrb[40].mxu0 %vm1095_vm3, %v1735_v0 }
 0x34c   : > { %4945 = vmatprep.mubr.msk.f32.mxu1 %vm3055_vm11, %v6483_v41 }
 0x34f   : > { %4946 = vmatmul.mubr.msk.f32.gmra.mrb[16].mxu1 %vm3055_vm11, %v6488_v10 }
 0x350   : > { %4948 = vmatprep.mubr.msk.f32.mxu1 %vm3055_vm11, %v6495_v49 }
 0x353   : > { %4949 = vmatmul.mubr.msk.f32.gmra.mrb[18].mxu1 %vm3055_vm11, %v6500_v53 }
 0x354   : > { %4951 = vmatprep.mubr.msk.f32.mxu1 %vm3055_vm11, %v6507_v28 }
 0x357   : > { %4952 = vmatmul.mubr.msk.f32.gmra.mrb[20].mxu1 %vm3055_vm11, %v6512_v56 }
 0x358   : > { %4954 = vmatprep.mubr.msk.f32.mxu1 %vm3055_vm11, %v6519_v6 }
 0x35b   : > { %4955 = vmatmul.mubr.msk.f32.gmra.mrb[22].mxu1 %vm3055_vm11, %v6524_v7 }
 0x35c   : > { %4957 = vmatprep.mubr.msk.f32.mxu1 %vm3055_vm11, %v6531_v58 }
 0x35f   : > { %4958 = vmatmul.mubr.msk.f32.gmra.mrb[24].mxu1 %vm3055_vm11, %v6536_v9 }
 0x360   : > { %4960 = vmatprep.mubr.msk.f32.mxu1 %vm3055_vm11, %v6543_v44 }
 0x363   : > { %4961 = vmatmul.mubr.msk.f32.gmra.mrb[26].mxu1 %vm3055_vm11, %v6548_v45 }
 0x364   : > { %4963 = vmatprep.mubr.msk.f32.mxu1 %vm3055_vm11, %v6555_v12 }
 0x367   : > { %4964 = vmatmul.mubr.msk.f32.gmra.mrb[28].mxu1 %vm3055_vm11, %v6560_v13 }
 0x368   : > { %4966 = vmatprep.mubr.msk.f32.mxu1 %vm3055_vm11, %v6567_v22 }
 0x36b   : > { %4967 = vmatmul.mubr.msk.f32.gmra.mrb[30].mxu1 %vm3055_vm11, %v6572_v23 }
 0x36c   : > { %4969 = vmatprep.mubr.msk.f32.mxu1 %vm3055_vm11, %v6579_v3 }
 0x36f   : > { %4970 = vmatmul.mubr.msk.f32.gmra.mrb[32].mxu1 %vm3055_vm11, %v6584_v35 }
 0x370   : > { %4972 = vmatprep.mubr.msk.f32.mxu1 %vm3055_vm11, %v6591_v48 }
 0x373   : > { %4973 = vmatmul.mubr.msk.f32.gmra.mrb[34].mxu1 %vm3055_vm11, %v6597_v19 }
 0x374   : > { %4975 = vmatprep.mubr.msk.f32.mxu1 %vm3055_vm11, %v6606_v62 }
 0x377   : > { %4976 = vmatmul.mubr.msk.f32.gmra.mrb[36].mxu1 %vm3055_vm11, %v6612_v31 }
 0x378   : > { %4982 = vmatprep.mubr.msk.f32.mxu1 %vm3055_vm11, %v6432_v60 }
 0x37b   : > { %4983 = vmatmul.mubr.msk.f32.vlgmr.msra.gmra.mrb[6].mxu1 %vm3055_vm11, %v6437_v1 }
 0x37c   : > { %4985 = vmatprep.mubr.msk.f32.mxu1 %vm3055_vm11, %v6457_v25  ;;  %v6775_v25 = vld [vmem:[%s4006_s25] ss:$0 sm:$0xff] }
 0x37f   : > { %4986 = vmatmul.mubr.msk.f32.gmra.mrb[8].mxu1 %vm3055_vm11, %v6462_v26 }
 0x380   : > { %4988 = vmatprep.mubr.msk.f32.mxu1 %vm3055_vm11, %v6471_v33  ;;  %v6777_v33 = vld [vmem:[%s4044_s28] ss:$0 sm:$0xff] }
 0x383   : > { %4989 = vmatmul.mubr.msk.f32.gmra.mrb[10].mxu1 %vm3055_vm11, %v6476_v34 }
 0x384   : > { %4991 = vmatprep.mubr.msk.f32.mxu1 %vm3055_vm11, %v6483_v41 }
 0x387   : > { %4992 = vmatmul.mubr.msk.f32.gmra.mrb[12].mxu1 %vm3055_vm11, %v6488_v10 }
 0x388   : > { %4994 = vmatprep.mubr.msk.f32.mxu1 %vm3055_vm11, %v6495_v49 }
 0x38b   : > { %4995 = vmatmul.mubr.msk.f32.gmra.mrb[14].mxu1 %vm3055_vm11, %v6500_v53 }
 0x38c   : > { %4997 = vmatprep.mubr.msk.f32.mxu1 %vm3055_vm11, %v6507_v28 }
 0x38f   : > { %4998 = vmatmul.mubr.msk.f32.gmra.mrb[16].mxu1 %vm3055_vm11, %v6512_v56 }
 0x390   : > { %5000 = vmatprep.mubr.msk.f32.mxu1 %vm3055_vm11, %v6519_v6 }
 0x393   : > { %5001 = vmatmul.mubr.msk.f32.gmra.mrb[18].mxu1 %vm3055_vm11, %v6524_v7 }
 0x394   : > { %5003 = vmatprep.mubr.msk.f32.mxu1 %vm3055_vm11, %v6531_v58 }
 0x397   : > { %5004 = vmatmul.mubr.msk.f32.gmra.mrb[20].mxu1 %vm3055_vm11, %v6536_v9 }
 0x398   : > { %5006 = vmatprep.mubr.msk.f32.mxu1 %vm3055_vm11, %v6543_v44 }
 0x39b   : > { %5007 = vmatmul.mubr.msk.f32.gmra.mrb[22].mxu1 %vm3055_vm11, %v6548_v45 }
 0x39c   : > { %5009 = vmatprep.mubr.msk.f32.mxu1 %vm3055_vm11, %v6555_v12 }
 0x39f   : > { %5010 = vmatmul.mubr.msk.f32.gmra.mrb[24].mxu1 %vm3055_vm11, %v6560_v13 }
 0x3a0   : > { %5012 = vmatprep.mubr.msk.f32.mxu1 %vm3055_vm11, %v6567_v22 }
 0x3a3   : > { %5013 = vmatmul.mubr.msk.f32.gmra.mrb[26].mxu1 %vm3055_vm11, %v6572_v23 }
 0x3a4   : > { %5015 = vmatprep.mubr.msk.f32.mxu1 %vm3055_vm11, %v6579_v3 }
 0x3a7   : > { %5016 = vmatmul.mubr.msk.f32.gmra.mrb[28].mxu1 %vm3055_vm11, %v6584_v35 }
 0x3a8   : > { %5018 = vmatprep.mubr.msk.f32.mxu1 %vm3055_vm11, %v6591_v48 }
 0x3ab   : > { %5019 = vmatmul.mubr.msk.f32.gmra.mrb[30].mxu1 %vm3055_vm11, %v6597_v19 }
 0x3ac   : > { %5021 = vmatprep.mubr.msk.f32.mxu1 %vm3055_vm11, %v6606_v62 }
 0x3af   : > { %5022 = vmatmul.mubr.msk.f32.gmra.mrb[32].mxu1 %vm3055_vm11, %v6612_v31 }
 0x3b0   : > { %5024 = vmatprep.mubr.msk.f32.mxu1 %vm3055_vm11, %v6622_v36 }
 0x3b3   : > { %5025 = vmatmul.mubr.msk.f32.gmra.mrb[34].mxu1 %vm3055_vm11, %v6627_v50 }
 0x3b4   : > { %5027 = vmatprep.mubr.msk.f32.mxu1 %vm3055_vm11, %v3645_v2 }
 0x3b7   : > { %5028 = vmatmul.mubr.msk.f32.gmra.mrb[36].mxu1 %vm3055_vm11, %v3646_v4 }
 0x41e   : > { %v4873_v60 = vpop.f32.mrb[40].mxu0 }
 0x41f   : > { %v2084_v1 = vpop.f32.mrb[41].mxu0 }
 0x44e   : > { %v4984_v26 = vpop.f32.mrb[6].mxu1 }
 0x44f   : > { %v4013_v34 = vmul.f32 %v4984_v26, %v6775_v25  ;;  %v3815_v41 = vpop.f32.mrb[7].mxu1 }
 0x450   : > { %v4012_v10 = vmul.f32 %v6775_v25, %v3815_v41 }
 0x451   : > { %v4051_v49 = vadd.f32 %v6777_v33, %v4013_v34 }
 0x452   : > { %v4050_v53 = vadd.f32 %v6777_v33, %v4012_v10  ;;  %v4987_v28 = vpop.f32.mrb[8].mxu1 }
 0x453   : > { %v4083_v56 = vmax.f32 %v4051_v49, 0.0  ;;  %v4015_v6 = vmul.f32 %v4987_v28, %v6775_v25  ;;  %v3825_v7 = vpop.f32.mrb[9].mxu1 }
 0x454   : > { %v4082_v58 = vmax.f32 %v4050_v53, 0.0  ;;  %v4014_v9 = vmul.f32 %v6775_v25, %v3825_v7 }
 0x455   : > { %4115 = vst.msk [vmem:[%s6786_s17 + $0x8] sm:$0xff] %vm2436_vm4, %v4083_v56  ;;  %v4053_v44 = vadd.f32 %v6777_v33, %v4015_v6 }
 0x456   : > { %4114 = vst.msk [vmem:[%s6786_s17] sm:$0xff] %vm2436_vm4, %v4082_v58  ;;  %v4052_v45 = vadd.f32 %v6777_v33, %v4014_v9  ;;  %v4990_v12 = vpop.f32.mrb[10].mxu1 }
 0x457   : > { %v4085_v13 = vmax.f32 %v4053_v44, 0.0  ;;  %v4017_v22 = vmul.f32 %v4990_v12, %v6775_v25  ;;  %v3835_v23 = vpop.f32.mrb[11].mxu1 }
 0x458   : > { %v4084_v24 = vmax.f32 %v4052_v45, 0.0  ;;  %v4016_v27 = vmul.f32 %v6775_v25, %v3835_v23 }
 0x459   : > { %4117 = vst.msk [vmem:[%s6786_s17 + $0x18] sm:$0xff] %vm2436_vm4, %v4085_v13  ;;  %v4055_v29 = vadd.f32 %v6777_v33, %v4017_v22 }
 0x45a   : > { %4116 = vst.msk [vmem:[%s6786_s17 + $0x10] sm:$0xff] %vm2436_vm4, %v4084_v24  ;;  %v4054_v30 = vadd.f32 %v6777_v33, %v4016_v27  ;;  %v4993_v3 = vpop.f32.mrb[12].mxu1 }
 0x45b   : > { %v4087_v35 = vmax.f32 %v4055_v29, 0.0  ;;  %v4019_v39 = vmul.f32 %v4993_v3, %v6775_v25  ;;  %v3845_v52 = vpop.f32.mrb[13].mxu1 }
 0x45c   : > { %v4086_v40 = vmax.f32 %v4054_v30, 0.0  ;;  %v4018_v46 = vmul.f32 %v6775_v25, %v3845_v52 }
 0x45d   : > { %4119 = vst.msk [vmem:[%s6786_s17 + $0x28] sm:$0xff] %vm2436_vm4, %v4087_v35  ;;  %v4057_v47 = vadd.f32 %v6777_v33, %v4019_v39 }
 0x45e   : > { %4118 = vst.msk [vmem:[%s6786_s17 + $0x20] sm:$0xff] %vm2436_vm4, %v4086_v40  ;;  %v4056_v48 = vadd.f32 %v6777_v33, %v4018_v46  ;;  %v4996_v19 = vpop.f32.mrb[14].mxu1 }
 0x45f   : > { %v4089_v54 = vmax.f32 %v4057_v47, 0.0  ;;  %v4021_v55 = vmul.f32 %v4996_v19, %v6775_v25  ;;  %v3855_v20 = vpop.f32.mrb[15].mxu1 }
 0x460   : > { %v4088_v37 = vmax.f32 %v4056_v48, 0.0  ;;  %v4020_v61 = vmul.f32 %v6775_v25, %v3855_v20 }
 0x461   : > { %4121 = vst.msk [vmem:[%s6786_s17 + $0x38] sm:$0xff] %vm2436_vm4, %v4089_v54  ;;  %v4059_v21 = vadd.f32 %v6777_v33, %v4021_v55 }
 0x462   : > { %4120 = vst.msk [vmem:[%s6786_s17 + $0x30] sm:$0xff] %vm2436_vm4, %v4088_v37  ;;  %v4058_v62 = vadd.f32 %v6777_v33, %v4020_v61  ;;  %v4999_v63 = vpop.f32.mrb[16].mxu1 }
 0x463   : > { %v4091_v31 = vmax.f32 %v4059_v21, 0.0  ;;  %v4023_v42 = vmul.f32 %v4999_v63, %v6775_v25  ;;  %v3865_v43 = vpop.f32.mrb[17].mxu1 }
 0x464   : > { %v4090_v57 = vmax.f32 %v4058_v62, 0.0  ;;  %v4022_v32 = vmul.f32 %v6775_v25, %v3865_v43 }
 0x465   : > { %4123 = vst.msk [vmem:[%s6786_s17 + $0x48] sm:$0xff] %vm2436_vm4, %v4091_v31  ;;  %v4061_v8 = vadd.f32 %v6777_v33, %v4023_v42 }
 0x466   : > { %4122 = vst.msk [vmem:[%s6786_s17 + $0x40] sm:$0xff] %vm2436_vm4, %v4090_v57  ;;  %v4060_v36 = vadd.f32 %v6777_v33, %v4022_v32  ;;  %v5002_v38 = vpop.f32.mrb[18].mxu1 }
 0x467   : > { %v4093_v50 = vmax.f32 %v4061_v8, 0.0  ;;  %v4025_v5 = vmul.f32 %v5002_v38, %v6775_v25  ;;  %v3875_v59 = vpop.f32.mrb[19].mxu1 }
 0x468   : > { %v4092_v16 = vmax.f32 %v4060_v36, 0.0  ;;  %v4024_v11 = vmul.f32 %v6775_v25, %v3875_v59 }
 0x469   : > { %4125 = vst.msk [vmem:[%s6786_s17 + $0x58] sm:$0xff] %vm2436_vm4, %v4093_v50  ;;  %v4063_v14 = vadd.f32 %v6777_v33, %v4025_v5 }
 0x46a   : > { %4124 = vst.msk [vmem:[%s6786_s17 + $0x50] sm:$0xff] %vm2436_vm4, %v4092_v16  ;;  %v4062_v15 = vadd.f32 %v6777_v33, %v4024_v11  ;;  %v5005_v17 = vpop.f32.mrb[20].mxu1 }
 0x46b   : > { %v4095_v18 = vmax.f32 %v4063_v14, 0.0  ;;  %v4027_v0 = vmul.f32 %v5005_v17, %v6775_v25  ;;  %v3885_v51 = vpop.f32.mrb[21].mxu1 }
 0x46c   : > { %v4094_v2 = vmax.f32 %v4062_v15, 0.0  ;;  %v4026_v4 = vmul.f32 %v6775_v25, %v3885_v51 }
 0x46d   : > { %4127 = vst.msk [vmem:[%s6786_s17 + $0x68] sm:$0xff] %vm2436_vm4, %v4095_v18  ;;  %v4065_v60 = vadd.f32 %v6777_v33, %v4027_v0 }
 0x46e   : > { %4126 = vst.msk [vmem:[%s6786_s17 + $0x60] sm:$0xff] %vm2436_vm4, %v4094_v2  ;;  %v4064_v1 = vadd.f32 %v6777_v33, %v4026_v4  ;;  %v5008_v26 = vpop.f32.mrb[22].mxu1 }
 0x46f   : > { %v4097_v34 = vmax.f32 %v4065_v60, 0.0  ;;  %v4029_v41 = vmul.f32 %v5008_v26, %v6775_v25  ;;  %v3895_v10 = vpop.f32.mrb[23].mxu1 }
 0x470   : > { %v4096_v49 = vmax.f32 %v4064_v1, 0.0  ;;  %v4028_v53 = vmul.f32 %v6775_v25, %v3895_v10 }
 0x471   : > { %4129 = vst.msk [vmem:[%s6786_s17 + $0x78] sm:$0xff] %vm2436_vm4, %v4097_v34  ;;  %v4067_v28 = vadd.f32 %v6777_v33, %v4029_v41 }
 0x472   : > { %4128 = vst.msk [vmem:[%s6786_s17 + $0x70] sm:$0xff] %vm2436_vm4, %v4096_v49  ;;  %v4066_v56 = vadd.f32 %v6777_v33, %v4028_v53  ;;  %v5011_v6 = vpop.f32.mrb[24].mxu1 }
 0x473   : > { %v4099_v7 = vmax.f32 %v4067_v28, 0.0  ;;  %v4031_v58 = vmul.f32 %v5011_v6, %v6775_v25  ;;  %v3905_v9 = vpop.f32.mrb[25].mxu1 }
 0x474   : > { %v4098_v44 = vmax.f32 %v4066_v56, 0.0  ;;  %v4030_v45 = vmul.f32 %v6775_v25, %v3905_v9 }
 0x475   : > { %4131 = vst.msk [vmem:[%s6786_s17 + $0x88] sm:$0xff] %vm2436_vm4, %v4099_v7  ;;  %v4069_v12 = vadd.f32 %v6777_v33, %v4031_v58 }
 0x476   : > { %4130 = vst.msk [vmem:[%s6786_s17 + $0x80] sm:$0xff] %vm2436_vm4, %v4098_v44  ;;  %v4068_v13 = vadd.f32 %v6777_v33, %v4030_v45  ;;  %v5014_v22 = vpop.f32.mrb[26].mxu1 }
 0x477   : > { %v4101_v23 = vmax.f32 %v4069_v12, 0.0  ;;  %v4033_v24 = vmul.f32 %v5014_v22, %v6775_v25  ;;  %v3915_v27 = vpop.f32.mrb[27].mxu1 }
 0x478   : > { %v4100_v29 = vmax.f32 %v4068_v13, 0.0  ;;  %v4032_v30 = vmul.f32 %v6775_v25, %v3915_v27 }
 0x479   : > { %4133 = vst.msk [vmem:[%s6786_s17 + $0x98] sm:$0xff] %vm2436_vm4, %v4101_v23  ;;  %v4071_v3 = vadd.f32 %v6777_v33, %v4033_v24 }
 0x47a   : > { %4132 = vst.msk [vmem:[%s6786_s17 + $0x90] sm:$0xff] %vm2436_vm4, %v4100_v29  ;;  %v4070_v35 = vadd.f32 %v6777_v33, %v4032_v30  ;;  %v5017_v39 = vpop.f32.mrb[28].mxu1 }
 0x47b   : > { %v4103_v52 = vmax.f32 %v4071_v3, 0.0  ;;  %v4035_v40 = vmul.f32 %v5017_v39, %v6775_v25  ;;  %v3925_v46 = vpop.f32.mrb[29].mxu1 }
 0x47c   : > { %v4102_v47 = vmax.f32 %v4070_v35, 0.0  ;;  %v4034_v48 = vmul.f32 %v6775_v25, %v3925_v46 }
 0x47d   : > { %4135 = vst.msk [vmem:[%s6786_s17 + $0xa8] sm:$0xff] %vm2436_vm4, %v4103_v52  ;;  %v4073_v19 = vadd.f32 %v6777_v33, %v4035_v40 }
 0x47e   : > { %4134 = vst.msk [vmem:[%s6786_s17 + $0xa0] sm:$0xff] %vm2436_vm4, %v4102_v47  ;;  %v4072_v54 = vadd.f32 %v6777_v33, %v4034_v48  ;;  %v5020_v55 = vpop.f32.mrb[30].mxu1 }
 0x47f   : > { %v4105_v20 = vmax.f32 %v4073_v19, 0.0  ;;  %v4037_v37 = vmul.f32 %v5020_v55, %v6775_v25  ;;  %v3935_v61 = vpop.f32.mrb[31].mxu1 }
 0x480   : > { %v4104_v21 = vmax.f32 %v4072_v54, 0.0  ;;  %v4036_v62 = vmul.f32 %v6775_v25, %v3935_v61 }
 0x481   : > { %4137 = vst.msk [vmem:[%s6786_s17 + $0xb8] sm:$0xff] %vm2436_vm4, %v4105_v20  ;;  %v4075_v63 = vadd.f32 %v6777_v33, %v4037_v37 }
 0x482   : > { %4136 = vst.msk [vmem:[%s6786_s17 + $0xb0] sm:$0xff] %vm2436_vm4, %v4104_v21  ;;  %v4074_v31 = vadd.f32 %v6777_v33, %v4036_v62  ;;  %v5023_v42 = vpop.f32.mrb[32].mxu1 }
 0x483   : > { %v4107_v43 = vmax.f32 %v4075_v63, 0.0  ;;  %v4039_v57 = vmul.f32 %v5023_v42, %v6775_v25  ;;  %v3945_v32 = vpop.f32.mrb[33].mxu1 }
 0x484   : > { %v4106_v8 = vmax.f32 %v4074_v31, 0.0  ;;  %v4038_v36 = vmul.f32 %v6775_v25, %v3945_v32 }
 0x485   : > { %4139 = vst.msk [vmem:[%s6786_s17 + $0xc8] sm:$0xff] %vm2436_vm4, %v4107_v43  ;;  %v4077_v38 = vadd.f32 %v6777_v33, %v4039_v57 }
 0x486   : > { %4138 = vst.msk [vmem:[%s6786_s17 + $0xc0] sm:$0xff] %vm2436_vm4, %v4106_v8  ;;  %v4076_v50 = vadd.f32 %v6777_v33, %v4038_v36  ;;  %v5026_v5 = vpop.f32.mrb[34].mxu1 }
 0x487   : > { %v4109_v59 = vmax.f32 %v4077_v38, 0.0  ;;  %v4041_v16 = vmul.f32 %v5026_v5, %v6775_v25  ;;  %v3955_v11 = vpop.f32.mrb[35].mxu1 }
 0x488   : > { %v4108_v14 = vmax.f32 %v4076_v50, 0.0  ;;  %v4040_v15 = vmul.f32 %v6775_v25, %v3955_v11 }
 0x489   : > { %4141 = vst.msk [vmem:[%s6786_s17 + $0xd8] sm:$0xff] %vm2436_vm4, %v4109_v59  ;;  %v4079_v17 = vadd.f32 %v6777_v33, %v4041_v16 }
 0x48a   : > { %4140 = vst.msk [vmem:[%s6786_s17 + $0xd0] sm:$0xff] %vm2436_vm4, %v4108_v14  ;;  %v4078_v18 = vadd.f32 %v6777_v33, %v4040_v15  ;;  %v5029_v0 = vpop.f32.mrb[36].mxu1 }
 0x48b   : > { %v4111_v51 = vmax.f32 %v4079_v17, 0.0  ;;  %v4043_v2 = vmul.f32 %v5029_v0, %v6775_v25  ;;  %v3965_v4 = vpop.f32.mrb[37].mxu1 }
 0x48c   : > { %v4110_v60 = vmax.f32 %v4078_v18, 0.0  ;;  %v4042_v1 = vmul.f32 %v6775_v25, %v3965_v4 }
 0x48d   : > { %4143 = vst.msk [vmem:[%s6786_s17 + $0xe8] sm:$0xff] %vm2436_vm4, %v4111_v51  ;;  %v4081_v26 = vadd.f32 %v6777_v33, %v4043_v2 }
 0x48e   : > { %4142 = vst.msk [vmem:[%s6786_s17 + $0xe0] sm:$0xff] %vm2436_vm4, %v4110_v60  ;;  %v4080_v34 = vadd.f32 %v6777_v33, %v4042_v1 }
 0x48f   : > { %v4113_v41 = vmax.f32 %v4081_v26, 0.0 }
 0x490   : > { %v4112_v10 = vmax.f32 %v4080_v34, 0.0 }
 0x491   : > { %4145 = vst.msk [vmem:[%s6786_s17 + $0xf8] sm:$0xff] %vm2436_vm4, %v4113_v41 }
 0x492   : > { %4144 = vst.msk [vmem:[%s6786_s17 + $0xf0] sm:$0xff] %vm2436_vm4, %v4112_v10 }
 0x493 PF: > { %s19_s11 = sadd.s32 1, %s5246_s11   ;;  %s6934_s30 = smov %s5242_s10 }
 0x494   : > { %p16_p5 = scmp.ge.s32.totalorder %s19_s11, 6   ;;  %s6935_s10 = smov %s6937_s12 }
 0x496   :  { %18 = sbr.rel (!%p16_p5) target bundleno = 2 (0x2), region = 97 }

</bundles_post_ra>
